<compile_context>
chip_gen: v7x
topology: tpu7x:2x2x1
jax: 0.10.0
libtpu: 0.0.40
codegen_flags: <defaults>
</compile_context>

<pallas_src>
import functools

import jax
import jax.numpy as jnp
from jax.experimental import pallas as pl
from jax.experimental.pallas import tpu as pltpu

BN_EPS = 1e-5


def _round_up(v, m):
    return (v + m - 1) // m * m


# ----------------------------------------------------------------------------
# Fused C3 kernel (one grid step == one image, everything stays in VMEM)
# ----------------------------------------------------------------------------
def _c3_kernel(
    x_ref,                                  # (1, M, C1)
    w1_ref, s1_ref, b1_ref,                 # cv1: (C1,c_), (1,c_), (1,c_)
    w2_ref, s2_ref, b2_ref,                 # cv2
    wb1_ref, sb1_ref, bb1_ref,              # bottleneck 1x1: (n,c_,c_), (n,1,c_), (n,1,c_)
    wb2_ref, sb2_ref, bb2_ref,              # bottleneck 3x3: (9n,c_,c_), (n,1,c_), (n,1,c_)
    w3a_ref, w3b_ref, s3_ref, b3_ref,       # cv3 split into two K chunks
    ml_ref, mr_ref,                         # (M,c_) column masks for dw=0 / dw=2
    o_ref,                                  # (1, M, C2)
    hp_ref,                                 # scratch: (M + 2P, c_) f32 halo-padded copy
    *, n, c_, H, W, P, shortcut, compute_dtype,
):
    M = H * W
    cd = compute_dtype
    f32 = jnp.float32

    def bn_silu(acc, scale, bias):
        y = acc * scale + bias              # f32 epilogue
        return y * jax.nn.sigmoid(y)        # SiLU in f32 (EUP)

    x = x_ref[0]                            # (M, C1) in compute dtype

    # Stem: cv1 and cv2 share the resident input tile (no HBM round trip).
    y1 = bn_silu(jnp.dot(x, w1_ref[...], preferred_element_type=f32),
                 s1_ref[...], b1_ref[...])                          # (M, c_) f32
    y2 = bn_silu(jnp.dot(x, w2_ref[...], preferred_element_type=f32),
                 s2_ref[...], b2_ref[...])                          # (M, c_) f32

    # Zero only the halo pad rows; the interior is rewritten per bottleneck.
    # (Done every step -> safe under megacore grid sharding.)
    zpad = jnp.zeros((P, c_), f32)
    hp_ref[pl.ds(0, P), :] = zpad
    hp_ref[pl.ds(P + M, P), :] = zpad

    mask_l = ml_ref[...]                    # 1.0 where column w-1 is in bounds
    mask_r = mr_ref[...]                    # 1.0 where column w+1 is in bounds

    for i in range(n):                      # static unroll over bottlenecks
        # 1x1 conv -> BN -> SiLU
        h = bn_silu(jnp.dot(y1.astype(cd), wb1_ref[i], preferred_element_type=f32),
                    sb1_ref[i], bb1_ref[i])                         # (M, c_) f32

        # 3x3 SAME conv as 9 shifted matmuls over the padded scratch copy.
        hp_ref[pl.ds(P, M), :] = h
        acc = jnp.zeros((M, c_), f32)
        for dh in range(3):
            for dw in range(3):
                shift = (dh - 1) * W + (dw - 1)
                sh = hp_ref[pl.ds(P + shift, M), :]                 # (M, c_) f32
                if dw == 0:
                    sh = sh * mask_l
                elif dw == 2:
                    sh = sh * mask_r
                acc = acc + jnp.dot(sh.astype(cd),
                                    wb2_ref[i * 9 + dh * 3 + dw],
                                    preferred_element_type=f32)
        bout = bn_silu(acc, sb2_ref[i], bb2_ref[i])
        y1 = y1 + bout if shortcut else bout

    # cv3 on [y1 | y2]: two K-block accumulations, concat never materialized.
    acc3 = (jnp.dot(y1.astype(cd), w3a_ref[...], preferred_element_type=f32)
            + jnp.dot(y2.astype(cd), w3b_ref[...], preferred_element_type=f32))
    out = bn_silu(acc3, s3_ref[...], b3_ref[...])
    o_ref[0] = out.astype(o_ref.dtype)


# ----------------------------------------------------------------------------
# Wrapper: builds flat weights / masks and launches the single fused kernel
# ----------------------------------------------------------------------------
def c3_forward(x_nhwc, params, shortcut=True, compute_dtype=jnp.float32):
    N, H, W, C1 = x_nhwc.shape
    M = H * W
    c_ = params["cv1"]["w2d"].shape[1]
    c2 = params["cv3"]["w2d"].shape[1]
    n = len(params["m"])
    cd = compute_dtype
    f32 = jnp.float32
    P = _round_up(W + 1, 8)                 # halo pad rows (sublane-aligned)

    x = x_nhwc.reshape(N, M, C1).astype(cd)

    def _sc_bias(p):
        c = p["scale"].shape[0]
        return (p["scale"].reshape(1, c).astype(f32),
                p["bias"].reshape(1, c).astype(f32))

    w1 = params["cv1"]["w2d"].astype(cd)
    w2 = params["cv2"]["w2d"].astype(cd)
    s1, b1 = _sc_bias(params["cv1"])
    s2, b2 = _sc_bias(params["cv2"])
    w3 = params["cv3"]["w2d"].astype(cd)                  # (2*c_, c2)
    w3a, w3b = w3[:c_], w3[c_:]
    s3, b3 = _sc_bias(params["cv3"])

    if n > 0:
        wb1 = jnp.stack([bp["cv1"]["w2d"] for bp in params["m"]]).astype(cd)
        wb2 = jnp.concatenate(
            [bp["cv2"]["w_hwio"].reshape(9, c_, c_) for bp in params["m"]],
            axis=0).astype(cd)                            # (9n, c_, c_)
        sb1 = jnp.stack([bp["cv1"]["scale"].reshape(1, c_) for bp in params["m"]]).astype(f32)
        bb1 = jnp.stack([bp["cv1"]["bias"].reshape(1, c_) for bp in params["m"]]).astype(f32)
        sb2 = jnp.stack([bp["cv2"]["scale"].reshape(1, c_) for bp in params["m"]]).astype(f32)
        bb2 = jnp.stack([bp["cv2"]["bias"].reshape(1, c_) for bp in params["m"]]).astype(f32)
    else:  # dummies (never indexed; kernel loop has zero iterations)
        wb1 = jnp.zeros((1, c_, c_), cd)
        wb2 = jnp.zeros((9, c_, c_), cd)
        sb1 = bb1 = sb2 = bb2 = jnp.zeros((1, 1, c_), f32)
    nb = max(n, 1)

    # Column-wrap masks, pre-broadcast to (M, c_) so no in-kernel broadcast.
    col = jnp.arange(M, dtype=jnp.int32) % W
    mask_l = jnp.broadcast_to((col != 0).astype(f32).reshape(M, 1), (M, c_))
    mask_r = jnp.broadcast_to((col != (W - 1)).astype(f32).reshape(M, 1), (M, c_))

    kernel = functools.partial(
        _c3_kernel, n=n, c_=c_, H=H, W=W, P=P,
        shortcut=bool(shortcut), compute_dtype=cd)

    def full(*dims):
        return pl.BlockSpec(dims, lambda i, _d=dims: (0,) * len(_d))

    # Advisory cost hint for XLA's scheduler around the custom call.
    out_itemsize = jnp.dtype(x_nhwc.dtype).itemsize

    def _nbytes(a):
        return int(a.size) * jnp.dtype(a.dtype).itemsize

    flops = N * (4 * M * C1 * c_                # cv1 + cv2
                 + n * 20 * M * c_ * c_         # bottleneck 1x1 + 3x3
                 + 4 * M * c_ * c2)             # cv3
    transcendentals = N * (2 * M * c_ + n * 2 * M * c_ + M * c2)
    bytes_accessed = (_nbytes(x) + N * M * c2 * out_itemsize
                      + sum(_nbytes(a) for a in
                            (w1, w2, w3a, w3b, wb1, wb2, s1, b1, s2, b2,
                             s3, b3, sb1, bb1, sb2, bb2, mask_l, mask_r)))
    cost = pl.CostEstimate(flops=int(flops),
                           transcendentals=int(transcendentals),
                           bytes_accessed=int(bytes_accessed))

    out = pl.pallas_call(
        kernel,
        out_shape=jax.ShapeDtypeStruct((N, M, c2), x_nhwc.dtype),
        grid=(N,),
        in_specs=[
            pl.BlockSpec((1, M, C1), lambda i: (i, 0, 0)),           # x (one image)
            full(C1, c_), full(1, c_), full(1, c_),                  # cv1
            full(C1, c_), full(1, c_), full(1, c_),                  # cv2
            full(nb, c_, c_), full(nb, 1, c_), full(nb, 1, c_),      # bottleneck 1x1
            full(9 * nb, c_, c_), full(nb, 1, c_), full(nb, 1, c_),  # bottleneck 3x3
            full(c_, c2), full(c_, c2), full(1, c2), full(1, c2),    # cv3
            full(M, c_), full(M, c_),                                # column masks
        ],
        out_specs=pl.BlockSpec((1, M, c2), lambda i: (i, 0, 0)),
        scratch_shapes=[pltpu.VMEM((M + 2 * P, c_), jnp.float32)],
        compiler_params=pltpu.CompilerParams(
            dimension_semantics=("parallel",)),
        cost_estimate=cost,
    )(x, w1, s1, b1, w2, s2, b2,
      wb1, sb1, bb1, wb2, sb2, bb2,
      w3a, w3b, s3, b3, mask_l, mask_r)
    return out.reshape(N, H, W, c2)


# ----------------------------------------------------------------------------
# Deterministic parameter construction (Conv = conv(no bias) + BN folded)
# ----------------------------------------------------------------------------
def make_conv_params(key, cin, cout, k):
    kw, kg, kb, km, kv = jax.random.split(key, 5)
    fan_in = cin * k * k
    w = jax.random.normal(kw, (k, k, cin, cout), jnp.float32) / jnp.sqrt(
        jnp.float32(fan_in))
    gamma = 1.0 + 0.1 * jax.random.normal(kg, (cout,), jnp.float32)
    beta = 0.1 * jax.random.normal(kb, (cout,), jnp.float32)
    run_mean = 0.1 * jax.random.normal(km, (cout,), jnp.float32)
    run_var = 1.0 + 0.5 * jax.random.uniform(kv, (cout,), jnp.float32)
    scale = gamma / jnp.sqrt(run_var + BN_EPS)
    bias = beta - run_mean * scale
    return {
        "w_hwio": w,
        "w2d": w.reshape(k * k * cin, cout),
        "scale": scale,
        "bias": bias,
    }


def make_c3_params(key, c1, c2, n=1, e=0.5):
    c_ = int(c2 * e)
    keys = jax.random.split(key, 3 + 2 * n)
    params = {
        "cv1": make_conv_params(keys[0], c1, c_, 1),
        "cv2": make_conv_params(keys[1], c1, c_, 1),
        "cv3": make_conv_params(keys[2], 2 * c_, c2, 1),
        "m": [],
    }
    for i in range(n):
        params["m"].append({
            "cv1": make_conv_params(keys[3 + 2 * i], c_, c_, 1),
            "cv2": make_conv_params(keys[4 + 2 * i], c_, c_, 3),
        })
    return params


# ----------------------------------------------------------------------------
# Pure-JAX reference (for correctness checking only)
# ----------------------------------------------------------------------------
def _conv_ref(x, p, k):
    pad = "SAME" if k == 3 else "VALID"
    y = jax.lax.conv_general_dilated(
        x, p["w_hwio"], (1, 1), pad, dimension_numbers=("NHWC", "HWIO", "NHWC"))
    y = y * p["scale"] + p["bias"]
    return y * jax.nn.sigmoid(y)


def c3_ref(x, params, shortcut=True):
    y1 = _conv_ref(x, params["cv1"], 1)
    for bp in params["m"]:
        h = _conv_ref(y1, bp["cv1"], 1)
        h = _conv_ref(h, bp["cv2"], 3)
        y1 = y1 + h if shortcut else h
    y2 = _conv_ref(x, params["cv2"], 1)
    return _conv_ref(jnp.concatenate([y1, y2], axis=-1), params["cv3"], 1)


# ----------------------------------------------------------------------------
if __name__ == "__main__":
    key = jax.random.PRNGKey(0)
    kx, kp = jax.random.split(key)

    # PyTorch module sees NCHW (2, 16, 16, 16); we run NHWC internally.
    N, C1, H, W = 2, 16, 16, 16
    C2, n_blocks = 16, 1
    x_nchw = jax.random.normal(kx, (N, C1, H, W), jnp.float32)
    x_nhwc = jnp.transpose(x_nchw, (0, 2, 3, 1))

    params = make_c3_params(kp, C1, C2, n=n_blocks, e=0.5)
    ref = jax.block_until_ready(c3_ref(x_nhwc, params, shortcut=True))

    fwd = jax.jit(c3_forward, static_argnames=("shortcut", "compute_dtype"))

    # f32 compute path: tight correctness check of the fused kernel.
    out_f32 = jax.block_until_ready(
        fwd(x_nhwc, params, shortcut=True, compute_dtype=jnp.float32))
    assert out_f32.shape == (N, H, W, C2), out_f32.shape
    assert jnp.allclose(out_f32, ref, rtol=1e-3, atol=1e-3), float(
        jnp.max(jnp.abs(out_f32 - ref)))

    # bf16 MXU path (perf-preferred on v6e/v7x): sanity bound vs f32 reference.
    out_bf16 = jax.block_until_ready(
        fwd(x_nhwc, params, shortcut=True, compute_dtype=jnp.bfloat16))
    assert out_bf16.shape == (N, H, W, C2), out_bf16.shape
    assert float(jnp.max(jnp.abs(out_bf16 - ref))) < 0.25

    print("KERNEL_OK")
</pallas_src>

<mosaic_0001>
module attributes {stable_mosaic.version = 11 : i64} {
  func.func @_c3_kernel(%arg0: i32, %arg1: memref<1x256x16xf32, #tpu.memory_space<vmem>>, %arg2: memref<16x8xf32, #tpu.memory_space<vmem>>, %arg3: memref<1x8xf32, #tpu.memory_space<vmem>>, %arg4: memref<1x8xf32, #tpu.memory_space<vmem>>, %arg5: memref<16x8xf32, #tpu.memory_space<vmem>>, %arg6: memref<1x8xf32, #tpu.memory_space<vmem>>, %arg7: memref<1x8xf32, #tpu.memory_space<vmem>>, %arg8: memref<1x8x8xf32, #tpu.memory_space<vmem>>, %arg9: memref<1x1x8xf32, #tpu.memory_space<vmem>>, %arg10: memref<1x1x8xf32, #tpu.memory_space<vmem>>, %arg11: memref<9x8x8xf32, #tpu.memory_space<vmem>>, %arg12: memref<1x1x8xf32, #tpu.memory_space<vmem>>, %arg13: memref<1x1x8xf32, #tpu.memory_space<vmem>>, %arg14: memref<8x16xf32, #tpu.memory_space<vmem>>, %arg15: memref<8x16xf32, #tpu.memory_space<vmem>>, %arg16: memref<1x16xf32, #tpu.memory_space<vmem>>, %arg17: memref<1x16xf32, #tpu.memory_space<vmem>>, %arg18: memref<256x8xf32, #tpu.memory_space<vmem>>, %arg19: memref<256x8xf32, #tpu.memory_space<vmem>>, %arg20: memref<1x256x16xf32, #tpu.memory_space<vmem>>, %arg21: memref<304x8xf32, #tpu.memory_space<vmem>>) attributes {dimension_semantics = [#tpu.dimension_semantics<parallel>], iteration_bounds = array<i64: 2>, scalar_prefetch = 0 : i64, scratch_operands = 1 : i64, tpu.core_type = #tpu.core_type<tc>, window_params = [{transform_indices = @transform_0, window_bounds = array<i64: 1, 256, 16>}, {pipeline_mode = #tpu.pipeline_mode<synchronous>, transform_indices = @transform_1, window_bounds = array<i64: 16, 8>}, {pipeline_mode = #tpu.pipeline_mode<synchronous>, transform_indices = @transform_2, window_bounds = array<i64: 1, 8>}, {pipeline_mode = #tpu.pipeline_mode<synchronous>, transform_indices = @transform_3, window_bounds = array<i64: 1, 8>}, {pipeline_mode = #tpu.pipeline_mode<synchronous>, transform_indices = @transform_4, window_bounds = array<i64: 16, 8>}, {pipeline_mode = #tpu.pipeline_mode<synchronous>, transform_indices = @transform_5, window_bounds = array<i64: 1, 8>}, {pipeline_mode = #tpu.pipeline_mode<synchronous>, transform_indices = @transform_6, window_bounds = array<i64: 1, 8>}, {pipeline_mode = #tpu.pipeline_mode<synchronous>, transform_indices = @transform_7, window_bounds = array<i64: 1, 8, 8>}, {pipeline_mode = #tpu.pipeline_mode<synchronous>, transform_indices = @transform_8, window_bounds = array<i64: 1, 1, 8>}, {pipeline_mode = #tpu.pipeline_mode<synchronous>, transform_indices = @transform_9, window_bounds = array<i64: 1, 1, 8>}, {pipeline_mode = #tpu.pipeline_mode<synchronous>, transform_indices = @transform_10, window_bounds = array<i64: 9, 8, 8>}, {pipeline_mode = #tpu.pipeline_mode<synchronous>, transform_indices = @transform_11, window_bounds = array<i64: 1, 1, 8>}, {pipeline_mode = #tpu.pipeline_mode<synchronous>, transform_indices = @transform_12, window_bounds = array<i64: 1, 1, 8>}, {pipeline_mode = #tpu.pipeline_mode<synchronous>, transform_indices = @transform_13, window_bounds = array<i64: 8, 16>}, {pipeline_mode = #tpu.pipeline_mode<synchronous>, transform_indices = @transform_14, window_bounds = array<i64: 8, 16>}, {pipeline_mode = #tpu.pipeline_mode<synchronous>, transform_indices = @transform_15, window_bounds = array<i64: 1, 16>}, {pipeline_mode = #tpu.pipeline_mode<synchronous>, transform_indices = @transform_16, window_bounds = array<i64: 1, 16>}, {pipeline_mode = #tpu.pipeline_mode<synchronous>, transform_indices = @transform_17, window_bounds = array<i64: 256, 8>}, {pipeline_mode = #tpu.pipeline_mode<synchronous>, transform_indices = @transform_18, window_bounds = array<i64: 256, 8>}, {transform_indices = @transform_19, window_bounds = array<i64: 1, 256, 16>}]} {
    %c0 = arith.constant 0 : index
    %c0_0 = arith.constant 0 : index
    %c0_1 = arith.constant 0 : index
    %0 = vector.load %arg1[%c0, %c0_0, %c0_1] : memref<1x256x16xf32, #tpu.memory_space<vmem>>, vector<1x256x16xf32>
    %1 = vector.shape_cast %0 : vector<1x256x16xf32> to vector<256x16xf32>
    %c0_2 = arith.constant 0 : index
    %c0_3 = arith.constant 0 : index
    %2 = vector.load %arg2[%c0_2, %c0_3] : memref<16x8xf32, #tpu.memory_space<vmem>>, vector<16x8xf32>
    %cst = arith.constant dense<0.000000e+00> : vector<256x8xf32>
    %3 = tpu.matmul %1, %2, %cst {dimension_numbers = #tpu.dot_dimension_numbers<[1], [0], [0], [1], [0, 0, 1, 1], [], []>} : vector<256x16xf32>, vector<16x8xf32>, vector<256x8xf32> -> vector<256x8xf32>
    %c0_4 = arith.constant 0 : index
    %c0_5 = arith.constant 0 : index
    %4 = vector.load %arg3[%c0_4, %c0_5] : memref<1x8xf32, #tpu.memory_space<vmem>>, vector<1x8xf32>
    %c0_6 = arith.constant 0 : index
    %c0_7 = arith.constant 0 : index
    %5 = vector.load %arg4[%c0_6, %c0_7] : memref<1x8xf32, #tpu.memory_space<vmem>>, vector<1x8xf32>
    %6 = vector.broadcast %4 : vector<1x8xf32> to vector<256x8xf32>
    %7 = arith.mulf %3, %6 : vector<256x8xf32>
    %8 = vector.broadcast %5 : vector<1x8xf32> to vector<256x8xf32>
    %9 = arith.addf %7, %8 : vector<256x8xf32>
    %10 = arith.negf %9 : vector<256x8xf32>
    %11 = math.exp %10 : vector<256x8xf32>
    %cst_8 = arith.constant 1.000000e+00 : f32
    %12 = vector.broadcast %cst_8 : f32 to vector<256x8xf32>
    %13 = arith.addf %12, %11 : vector<256x8xf32>
    %14 = arith.divf %12, %13 : vector<256x8xf32>
    %15 = arith.mulf %9, %14 : vector<256x8xf32>
    %c0_9 = arith.constant 0 : index
    %c0_10 = arith.constant 0 : index
    %16 = vector.load %arg5[%c0_9, %c0_10] : memref<16x8xf32, #tpu.memory_space<vmem>>, vector<16x8xf32>
    %cst_11 = arith.constant dense<0.000000e+00> : vector<256x8xf32>
    %17 = tpu.matmul %1, %16, %cst_11 {dimension_numbers = #tpu.dot_dimension_numbers<[1], [0], [0], [1], [0, 0, 1, 1], [], []>} : vector<256x16xf32>, vector<16x8xf32>, vector<256x8xf32> -> vector<256x8xf32>
    %c0_12 = arith.constant 0 : index
    %c0_13 = arith.constant 0 : index
    %18 = vector.load %arg6[%c0_12, %c0_13] : memref<1x8xf32, #tpu.memory_space<vmem>>, vector<1x8xf32>
    %c0_14 = arith.constant 0 : index
    %c0_15 = arith.constant 0 : index
    %19 = vector.load %arg7[%c0_14, %c0_15] : memref<1x8xf32, #tpu.memory_space<vmem>>, vector<1x8xf32>
    %20 = vector.broadcast %18 : vector<1x8xf32> to vector<256x8xf32>
    %21 = arith.mulf %17, %20 : vector<256x8xf32>
    %22 = vector.broadcast %19 : vector<1x8xf32> to vector<256x8xf32>
    %23 = arith.addf %21, %22 : vector<256x8xf32>
    %24 = arith.negf %23 : vector<256x8xf32>
    %25 = math.exp %24 : vector<256x8xf32>
    %cst_16 = arith.constant 1.000000e+00 : f32
    %26 = vector.broadcast %cst_16 : f32 to vector<256x8xf32>
    %27 = arith.addf %26, %25 : vector<256x8xf32>
    %28 = arith.divf %26, %27 : vector<256x8xf32>
    %29 = arith.mulf %23, %28 : vector<256x8xf32>
    %cst_17 = arith.constant 0.000000e+00 : f32
    %30 = vector.broadcast %cst_17 : f32 to vector<24x8xf32>
    %c0_18 = arith.constant 0 : index
    %c0_19 = arith.constant 0 : index
    %31 = vector.load %arg21[%c0_18, %c0_19] : memref<304x8xf32, #tpu.memory_space<vmem>>, vector<24x8xf32>
    tpu.vector_store %arg21[%c0_18, %c0_19], %30 {strides = array<i32>} : memref<304x8xf32, #tpu.memory_space<vmem>>, vector<24x8xf32>,
    %c280 = arith.constant 280 : index
    %c0_20 = arith.constant 0 : index
    %32 = vector.load %arg21[%c280, %c0_20] : memref<304x8xf32, #tpu.memory_space<vmem>>, vector<24x8xf32>
    tpu.vector_store %arg21[%c280, %c0_20], %30 {strides = array<i32>} : memref<304x8xf32, #tpu.memory_space<vmem>>, vector<24x8xf32>,
    %c0_21 = arith.constant 0 : index
    %c0_22 = arith.constant 0 : index
    %33 = vector.load %arg18[%c0_21, %c0_22] : memref<256x8xf32, #tpu.memory_space<vmem>>, vector<256x8xf32>
    %c0_23 = arith.constant 0 : index
    %c0_24 = arith.constant 0 : index
    %34 = vector.load %arg19[%c0_23, %c0_24] : memref<256x8xf32, #tpu.memory_space<vmem>>, vector<256x8xf32>
    %c0_25 = arith.constant 0 : index
    %c0_26 = arith.constant 0 : index
    %c0_27 = arith.constant 0 : index
    %35 = vector.load %arg8[%c0_25, %c0_26, %c0_27] : memref<1x8x8xf32, #tpu.memory_space<vmem>>, vector<1x8x8xf32>
    %36 = vector.shape_cast %35 : vector<1x8x8xf32> to vector<8x8xf32>
    %cst_28 = arith.constant dense<0.000000e+00> : vector<256x8xf32>
    %37 = tpu.matmul %15, %36, %cst_28 {dimension_numbers = #tpu.dot_dimension_numbers<[1], [0], [0], [1], [0, 0, 1, 1], [], []>} : vector<256x8xf32>, vector<8x8xf32>, vector<256x8xf32> -> vector<256x8xf32>
    %c0_29 = arith.constant 0 : index
    %c0_30 = arith.constant 0 : index
    %c0_31 = arith.constant 0 : index
    %38 = vector.load %arg9[%c0_29, %c0_30, %c0_31] : memref<1x1x8xf32, #tpu.memory_space<vmem>>, vector<1x1x8xf32>
    %39 = vector.shape_cast %38 : vector<1x1x8xf32> to vector<1x8xf32>
    %c0_32 = arith.constant 0 : index
    %c0_33 = arith.constant 0 : index
    %c0_34 = arith.constant 0 : index
    %40 = vector.load %arg10[%c0_32, %c0_33, %c0_34] : memref<1x1x8xf32, #tpu.memory_space<vmem>>, vector<1x1x8xf32>
    %41 = vector.shape_cast %40 : vector<1x1x8xf32> to vector<1x8xf32>
    %42 = vector.broadcast %39 : vector<1x8xf32> to vector<256x8xf32>
    %43 = arith.mulf %37, %42 : vector<256x8xf32>
    %44 = vector.broadcast %41 : vector<1x8xf32> to vector<256x8xf32>
    %45 = arith.addf %43, %44 : vector<256x8xf32>
    %46 = arith.negf %45 : vector<256x8xf32>
    %47 = math.exp %46 : vector<256x8xf32>
    %cst_35 = arith.constant 1.000000e+00 : f32
    %48 = vector.broadcast %cst_35 : f32 to vector<256x8xf32>
    %49 = arith.addf %48, %47 : vector<256x8xf32>
    %50 = arith.divf %48, %49 : vector<256x8xf32>
    %51 = arith.mulf %45, %50 : vector<256x8xf32>
    %c24 = arith.constant 24 : index
    %c0_36 = arith.constant 0 : index
    %52 = vector.load %arg21[%c24, %c0_36] : memref<304x8xf32, #tpu.memory_space<vmem>>, vector<256x8xf32>
    tpu.vector_store %arg21[%c24, %c0_36], %51 {strides = array<i32>} : memref<304x8xf32, #tpu.memory_space<vmem>>, vector<256x8xf32>,
    %cst_37 = arith.constant 0.000000e+00 : f32
    %53 = vector.broadcast %cst_37 : f32 to vector<256x8xf32>
    %c7 = arith.constant 7 : index
    %c0_38 = arith.constant 0 : index
    %54 = vector.load %arg21[%c7, %c0_38] : memref<304x8xf32, #tpu.memory_space<vmem>>, vector<256x8xf32>
    %55 = arith.mulf %54, %33 : vector<256x8xf32>
    %c0_39 = arith.constant 0 : index
    %c0_40 = arith.constant 0 : index
    %c0_41 = arith.constant 0 : index
    %56 = vector.load %arg11[%c0_39, %c0_40, %c0_41] : memref<9x8x8xf32, #tpu.memory_space<vmem>>, vector<1x8x8xf32>
    %57 = vector.shape_cast %56 : vector<1x8x8xf32> to vector<8x8xf32>
    %cst_42 = arith.constant dense<0.000000e+00> : vector<256x8xf32>
    %58 = tpu.matmul %55, %57, %cst_42 {dimension_numbers = #tpu.dot_dimension_numbers<[1], [0], [0], [1], [0, 0, 1, 1], [], []>} : vector<256x8xf32>, vector<8x8xf32>, vector<256x8xf32> -> vector<256x8xf32>
    %59 = arith.addf %53, %58 : vector<256x8xf32>
    %c8 = arith.constant 8 : index
    %c0_43 = arith.constant 0 : index
    %60 = vector.load %arg21[%c8, %c0_43] : memref<304x8xf32, #tpu.memory_space<vmem>>, vector<256x8xf32>
    %c1 = arith.constant 1 : index
    %c0_44 = arith.constant 0 : index
    %c0_45 = arith.constant 0 : index
    %61 = vector.load %arg11[%c1, %c0_44, %c0_45] : memref<9x8x8xf32, #tpu.memory_space<vmem>>, vector<1x8x8xf32>
    %62 = vector.shape_cast %61 : vector<1x8x8xf32> to vector<8x8xf32>
    %cst_46 = arith.constant dense<0.000000e+00> : vector<256x8xf32>
    %63 = tpu.matmul %60, %62, %cst_46 {dimension_numbers = #tpu.dot_dimension_numbers<[1], [0], [0], [1], [0, 0, 1, 1], [], []>} : vector<256x8xf32>, vector<8x8xf32>, vector<256x8xf32> -> vector<256x8xf32>
    %64 = arith.addf %59, %63 : vector<256x8xf32>
    %c9 = arith.constant 9 : index
    %c0_47 = arith.constant 0 : index
    %65 = vector.load %arg21[%c9, %c0_47] : memref<304x8xf32, #tpu.memory_space<vmem>>, vector<256x8xf32>
    %66 = arith.mulf %65, %34 : vector<256x8xf32>
    %c2 = arith.constant 2 : index
    %c0_48 = arith.constant 0 : index
    %c0_49 = arith.constant 0 : index
    %67 = vector.load %arg11[%c2, %c0_48, %c0_49] : memref<9x8x8xf32, #tpu.memory_space<vmem>>, vector<1x8x8xf32>
    %68 = vector.shape_cast %67 : vector<1x8x8xf32> to vector<8x8xf32>
    %cst_50 = arith.constant dense<0.000000e+00> : vector<256x8xf32>
    %69 = tpu.matmul %66, %68, %cst_50 {dimension_numbers = #tpu.dot_dimension_numbers<[1], [0], [0], [1], [0, 0, 1, 1], [], []>} : vector<256x8xf32>, vector<8x8xf32>, vector<256x8xf32> -> vector<256x8xf32>
    %70 = arith.addf %64, %69 : vector<256x8xf32>
    %c23 = arith.constant 23 : index
    %c0_51 = arith.constant 0 : index
    %71 = vector.load %arg21[%c23, %c0_51] : memref<304x8xf32, #tpu.memory_space<vmem>>, vector<256x8xf32>
    %72 = arith.mulf %71, %33 : vector<256x8xf32>
    %c3 = arith.constant 3 : index
    %c0_52 = arith.constant 0 : index
    %c0_53 = arith.constant 0 : index
    %73 = vector.load %arg11[%c3, %c0_52, %c0_53] : memref<9x8x8xf32, #tpu.memory_space<vmem>>, vector<1x8x8xf32>
    %74 = vector.shape_cast %73 : vector<1x8x8xf32> to vector<8x8xf32>
    %cst_54 = arith.constant dense<0.000000e+00> : vector<256x8xf32>
    %75 = tpu.matmul %72, %74, %cst_54 {dimension_numbers = #tpu.dot_dimension_numbers<[1], [0], [0], [1], [0, 0, 1, 1], [], []>} : vector<256x8xf32>, vector<8x8xf32>, vector<256x8xf32> -> vector<256x8xf32>
    %76 = arith.addf %70, %75 : vector<256x8xf32>
    %c24_55 = arith.constant 24 : index
    %c0_56 = arith.constant 0 : index
    %77 = vector.load %arg21[%c24_55, %c0_56] : memref<304x8xf32, #tpu.memory_space<vmem>>, vector<256x8xf32>
    %c4 = arith.constant 4 : index
    %c0_57 = arith.constant 0 : index
    %c0_58 = arith.constant 0 : index
    %78 = vector.load %arg11[%c4, %c0_57, %c0_58] : memref<9x8x8xf32, #tpu.memory_space<vmem>>, vector<1x8x8xf32>
    %79 = vector.shape_cast %78 : vector<1x8x8xf32> to vector<8x8xf32>
    %cst_59 = arith.constant dense<0.000000e+00> : vector<256x8xf32>
    %80 = tpu.matmul %77, %79, %cst_59 {dimension_numbers = #tpu.dot_dimension_numbers<[1], [0], [0], [1], [0, 0, 1, 1], [], []>} : vector<256x8xf32>, vector<8x8xf32>, vector<256x8xf32> -> vector<256x8xf32>
    %81 = arith.addf %76, %80 : vector<256x8xf32>
    %c25 = arith.constant 25 : index
    %c0_60 = arith.constant 0 : index
    %82 = vector.load %arg21[%c25, %c0_60] : memref<304x8xf32, #tpu.memory_space<vmem>>, vector<256x8xf32>
    %83 = arith.mulf %82, %34 : vector<256x8xf32>
    %c5 = arith.constant 5 : index
    %c0_61 = arith.constant 0 : index
    %c0_62 = arith.constant 0 : index
    %84 = vector.load %arg11[%c5, %c0_61, %c0_62] : memref<9x8x8xf32, #tpu.memory_space<vmem>>, vector<1x8x8xf32>
    %85 = vector.shape_cast %84 : vector<1x8x8xf32> to vector<8x8xf32>
    %cst_63 = arith.constant dense<0.000000e+00> : vector<256x8xf32>
    %86 = tpu.matmul %83, %85, %cst_63 {dimension_numbers = #tpu.dot_dimension_numbers<[1], [0], [0], [1], [0, 0, 1, 1], [], []>} : vector<256x8xf32>, vector<8x8xf32>, vector<256x8xf32> -> vector<256x8xf32>
    %87 = arith.addf %81, %86 : vector<256x8xf32>
    %c39 = arith.constant 39 : index
    %c0_64 = arith.constant 0 : index
    %88 = vector.load %arg21[%c39, %c0_64] : memref<304x8xf32, #tpu.memory_space<vmem>>, vector<256x8xf32>
    %89 = arith.mulf %88, %33 : vector<256x8xf32>
    %c6 = arith.constant 6 : index
    %c0_65 = arith.constant 0 : index
    %c0_66 = arith.constant 0 : index
    %90 = vector.load %arg11[%c6, %c0_65, %c0_66] : memref<9x8x8xf32, #tpu.memory_space<vmem>>, vector<1x8x8xf32>
    %91 = vector.shape_cast %90 : vector<1x8x8xf32> to vector<8x8xf32>
    %cst_67 = arith.constant dense<0.000000e+00> : vector<256x8xf32>
    %92 = tpu.matmul %89, %91, %cst_67 {dimension_numbers = #tpu.dot_dimension_numbers<[1], [0], [0], [1], [0, 0, 1, 1], [], []>} : vector<256x8xf32>, vector<8x8xf32>, vector<256x8xf32> -> vector<256x8xf32>
    %93 = arith.addf %87, %92 : vector<256x8xf32>
    %c40 = arith.constant 40 : index
    %c0_68 = arith.constant 0 : index
    %94 = vector.load %arg21[%c40, %c0_68] : memref<304x8xf32, #tpu.memory_space<vmem>>, vector<256x8xf32>
    %c7_69 = arith.constant 7 : index
    %c0_70 = arith.constant 0 : index
    %c0_71 = arith.constant 0 : index
    %95 = vector.load %arg11[%c7_69, %c0_70, %c0_71] : memref<9x8x8xf32, #tpu.memory_space<vmem>>, vector<1x8x8xf32>
    %96 = vector.shape_cast %95 : vector<1x8x8xf32> to vector<8x8xf32>
    %cst_72 = arith.constant dense<0.000000e+00> : vector<256x8xf32>
    %97 = tpu.matmul %94, %96, %cst_72 {dimension_numbers = #tpu.dot_dimension_numbers<[1], [0], [0], [1], [0, 0, 1, 1], [], []>} : vector<256x8xf32>, vector<8x8xf32>, vector<256x8xf32> -> vector<256x8xf32>
    %98 = arith.addf %93, %97 : vector<256x8xf32>
    %c41 = arith.constant 41 : index
    %c0_73 = arith.constant 0 : index
    %99 = vector.load %arg21[%c41, %c0_73] : memref<304x8xf32, #tpu.memory_space<vmem>>, vector<256x8xf32>
    %100 = arith.mulf %99, %34 : vector<256x8xf32>
    %c8_74 = arith.constant 8 : index
    %c0_75 = arith.constant 0 : index
    %c0_76 = arith.constant 0 : index
    %101 = vector.load %arg11[%c8_74, %c0_75, %c0_76] : memref<9x8x8xf32, #tpu.memory_space<vmem>>, vector<1x8x8xf32>
    %102 = vector.shape_cast %101 : vector<1x8x8xf32> to vector<8x8xf32>
    %cst_77 = arith.constant dense<0.000000e+00> : vector<256x8xf32>
    %103 = tpu.matmul %100, %102, %cst_77 {dimension_numbers = #tpu.dot_dimension_numbers<[1], [0], [0], [1], [0, 0, 1, 1], [], []>} : vector<256x8xf32>, vector<8x8xf32>, vector<256x8xf32> -> vector<256x8xf32>
    %104 = arith.addf %98, %103 : vector<256x8xf32>
    %c0_78 = arith.constant 0 : index
    %c0_79 = arith.constant 0 : index
    %c0_80 = arith.constant 0 : index
    %105 = vector.load %arg12[%c0_78, %c0_79, %c0_80] : memref<1x1x8xf32, #tpu.memory_space<vmem>>, vector<1x1x8xf32>
    %106 = vector.shape_cast %105 : vector<1x1x8xf32> to vector<1x8xf32>
    %c0_81 = arith.constant 0 : index
    %c0_82 = arith.constant 0 : index
    %c0_83 = arith.constant 0 : index
    %107 = vector.load %arg13[%c0_81, %c0_82, %c0_83] : memref<1x1x8xf32, #tpu.memory_space<vmem>>, vector<1x1x8xf32>
    %108 = vector.shape_cast %107 : vector<1x1x8xf32> to vector<1x8xf32>
    %109 = vector.broadcast %106 : vector<1x8xf32> to vector<256x8xf32>
    %110 = arith.mulf %104, %109 : vector<256x8xf32>
    %111 = vector.broadcast %108 : vector<1x8xf32> to vector<256x8xf32>
    %112 = arith.addf %110, %111 : vector<256x8xf32>
    %113 = arith.negf %112 : vector<256x8xf32>
    %114 = math.exp %113 : vector<256x8xf32>
    %cst_84 = arith.constant 1.000000e+00 : f32
    %115 = vector.broadcast %cst_84 : f32 to vector<256x8xf32>
    %116 = arith.addf %115, %114 : vector<256x8xf32>
    %117 = arith.divf %115, %116 : vector<256x8xf32>
    %118 = arith.mulf %112, %117 : vector<256x8xf32>
    %119 = arith.addf %15, %118 : vector<256x8xf32>
    %c0_85 = arith.constant 0 : index
    %c0_86 = arith.constant 0 : index
    %120 = vector.load %arg14[%c0_85, %c0_86] : memref<8x16xf32, #tpu.memory_space<vmem>>, vector<8x16xf32>
    %cst_87 = arith.constant dense<0.000000e+00> : vector<256x16xf32>
    %121 = tpu.matmul %119, %120, %cst_87 {dimension_numbers = #tpu.dot_dimension_numbers<[1], [0], [0], [1], [0, 0, 1, 1], [], []>} : vector<256x8xf32>, vector<8x16xf32>, vector<256x16xf32> -> vector<256x16xf32>
    %c0_88 = arith.constant 0 : index
    %c0_89 = arith.constant 0 : index
    %122 = vector.load %arg15[%c0_88, %c0_89] : memref<8x16xf32, #tpu.memory_space<vmem>>, vector<8x16xf32>
    %cst_90 = arith.constant dense<0.000000e+00> : vector<256x16xf32>
    %123 = tpu.matmul %29, %122, %cst_90 {dimension_numbers = #tpu.dot_dimension_numbers<[1], [0], [0], [1], [0, 0, 1, 1], [], []>} : vector<256x8xf32>, vector<8x16xf32>, vector<256x16xf32> -> vector<256x16xf32>
    %124 = arith.addf %121, %123 : vector<256x16xf32>
    %c0_91 = arith.constant 0 : index
    %c0_92 = arith.constant 0 : index
    %125 = vector.load %arg16[%c0_91, %c0_92] : memref<1x16xf32, #tpu.memory_space<vmem>>, vector<1x16xf32>
    %c0_93 = arith.constant 0 : index
    %c0_94 = arith.constant 0 : index
    %126 = vector.load %arg17[%c0_93, %c0_94] : memref<1x16xf32, #tpu.memory_space<vmem>>, vector<1x16xf32>
    %127 = vector.broadcast %125 : vector<1x16xf32> to vector<256x16xf32>
    %128 = arith.mulf %124, %127 : vector<256x16xf32>
    %129 = vector.broadcast %126 : vector<1x16xf32> to vector<256x16xf32>
    %130 = arith.addf %128, %129 : vector<256x16xf32>
    %131 = arith.negf %130 : vector<256x16xf32>
    %132 = math.exp %131 : vector<256x16xf32>
    %cst_95 = arith.constant 1.000000e+00 : f32
    %133 = vector.broadcast %cst_95 : f32 to vector<256x16xf32>
    %134 = arith.addf %133, %132 : vector<256x16xf32>
    %135 = arith.divf %133, %134 : vector<256x16xf32>
    %136 = arith.mulf %130, %135 : vector<256x16xf32>
    %c0_96 = arith.constant 0 : index
    %c0_97 = arith.constant 0 : index
    %c0_98 = arith.constant 0 : index
    %137 = vector.load %arg20[%c0_96, %c0_97, %c0_98] : memref<1x256x16xf32, #tpu.memory_space<vmem>>, vector<1x256x16xf32>
    %138 = vector.shape_cast %137 : vector<1x256x16xf32> to vector<256x16xf32>
    %139 = vector.shape_cast %136 : vector<256x16xf32> to vector<1x256x16xf32>
    tpu.vector_store %arg20[%c0_96, %c0_97, %c0_98], %139 {strides = array<i32>} : memref<1x256x16xf32, #tpu.memory_space<vmem>>, vector<1x256x16xf32>,
    return
  }
  func.func @transform_0(%arg0: i32) -> (i32, i32, i32) {
    %c0_i32 = arith.constant 0 : i32
    %c0_i32_0 = arith.constant 0 : i32
    %c0_i32_1 = arith.constant 0 : i32
    return %arg0, %c0_i32, %c0_i32_0 : i32, i32, i32
  }
  func.func @transform_1(%arg0: i32) -> (i32, i32) {
    %c0_i32 = arith.constant 0 : i32
    %c0_i32_0 = arith.constant 0 : i32
    %c0_i32_1 = arith.constant 0 : i32
    return %c0_i32, %c0_i32_0 : i32, i32
  }
  func.func @transform_2(%arg0: i32) -> (i32, i32) {
    %c0_i32 = arith.constant 0 : i32
    %c0_i32_0 = arith.constant 0 : i32
    %c0_i32_1 = arith.constant 0 : i32
    return %c0_i32, %c0_i32_0 : i32, i32
  }
  func.func @transform_3(%arg0: i32) -> (i32, i32) {
    %c0_i32 = arith.constant 0 : i32
    %c0_i32_0 = arith.constant 0 : i32
    %c0_i32_1 = arith.constant 0 : i32
    return %c0_i32, %c0_i32_0 : i32, i32
  }
  func.func @transform_4(%arg0: i32) -> (i32, i32) {
    %c0_i32 = arith.constant 0 : i32
    %c0_i32_0 = arith.constant 0 : i32
    %c0_i32_1 = arith.constant 0 : i32
    return %c0_i32, %c0_i32_0 : i32, i32
  }
  func.func @transform_5(%arg0: i32) -> (i32, i32) {
    %c0_i32 = arith.constant 0 : i32
    %c0_i32_0 = arith.constant 0 : i32
    %c0_i32_1 = arith.constant 0 : i32
    return %c0_i32, %c0_i32_0 : i32, i32
  }
  func.func @transform_6(%arg0: i32) -> (i32, i32) {
    %c0_i32 = arith.constant 0 : i32
    %c0_i32_0 = arith.constant 0 : i32
    %c0_i32_1 = arith.constant 0 : i32
    return %c0_i32, %c0_i32_0 : i32, i32
  }
  func.func @transform_7(%arg0: i32) -> (i32, i32, i32) {
    %c0_i32 = arith.constant 0 : i32
    %c0_i32_0 = arith.constant 0 : i32
    %c0_i32_1 = arith.constant 0 : i32
    %c0_i32_2 = arith.constant 0 : i32
    return %c0_i32, %c0_i32_0, %c0_i32_1 : i32, i32, i32
  }
  func.func @transform_8(%arg0: i32) -> (i32, i32, i32) {
    %c0_i32 = arith.constant 0 : i32
    %c0_i32_0 = arith.constant 0 : i32
    %c0_i32_1 = arith.constant 0 : i32
    %c0_i32_2 = arith.constant 0 : i32
    return %c0_i32, %c0_i32_0, %c0_i32_1 : i32, i32, i32
  }
  func.func @transform_9(%arg0: i32) -> (i32, i32, i32) {
    %c0_i32 = arith.constant 0 : i32
    %c0_i32_0 = arith.constant 0 : i32
    %c0_i32_1 = arith.constant 0 : i32
    %c0_i32_2 = arith.constant 0 : i32
    return %c0_i32, %c0_i32_0, %c0_i32_1 : i32, i32, i32
  }
  func.func @transform_10(%arg0: i32) -> (i32, i32, i32) {
    %c0_i32 = arith.constant 0 : i32
    %c0_i32_0 = arith.constant 0 : i32
    %c0_i32_1 = arith.constant 0 : i32
    %c0_i32_2 = arith.constant 0 : i32
    return %c0_i32, %c0_i32_0, %c0_i32_1 : i32, i32, i32
  }
  func.func @transform_11(%arg0: i32) -> (i32, i32, i32) {
    %c0_i32 = arith.constant 0 : i32
    %c0_i32_0 = arith.constant 0 : i32
    %c0_i32_1 = arith.constant 0 : i32
    %c0_i32_2 = arith.constant 0 : i32
    return %c0_i32, %c0_i32_0, %c0_i32_1 : i32, i32, i32
  }
  func.func @transform_12(%arg0: i32) -> (i32, i32, i32) {
    %c0_i32 = arith.constant 0 : i32
    %c0_i32_0 = arith.constant 0 : i32
    %c0_i32_1 = arith.constant 0 : i32
    %c0_i32_2 = arith.constant 0 : i32
    return %c0_i32, %c0_i32_0, %c0_i32_1 : i32, i32, i32
  }
  func.func @transform_13(%arg0: i32) -> (i32, i32) {
    %c0_i32 = arith.constant 0 : i32
    %c0_i32_0 = arith.constant 0 : i32
    %c0_i32_1 = arith.constant 0 : i32
    return %c0_i32, %c0_i32_0 : i32, i32
  }
  func.func @transform_14(%arg0: i32) -> (i32, i32) {
    %c0_i32 = arith.constant 0 : i32
    %c0_i32_0 = arith.constant 0 : i32
    %c0_i32_1 = arith.constant 0 : i32
    return %c0_i32, %c0_i32_0 : i32, i32
  }
  func.func @transform_15(%arg0: i32) -> (i32, i32) {
    %c0_i32 = arith.constant 0 : i32
    %c0_i32_0 = arith.constant 0 : i32
    %c0_i32_1 = arith.constant 0 : i32
    return %c0_i32, %c0_i32_0 : i32, i32
  }
  func.func @transform_16(%arg0: i32) -> (i32, i32) {
    %c0_i32 = arith.constant 0 : i32
    %c0_i32_0 = arith.constant 0 : i32
    %c0_i32_1 = arith.constant 0 : i32
    return %c0_i32, %c0_i32_0 : i32, i32
  }
  func.func @transform_17(%arg0: i32) -> (i32, i32) {
    %c0_i32 = arith.constant 0 : i32
    %c0_i32_0 = arith.constant 0 : i32
    %c0_i32_1 = arith.constant 0 : i32
    return %c0_i32, %c0_i32_0 : i32, i32
  }
  func.func @transform_18(%arg0: i32) -> (i32, i32) {
    %c0_i32 = arith.constant 0 : i32
    %c0_i32_0 = arith.constant 0 : i32
    %c0_i32_1 = arith.constant 0 : i32
    return %c0_i32, %c0_i32_0 : i32, i32
  }
  func.func @transform_19(%arg0: i32) -> (i32, i32, i32) {
    %c0_i32 = arith.constant 0 : i32
    %c0_i32_0 = arith.constant 0 : i32
    %c0_i32_1 = arith.constant 0 : i32
    return %arg0, %c0_i32, %c0_i32_0 : i32, i32, i32
  }
}

</mosaic_0001>

<bundles_post_ra>
// kernel: c3_forward.1
= control target key start
LH: loop header
LB: loop body
LE: loop exit
PB: predicated region body
PF: predicated region fallthrough
CT: control target
= control target key end

     0   :  { %s13636_s0 = inlined_call_operand.vmem [shape: f32[2,256,16], index: 0, kind: input, shape index: {}]   ;;  %s13637_s1 = inlined_call_operand.vmem [shape: f32[16,8], index: 1, kind: input, shape index: {}]   ;;  %s13638_s2 = inlined_call_operand.vmem [shape: f32[1,8], index: 2, kind: input, shape index: {}]   ;;  %s13639_s3 = inlined_call_operand.vmem [shape: f32[1,8], index: 3, kind: input, shape index: {}]   ;;  %s13640_s4 = inlined_call_operand.vmem [shape: f32[16,8], index: 4, kind: input, shape index: {}]   ;;  %s13641_s5 = inlined_call_operand.vmem [shape: f32[1,8], index: 5, kind: input, shape index: {}]   ;;  %s13642_s6 = inlined_call_operand.vmem [shape: f32[1,8], index: 6, kind: input, shape index: {}]   ;;  %s13643_s7 = inlined_call_operand.vmem [shape: f32[1,8,8], index: 7, kind: input, shape index: {}]   ;;  %s13644_s8 = inlined_call_operand.vmem [shape: f32[1,1,8], index: 8, kind: input, shape index: {}]   ;;  %s13645_s9 = inlined_call_operand.vmem [shape: f32[1,1,8], index: 9, kind: input, shape index: {}]   ;;  %s13646_s10 = inlined_call_operand.vmem [shape: f32[9,8,8], index: 10, kind: input, shape index: {}]   ;;  %s13647_s11 = inlined_call_operand.vmem [shape: f32[1,1,8], index: 11, kind: input, shape index: {}]   ;;  %s13648_s12 = inlined_call_operand.vmem [shape: f32[1,1,8], index: 12, kind: input, shape index: {}]   ;;  %s13649_s13 = inlined_call_operand.vmem [shape: f32[8,16], index: 13, kind: input, shape index: {}]   ;;  %s13650_s14 = inlined_call_operand.vmem [shape: f32[8,16], index: 14, kind: input, shape index: {}]   ;;  %s13651_s15 = inlined_call_operand.vmem [shape: f32[1,16], index: 15, kind: input, shape index: {}]   ;;  %s13652_s16 = inlined_call_operand.vmem [shape: f32[1,16], index: 16, kind: input, shape index: {}]   ;;  %s13653_s17 = inlined_call_operand.vmem [shape: f32[256,8], index: 17, kind: input, shape index: {}]   ;;  %s13654_s18 = inlined_call_operand.vmem [shape: f32[256,8], index: 18, kind: input, shape index: {}]   ;;  %s13655_s19 = inlined_call_operand.hbm [shape: f32[2,256,16], index: 19, kind: output, shape index: {}]  }
   0x1   :  { %13714 = sst [smem:[#allocation133_spill]] %s13636_s0 }
   0x2   :  { %13715 = sst [smem:[#allocation134_spill]] %s13637_s1 }
   0x3   :  { %13716 = sst [smem:[#allocation135_spill]] %s13638_s2 }
   0x4   :  { %13717 = sst [smem:[#allocation136_spill]] %s13639_s3 }
   0x5   :  { %24 = vsyncpa [#allocation4], 0 }
   0x6   :  { %26 = vsyncpa [#allocation4 + $0x1], 0  ;;  %s10533_s0 = smov 0   ;;  %s10535_s30 = smov 0  }
   0x7   :  { %s10537_s20 = smov 0   ;;  %s10539_s21 = smov 0  }
   0x8 LB: > { %13718 = sst [smem:[#allocation6_spill]] %s10415_s0  ;;  %s10554_s1 = sadd.s32 4294967295, %s10427_s21   ;;  %s10427_s21 = sphi %s10539_s21, %s13975_s21   ;;  %s10423_s20 = sphi %s10537_s20, %s13977_s20   ;;  %s10419_s30 = sphi %s10535_s30, %s13979_s30   ;;  %s10415_s0 = sphi %s10533_s0, %s13978_s0  }
   0x9   : > { %13719 = sst [smem:[#allocation7_spill]] %s10423_s20  ;;  %s7513_s22 = sadd.s32 4294967294, %s10427_s21  }
   0xa   : > { %s10558_s2 = sadd.s32 1, %s10427_s21   ;;  %s443_s23 = sadd.s32 1, %s10423_s20 }
   0xb   : > { %13720 = sst [smem:[#allocation8_spill]] %s10558_s2  ;;  %s440_s24 = ssub.s32 %s10427_s21, %s10558_s2 }
   0xc   : > { %p453_p0 = scmp.ne.s32.totalorder %s10423_s20, %s10419_s30  ;;  %p441_p1 = scmp.eq.s32.totalorder %s440_s24, 0 }
   0xd   : > { %p454_p2 = scmp.eq.s32.totalorder %s10554_s1, 1  ;;  %p459_p3 = scmp.ne.s32.totalorder %s10419_s30, %s10415_s0 }
   0xe   : > { %p460_p4 = scmp.eq.s32.totalorder %s7513_s22, 1  ;;  %p7516_p7 = scmp.ge.s32.totalorder %s10427_s21, 1 }
   0xf   : > { %s10569_s25 = scalar_select %p441_p1, %s10423_s20, %s443_s23  }
  0x10   : > { %p10571_p5 = por %p454_p2, %p453_p0  ;;  %p10575_p6 = por %p460_p4, %p459_p3 }
  0x11   : > { %13721 = sst [smem:[#allocation9_spill]] %s10569_s25  ;;  %p540_p8 = scmp.lt.s32.totalorder %s10427_s21, 3 }
  0x12   : > { %s13723_s26 = scalar_select %p10575_p6, 1, 0 }
  0x13   : > { %p541_p9 = pnand %p7516_p7, %p540_p8 }
  0x14   : > { %13724 = sst [smem:[#allocation10_spill]] %s13723_s26 }
  0x15   : > { %544 = sbr.rel (%p541_p9) target bundleno = 1522 (0x5f2), region = 96 }
  0x1c   : > { %s13725_s29 = sld [smem:[#allocation134_spill]]  ;;  %p596_p10 = scmp.lt.s32.totalorder %s10554_s1, 1  ;;  %v1259_v2 = vld [vmem:[%s13640_s4] sm:$0xff]  ;;  %v1260_v4 = vld [vmem:[%s13640_s4 + $0x8] sm:$0xff]  ;;  %vm635_vm0 = vcmask 130048   ;;  %vm1788_vm1 = vcmask 64512  }
  0x1d   : > { %v9325_v5 = vpack.c.bf16 %v1260_v4, %v1259_v2  ;;  %s13726_s22 = sld [smem:[#allocation133_spill]]  ;;  %v10614_v9 = vld [vmem:[%s13643_s7] sm:$0xff]  ;;  %s13728_s28 = sld [smem:[#allocation136_spill]] }
  0x1e   : > { %s597_s26 = scalar_select %p596_p10, %s10554_s1, 1 }
  0x1f   : > { %s10430_s24 = smov [#allocation3]  }
  0x20   : > { %s8151_s27 = sshll.u32 %s597_s26, 8  ;;  %s13727_s26 = sld [smem:[#allocation135_spill]] }
  0x22   : > { %v633_v0 = vld [vmem:[%s13725_s29] sm:$0xff]  ;;  %v634_v1 = vld [vmem:[%s13725_s29 + $0x8] sm:$0xff] }
  0x23   : > { %v9321_v3 = vpack.c.bf16 %v634_v1, %v633_v0  ;;  %s10598_s23 = scalar_lea.vmem %s13726_s22, %s8151_s27  ;;  %v10731_v41 = vld [vmem:[%s13728_s28] ss:$0 sm:$0xff]  ;;  %s593_s27 = sand.u32 1, %s10419_s30  }
  0x24   : > { %v10601_v6 = vld [vmem:[%s10598_s23] sm:$0xff]  ;;  %v10604_v7 = vld [vmem:[%s10598_s23 + $0x8] sm:$0xff]  ;;  %v10607_v8 = vld [vmem:[%s10598_s23 + $0x10] sm:$0xff]  ;;  %s7517_s28 = sshll.u32 %s593_s27, 8 }
  0x25   : > { %9322 = vmatprep.subr.bf16.mxu0 %v9321_v3  ;;  %8621 = vmatprep.mubr.msk.f32.mxu0 %vm635_vm0, %v10601_v6  ;;  %v10621_v10 = vld [vmem:[%s10598_s23 + $0x18] sm:$0xff]  ;;  %v10624_v11 = vld [vmem:[%s10598_s23 + $0x20] sm:$0xff]  ;;  %v606_v12 = vld [vmem:[%s10598_s23 + $0x28] sm:$0xff]  ;;  %s13387_s22 = scalar_lea.vmem [#allocation3], %s7517_s28  ;;  %s10369_s28 = sshll.u32 %s10430_s24, 4  ;;  %s10370_s28 = int_to_ptr.vmem [resolvable:$false] %s10369_s28 }
  0x26   : > { %9324 = vmatpush3.bf16.msra.mxu0 %v9321_v3  ;;  %v607_v13 = vld [vmem:[%s10598_s23 + $0x30] sm:$0xff]  ;;  %v608_v14 = vld [vmem:[%s10598_s23 + $0x38] sm:$0xff]  ;;  %v609_v15 = vld [vmem:[%s10598_s23 + $0x40] sm:$0xff]  ;;  %s7451_s0 = sshll.u32 %s13387_s22, 4  ;;  %s13586_s0 = int_to_ptr.vmem [resolvable:$true] %s7451_s0 }
  0x27   : > { %9326 = vmatprep.subr.bf16.mxu0 %v9325_v5  ;;  %v610_v16 = vld [vmem:[%s10598_s23 + $0x48] sm:$0xff]  ;;  %v611_v17 = vld [vmem:[%s10598_s23 + $0x50] sm:$0xff]  ;;  %v612_v18 = vld [vmem:[%s10598_s23 + $0x58] sm:$0xff]  ;;  %p10372_p0 = scmp.lt.s32.totalorder %s13586_s0, %s10370_s28 }
  0x28   : > { %v613_v19 = vld [vmem:[%s10598_s23 + $0x60] sm:$0xff]  ;;  %v614_v20 = vld [vmem:[%s10598_s23 + $0x68] sm:$0xff]  ;;  %v615_v21 = vld [vmem:[%s10598_s23 + $0x70] sm:$0xff] }
  0x29   : > { %8622 = vmatmul.mubr.msk.f32.vlgmr.msra.gmra.mrb[0].mxu0 %vm635_vm0, %v10604_v7  ;;  %v616_v22 = vld [vmem:[%s10598_s23 + $0x78] sm:$0xff]  ;;  %v617_v23 = vld [vmem:[%s10598_s23 + $0x80] sm:$0xff]  ;;  %v618_v24 = vld [vmem:[%s10598_s23 + $0x88] sm:$0xff] }
  0x2a   : > { %8624 = vmatprep.mubr.msk.f32.mxu0 %vm635_vm0, %v10607_v8  ;;  %9328 = vmatpush3.bf16.msra.mxu0 %v9325_v5  ;;  %v619_v25 = vld [vmem:[%s10598_s23 + $0x90] sm:$0xff]  ;;  %v620_v26 = vld [vmem:[%s10598_s23 + $0x98] sm:$0xff]  ;;  %v621_v27 = vld [vmem:[%s10598_s23 + $0xa0] sm:$0xff] }
  0x2b   : > { %8721 = vmatprep.subr.mxu0 %v10614_v9  ;;  %v622_v28 = vld [vmem:[%s10598_s23 + $0xa8] sm:$0xff]  ;;  %v623_v29 = vld [vmem:[%s10598_s23 + $0xb0] sm:$0xff]  ;;  %v624_v30 = vld [vmem:[%s10598_s23 + $0xb8] sm:$0xff] }
  0x2c   : > { %v625_v31 = vld [vmem:[%s10598_s23 + $0xc0] sm:$0xff]  ;;  %v626_v32 = vld [vmem:[%s10598_s23 + $0xc8] sm:$0xff]  ;;  %v627_v33 = vld [vmem:[%s10598_s23 + $0xd0] sm:$0xff] }
  0x2d   : > { %8625 = vmatmul.mubr.msk.f32.gmra.mrb[2].mxu0 %vm635_vm0, %v10621_v10  ;;  %v628_v34 = vld [vmem:[%s10598_s23 + $0xd8] sm:$0xff]  ;;  %v629_v35 = vld [vmem:[%s10598_s23 + $0xe0] sm:$0xff]  ;;  %v630_v36 = vld [vmem:[%s10598_s23 + $0xe8] sm:$0xff] }
  0x2e   : > { %8627 = vmatprep.mubr.msk.f32.mxu0 %vm635_vm0, %v10624_v11  ;;  %v631_v37 = vld [vmem:[%s10598_s23 + $0xf0] sm:$0xff]  ;;  %v632_v38 = vld [vmem:[%s10598_s23 + $0xf8] sm:$0xff]  ;;  %v10726_v39 = vld [vmem:[%s13727_s26] ss:$0 sm:$0xff]  ;;  %s8152_s23 = sshll.u32 %s10554_s1, 12  ;;  %s13595_s1 = scalar_lea.sflag [#allocation4], %s593_s27 }
  0x2f   : > { %s13584_s25 = scalar_lea.hbm %s13655_s19, %s8152_s23  ;;  %s10365_s26 = scalar_lea.vmem %s13586_s0, 4096 }
  0x30   : > { %p10366_p11 = scmp.ne.s32.totalorder %s13586_s0, %s10365_s26  ;;  %s10371_s23 = scalar_lea.vmem %s10370_s28, 8192 }
  0x31   : > { %8628 = vmatmul.mubr.msk.f32.gmra.mrb[4].mxu0 %vm635_vm0, %v606_v12  ;;  %p10373_p1 = scmp.lt.s32.totalorder %s10371_s23, %s10365_s26 }
  0x32   : > { %8630 = vmatprep.mubr.msk.f32.mxu0 %vm635_vm0, %v607_v13  ;;  %p10367_p12 = pnand %p10366_p11, %p10571_p5 }
  0x33   : > { %p10374_p2 = por %p10373_p1, %p10372_p0 }
  0x34   : > { %p10368_p13 = pneg %p10367_p12 }
  0x35   : > { %8631 = vmatmul.mubr.msk.f32.gmra.mrb[6].mxu0 %vm635_vm0, %v608_v14 }
  0x36   : > { %8633 = vmatprep.mubr.msk.f32.mxu0 %vm635_vm0, %v609_v15  ;;  %p10375_p3 = pnand %p10374_p2, %p10368_p13 }
  0x39   : > { %8634 = vmatmul.mubr.msk.f32.gmra.mrb[8].mxu0 %vm635_vm0, %v610_v16 }
  0x3a   : > { %8636 = vmatprep.mubr.msk.f32.mxu0 %vm635_vm0, %v611_v17 }
  0x3d   : > { %8637 = vmatmul.mubr.msk.f32.gmra.mrb[10].mxu0 %vm635_vm0, %v612_v18 }
  0x3e   : > { %8639 = vmatprep.mubr.msk.f32.mxu0 %vm635_vm0, %v613_v19 }
  0x41   : > { %8640 = vmatmul.mubr.msk.f32.gmra.mrb[12].mxu0 %vm635_vm0, %v614_v20 }
  0x42   : > { %8642 = vmatprep.mubr.msk.f32.mxu0 %vm635_vm0, %v615_v21 }
  0x45   : > { %8643 = vmatmul.mubr.msk.f32.gmra.mrb[14].mxu0 %vm635_vm0, %v616_v22 }
  0x46   : > { %8645 = vmatprep.mubr.msk.f32.mxu0 %vm635_vm0, %v617_v23 }
  0x49   : > { %8646 = vmatmul.mubr.msk.f32.gmra.mrb[16].mxu0 %vm635_vm0, %v618_v24 }
  0x4a   : > { %8648 = vmatprep.mubr.msk.f32.mxu0 %vm635_vm0, %v619_v25 }
  0x4d   : > { %8649 = vmatmul.mubr.msk.f32.gmra.mrb[18].mxu0 %vm635_vm0, %v620_v26 }
  0x4e   : > { %8651 = vmatprep.mubr.msk.f32.mxu0 %vm635_vm0, %v621_v27 }
  0x51   : > { %8652 = vmatmul.mubr.msk.f32.gmra.mrb[20].mxu0 %vm635_vm0, %v622_v28 }
  0x52   : > { %8654 = vmatprep.mubr.msk.f32.mxu0 %vm635_vm0, %v623_v29 }
  0x55   : > { %8655 = vmatmul.mubr.msk.f32.gmra.mrb[22].mxu0 %vm635_vm0, %v624_v30 }
  0x56   : > { %8657 = vmatprep.mubr.msk.f32.mxu0 %vm635_vm0, %v625_v31 }
  0x59   : > { %8658 = vmatmul.mubr.msk.f32.gmra.mrb[24].mxu0 %vm635_vm0, %v626_v32 }
  0x5a   : > { %8660 = vmatprep.mubr.msk.f32.mxu0 %vm635_vm0, %v627_v33 }
  0x5d   : > { %8661 = vmatmul.mubr.msk.f32.gmra.mrb[26].mxu0 %vm635_vm0, %v628_v34 }
  0x5e   : > { %8663 = vmatprep.mubr.msk.f32.mxu0 %vm635_vm0, %v629_v35 }
  0x61   : > { %8664 = vmatmul.mubr.msk.f32.gmra.mrb[28].mxu0 %vm635_vm0, %v630_v36 }
  0x62   : > { %8666 = vmatprep.mubr.msk.f32.mxu0 %vm635_vm0, %v631_v37 }
  0x65   : > { %8667 = vmatmul.mubr.msk.f32.gmra.mrb[30].mxu0 %vm635_vm0, %v632_v38 }
  0x66   : > { %8673 = vmatprep.mubr.msk.f32.mxu0 %vm635_vm0, %v10601_v6 }
  0x69   : > { %8674 = vmatmul.mubr.msk.f32.vlgmr.msra.gmra.mrb[32].mxu0 %vm635_vm0, %v10604_v7 }
  0x6a   : > { %8676 = vmatprep.mubr.msk.f32.mxu0 %vm635_vm0, %v10607_v8  ;;  %8722 = vmatpush3.msra.mxu0 %v10614_v9 }
  0x6d   : > { %8677 = vmatmul.mubr.msk.f32.gmra.mrb[34].mxu0 %vm635_vm0, %v10621_v10 }
  0x6e   : > { %8679 = vmatprep.mubr.msk.f32.mxu0 %vm635_vm0, %v10624_v11 }
  0x71   : > { %8680 = vmatmul.mubr.msk.f32.gmra.mrb[36].mxu0 %vm635_vm0, %v606_v12 }
  0x72   : > { %8682 = vmatprep.mubr.msk.f32.mxu0 %vm635_vm0, %v607_v13 }
  0x75   : > { %8683 = vmatmul.mubr.msk.f32.gmra.mrb[38].mxu0 %vm635_vm0, %v608_v14 }
  0x76   : > { %8685 = vmatprep.mubr.msk.f32.mxu0 %vm635_vm0, %v609_v15 }
  0x79   : > { %8686 = vmatmul.mubr.msk.f32.gmra.mrb[40].mxu0 %vm635_vm0, %v610_v16 }
  0x7a   : > { %8688 = vmatprep.mubr.msk.f32.mxu0 %vm635_vm0, %v611_v17 }
  0x7d   : > { %8689 = vmatmul.mubr.msk.f32.gmra.mrb[42].mxu0 %vm635_vm0, %v612_v18 }
  0x7e   : > { %8691 = vmatprep.mubr.msk.f32.mxu0 %vm635_vm0, %v613_v19 }
  0x81   : > { %8692 = vmatmul.mubr.msk.f32.gmra.mrb[44].mxu0 %vm635_vm0, %v614_v20 }
  0x82   : > { %8694 = vmatprep.mubr.msk.f32.mxu0 %vm635_vm0, %v615_v21 }
  0x85   : > { %8695 = vmatmul.mubr.msk.f32.gmra.mrb[46].mxu0 %vm635_vm0, %v616_v22 }
  0x86   : > { %8697 = vmatprep.mubr.msk.f32.mxu0 %vm635_vm0, %v617_v23 }
  0x89   : > { %8698 = vmatmul.mubr.msk.f32.gmra.mrb[48].mxu0 %vm635_vm0, %v618_v24 }
  0x8a   : > { %8700 = vmatprep.mubr.msk.f32.mxu0 %vm635_vm0, %v619_v25 }
  0x8d   : > { %8701 = vmatmul.mubr.msk.f32.gmra.mrb[50].mxu0 %vm635_vm0, %v620_v26 }
  0x8e   : > { %8703 = vmatprep.mubr.msk.f32.mxu0 %vm635_vm0, %v621_v27 }
  0x91   : > { %8704 = vmatmul.mubr.msk.f32.gmra.mrb[52].mxu0 %vm635_vm0, %v622_v28 }
  0x92   : > { %8706 = vmatprep.mubr.msk.f32.mxu0 %vm635_vm0, %v623_v29 }
  0x95   : > { %8707 = vmatmul.mubr.msk.f32.gmra.mrb[54].mxu0 %vm635_vm0, %v624_v30 }
  0x96   : > { %8709 = vmatprep.mubr.msk.f32.mxu0 %vm635_vm0, %v625_v31 }
  0x99   : > { %8710 = vmatmul.mubr.msk.f32.gmra.mrb[56].mxu0 %vm635_vm0, %v626_v32 }
  0x9a   : > { %8712 = vmatprep.mubr.msk.f32.mxu0 %vm635_vm0, %v627_v33 }
  0x9d   : > { %8713 = vmatmul.mubr.msk.f32.gmra.mrb[58].mxu0 %vm635_vm0, %v628_v34 }
  0x9e   : > { %8715 = vmatprep.mubr.msk.f32.mxu0 %vm635_vm0, %v629_v35 }
  0xa1   : > { %8716 = vmatmul.mubr.msk.f32.gmra.mrb[60].mxu0 %vm635_vm0, %v630_v36 }
  0xa2   : > { %8718 = vmatprep.mubr.msk.f32.mxu0 %vm635_vm0, %v631_v37 }
  0xa5   : > { %8719 = vmatmul.mubr.msk.f32.gmra.mrb[62].mxu0 %vm635_vm0, %v632_v38 }
  0xfc   : > { %v8623_v40 = vpop.f32.mrb[0].mxu0 }
  0xfd   : > { %v966_v42 = vmul.f32 %v8623_v40, %v10726_v39  ;;  %v798_v43 = vpop.f32.mrb[1].mxu0 }
  0xfe   : > { %v965_v44 = vmul.f32 %v10726_v39, %v798_v43 }
  0xff   : > { %v10736_v45 = vadd.f32 %v10731_v41, %v966_v42 }
 0x100   : > { %v10739_v46 = vadd.f32 %v10731_v41, %v965_v44  ;;  %v8626_v47 = vpop.f32.mrb[2].mxu0 }
 0x101   : > { %v7555_v48 = vmul.f32 -1.442695, %v10736_v45  ;;  %v968_v49 = vmul.f32 %v8626_v47, %v10726_v39  ;;  %v808_v50 = vpop.f32.mrb[3].mxu0 }
 0x102   : > { %v7554_v51 = vmul.f32 -1.442695, %v10739_v46  ;;  %v967_v52 = vmul.f32 %v10726_v39, %v808_v50 }
 0x103   : > { %9659 = vpow2.f32 %v7555_v48  ;;  %v10746_v53 = vadd.f32 %v10731_v41, %v968_v49 }
 0x104   : > { %9661 = vpow2.f32 %v7554_v51  ;;  %v10749_v54 = vadd.f32 %v10731_v41, %v967_v52  ;;  %v8629_v55 = vpop.f32.mrb[4].mxu0 }
 0x105   : > { %v7557_v56 = vmul.f32 -1.442695, %v10746_v53  ;;  %v970_v57 = vmul.f32 %v8629_v55, %v10726_v39  ;;  %v818_v58 = vpop.f32.mrb[5].mxu0 }
 0x106   : > { %v7556_v59 = vmul.f32 -1.442695, %v10749_v54  ;;  %v969_v60 = vmul.f32 %v10726_v39, %v818_v58 }
 0x107   : > { %9663 = vpow2.f32 %v7557_v56  ;;  %v10756_v61 = vadd.f32 %v10731_v41, %v970_v57 }
 0x108   : > { %9665 = vpow2.f32 %v7556_v59  ;;  %v10759_v62 = vadd.f32 %v10731_v41, %v969_v60  ;;  %v8632_v63 = vpop.f32.mrb[6].mxu0 }
 0x109   : > { %v7559_v0 = vmul.f32 -1.442695, %v10756_v61  ;;  %v972_v1 = vmul.f32 %v8632_v63, %v10726_v39  ;;  %v828_v2 = vpop.f32.mrb[7].mxu0 }
 0x10a   : > { %v7558_v3 = vmul.f32 -1.442695, %v10759_v62  ;;  %v971_v4 = vmul.f32 %v10726_v39, %v828_v2 }
 0x10b   : > { %9667 = vpow2.f32 %v7559_v0  ;;  %v10766_v5 = vadd.f32 %v10731_v41, %v972_v1 }
 0x10c   : > { %9669 = vpow2.f32 %v7558_v3  ;;  %v10769_v6 = vadd.f32 %v10731_v41, %v971_v4  ;;  %v8635_v7 = vpop.f32.mrb[8].mxu0 }
 0x10d   : > { %v9660_v8 = vpop.eup %9659  ;;  %v7561_v9 = vmul.f32 -1.442695, %v10766_v5  ;;  %v974_v10 = vmul.f32 %v8635_v7, %v10726_v39  ;;  %v838_v11 = vpop.f32.mrb[9].mxu0 }
 0x10e   : > { %v9662_v12 = vpop.eup %9661  ;;  %v1132_v13 = vadd.f32 1.0, %v9660_v8  ;;  %v7560_v14 = vmul.f32 -1.442695, %v10769_v6  ;;  %v973_v15 = vmul.f32 %v10726_v39, %v838_v11 }
 0x10f   : > { %v1131_v16 = vadd.f32 1.0, %v9662_v12  ;;  %9671 = vpow2.f32 %v7561_v9  ;;  %v10776_v17 = vadd.f32 %v10731_v41, %v974_v10 }
 0x110   : > { %9673 = vrcp.f32 %v1132_v13  ;;  %v10779_v18 = vadd.f32 %v10731_v41, %v973_v15  ;;  %v8638_v19 = vpop.f32.mrb[10].mxu0 }
 0x111   : > { %v9664_v20 = vpop.eup %9663  ;;  %9675 = vrcp.f32 %v1131_v16  ;;  %v7563_v21 = vmul.f32 -1.442695, %v10776_v17  ;;  %v976_v22 = vmul.f32 %v8638_v19, %v10726_v39  ;;  %v848_v23 = vpop.f32.mrb[11].mxu0 }
 0x112   : > { %v9666_v24 = vpop.eup %9665  ;;  %v1134_v25 = vadd.f32 1.0, %v9664_v20  ;;  %9677 = vpow2.f32 %v7560_v14  ;;  %v7562_v26 = vmul.f32 -1.442695, %v10779_v18  ;;  %v975_v27 = vmul.f32 %v10726_v39, %v848_v23 }
 0x113   : > { %v1133_v28 = vadd.f32 1.0, %v9666_v24  ;;  %9679 = vpow2.f32 %v7563_v21  ;;  %v10786_v29 = vadd.f32 %v10731_v41, %v976_v22 }
 0x114   : > { %9681 = vrcp.f32 %v1134_v25  ;;  %v10789_v30 = vadd.f32 %v10731_v41, %v975_v27  ;;  %v8641_v31 = vpop.f32.mrb[12].mxu0 }
 0x115   : > { %v9668_v32 = vpop.eup %9667  ;;  %9683 = vrcp.f32 %v1133_v28  ;;  %v7565_v33 = vmul.f32 -1.442695, %v10786_v29  ;;  %v978_v34 = vmul.f32 %v8641_v31, %v10726_v39  ;;  %v858_v35 = vpop.f32.mrb[13].mxu0 }
 0x116   : > { %v9670_v36 = vpop.eup %9669  ;;  %v1136_v37 = vadd.f32 1.0, %v9668_v32  ;;  %9685 = vpow2.f32 %v7562_v26  ;;  %v7564_v38 = vmul.f32 -1.442695, %v10789_v30  ;;  %v977_v40 = vmul.f32 %v10726_v39, %v858_v35 }
 0x117   : > { %v1135_v42 = vadd.f32 1.0, %v9670_v36  ;;  %9687 = vpow2.f32 %v7565_v33  ;;  %v10796_v43 = vadd.f32 %v10731_v41, %v978_v34 }
 0x118   : > { %9689 = vrcp.f32 %v1136_v37  ;;  %v10799_v44 = vadd.f32 %v10731_v41, %v977_v40  ;;  %v8644_v47 = vpop.f32.mrb[14].mxu0 }
 0x119   : > { %v9672_v48 = vpop.eup %9671  ;;  %9691 = vrcp.f32 %v1135_v42  ;;  %v7567_v49 = vmul.f32 -1.442695, %v10796_v43  ;;  %v980_v50 = vmul.f32 %v8644_v47, %v10726_v39  ;;  %v868_v51 = vpop.f32.mrb[15].mxu0 }
 0x11a   : > { %v9674_v52 = vpop.eup %9673  ;;  %v1138_v55 = vadd.f32 1.0, %v9672_v48  ;;  %9693 = vpow2.f32 %v7564_v38  ;;  %v7566_v56 = vmul.f32 -1.442695, %v10799_v44  ;;  %v979_v57 = vmul.f32 %v10726_v39, %v868_v51 }
 0x11b   : > { %v9676_v58 = vpop.eup %9675  ;;  %9695 = vpow2.f32 %v7567_v49  ;;  %v10806_v59 = vadd.f32 %v10731_v41, %v980_v50  ;;  %v10809_v63 = vmul.f32 %v9674_v52, %v10736_v45 }
 0x11c   : > { %v9678_v60 = vpop.eup %9677  ;;  %v10812_v0 = vmul.f32 %v9676_v58, %v10739_v46  ;;  %v10815_v1 = vadd.f32 %v10731_v41, %v979_v57  ;;  %v8647_v2 = vpop.f32.mrb[16].mxu0  ;;  %9697 = vpow2.f32 %v7566_v56 }
 0x11d   : > { %13729 = vst [vmem:[#allocation11_spill] sm:$0xff] %v10809_v63  ;;  %v9680_v3 = vpop.eup %9679  ;;  %v1137_v4 = vadd.f32 1.0, %v9678_v60  ;;  %v7569_v7 = vmul.f32 -1.442695, %v10806_v59  ;;  %v982_v8 = vmul.f32 %v8647_v2, %v10726_v39  ;;  %v878_v9 = vpop.f32.mrb[17].mxu0  ;;  %9699 = vrcp.f32 %v1138_v55 }
 0x11e   : > { %13730 = vst [vmem:[#allocation12_spill] sm:$0xff] %v10812_v0  ;;  %v9682_v10 = vpop.eup %9681  ;;  %v1140_v11 = vadd.f32 1.0, %v9680_v3  ;;  %v7568_v45 = vmul.f32 -1.442695, %v10815_v1  ;;  %v981_v46 = vmul.f32 %v10726_v39, %v878_v9  ;;  %8723 = vmatprep.mubr.msk.f32.mxu0 %vm1788_vm1, %v10812_v0 }
 0x11f   : > { %v9684_v12 = vpop.eup %9683  ;;  %9701 = vrcp.f32 %v1137_v4  ;;  %v10824_v13 = vadd.f32 %v10731_v41, %v982_v8  ;;  %8724 = vmatmul.mubr.msk.f32.vlgmr.msra.gmra.mrb[64].mxu0 %vm1788_vm1, %v10809_v63  ;;  %v10829_v15 = vmul.f32 %v9682_v10, %v10746_v53 }
 0x120   : > { %v9686_v14 = vpop.eup %9685  ;;  %v10832_v16 = vmul.f32 %v9684_v12, %v10749_v54  ;;  %9703 = vrcp.f32 %v1140_v11  ;;  %v10835_v19 = vadd.f32 %v10731_v41, %v981_v46  ;;  %v8650_v20 = vpop.f32.mrb[18].mxu0 }
 0x121   : > { %13731 = vst [vmem:[#allocation13_spill] sm:$0xff] %v10829_v15  ;;  %v9688_v21 = vpop.eup %9687  ;;  %v1139_v22 = vadd.f32 1.0, %v9686_v14  ;;  %9705 = vpow2.f32 %v7569_v7  ;;  %v7571_v23 = vmul.f32 -1.442695, %v10824_v13  ;;  %v984_v24 = vmul.f32 %v8650_v20, %v10726_v39  ;;  %v888_v25 = vpop.f32.mrb[19].mxu0 }
 0x122   : > { %13732 = vst [vmem:[#allocation14_spill] sm:$0xff] %v10832_v16  ;;  %v9690_v26 = vpop.eup %9689  ;;  %v1142_v27 = vadd.f32 1.0, %v9688_v21  ;;  %9707 = vpow2.f32 %v7568_v45  ;;  %v7570_v53 = vmul.f32 -1.442695, %v10835_v19  ;;  %v983_v54 = vmul.f32 %v10726_v39, %v888_v25  ;;  %8726 = vmatprep.mubr.msk.f32.mxu0 %vm1788_vm1, %v10832_v16 }
 0x123   : > { %v9692_v28 = vpop.eup %9691  ;;  %9709 = vrcp.f32 %v1139_v22  ;;  %v10844_v31 = vadd.f32 %v10731_v41, %v984_v24  ;;  %8727 = vmatmul.mubr.msk.f32.gmra.mrb[66].mxu0 %vm1788_vm1, %v10829_v15  ;;  %v10849_v33 = vmul.f32 %v9690_v26, %v10756_v61 }
 0x124   : > { %v9694_v32 = vpop.eup %9693  ;;  %v10852_v34 = vmul.f32 %v9692_v28, %v10759_v62  ;;  %9711 = vrcp.f32 %v1142_v27  ;;  %v10855_v35 = vadd.f32 %v10731_v41, %v983_v54  ;;  %v8653_v36 = vpop.f32.mrb[20].mxu0 }
 0x125   : > { %13733 = vst [vmem:[#allocation15_spill] sm:$0xff] %v10849_v33  ;;  %v9696_v37 = vpop.eup %9695  ;;  %v1141_v38 = vadd.f32 1.0, %v9694_v32  ;;  %9713 = vpow2.f32 %v7571_v23  ;;  %v7573_v40 = vmul.f32 -1.442695, %v10844_v31  ;;  %v986_v42 = vmul.f32 %v8653_v36, %v10726_v39  ;;  %v898_v47 = vpop.f32.mrb[21].mxu0 }
 0x126   : > { %13734 = vst [vmem:[#allocation16_spill] sm:$0xff] %v10852_v34  ;;  %v1144_v48 = vadd.f32 1.0, %v9696_v37  ;;  %9715 = vpow2.f32 %v7570_v53  ;;  %v985_v61 = vmul.f32 %v10726_v39, %v898_v47  ;;  %8729 = vmatprep.mubr.msk.f32.mxu0 %vm1788_vm1, %v10852_v34  ;;  %v9698_v62 = vpop.eup %9697  ;;  %v7572_v49 = vmul.f32 -1.442695, %v10855_v35 }
 0x127   : > { %9717 = vrcp.f32 %v1141_v38  ;;  %v10864_v50 = vadd.f32 %v10731_v41, %v986_v42  ;;  %8730 = vmatmul.mubr.msk.f32.gmra.mrb[68].mxu0 %vm1788_vm1, %v10849_v33  ;;  %v9700_v51 = vpop.eup %9699  ;;  %v1143_v52 = vadd.f32 1.0, %v9698_v62 }
 0x128   : > { %9719 = vrcp.f32 %v1144_v48  ;;  %v10869_v55 = vadd.f32 %v10731_v41, %v985_v61  ;;  %v8656_v56 = vpop.f32.mrb[22].mxu0  ;;  %v10879_v10 = vmul.f32 %v9700_v51, %v10766_v5 }
 0x129   : > { %v9702_v57 = vpop.eup %9701  ;;  %9721 = vpow2.f32 %v7573_v40  ;;  %v7575_v58 = vmul.f32 -1.442695, %v10864_v50  ;;  %v988_v60 = vmul.f32 %v8656_v56, %v10726_v39  ;;  %v908_v2 = vpop.f32.mrb[23].mxu0 }
 0x12a   : > { %v9704_v3 = vpop.eup %9703  ;;  %v10874_v4 = vmul.f32 %v9702_v57, %v10769_v6  ;;  %9723 = vrcp.f32 %v1143_v52  ;;  %v7574_v7 = vmul.f32 -1.442695, %v10869_v55  ;;  %v987_v8 = vmul.f32 %v10726_v39, %v908_v2  ;;  %13736 = vst [vmem:[#allocation18_spill] sm:$0xff] %v10879_v10 }
 0x12b   : > { %v9706_v9 = vpop.eup %9705  ;;  %9725 = vpow2.f32 %v7572_v49  ;;  %v10882_v11 = vadd.f32 %v10731_v41, %v988_v60  ;;  %v10899_v53 = vmul.f32 %v9704_v3, %v10776_v17 }
 0x12c   : > { %13735 = vst [vmem:[#allocation17_spill] sm:$0xff] %v10874_v4  ;;  %v9708_v45 = vpop.eup %9707  ;;  %v1146_v46 = vadd.f32 1.0, %v9706_v9  ;;  %9727 = vpow2.f32 %v7575_v58  ;;  %v10885_v12 = vadd.f32 %v10731_v41, %v987_v8  ;;  %8732 = vmatprep.mubr.msk.f32.mxu0 %vm1788_vm1, %v10874_v4  ;;  %v8659_v6 = vpop.f32.mrb[24].mxu0 }
 0x12d   : > { %v9710_v14 = vpop.eup %9709  ;;  %v1145_v20 = vadd.f32 1.0, %v9708_v45  ;;  %9729 = vpow2.f32 %v7574_v7  ;;  %v7577_v5 = vmul.f32 -1.442695, %v10882_v11  ;;  %8733 = vmatmul.mubr.msk.f32.gmra.mrb[70].mxu0 %vm1788_vm1, %v10879_v10  ;;  %v990_v21 = vmul.f32 %v8659_v6, %v10726_v39  ;;  %v918_v22 = vpop.f32.mrb[25].mxu0  ;;  %13738 = vst [vmem:[#allocation20_spill] sm:$0xff] %v10899_v53 }
 0x12e   : > { %v9712_v23 = vpop.eup %9711  ;;  %v10894_v24 = vmul.f32 %v9710_v14, %v10779_v18  ;;  %9731 = vrcp.f32 %v1146_v46  ;;  %v7576_v25 = vmul.f32 -1.442695, %v10885_v12  ;;  %v989_v26 = vmul.f32 %v10726_v39, %v918_v22 }
 0x12f   : > { %v9714_v27 = vpop.eup %9713  ;;  %9733 = vrcp.f32 %v1145_v20  ;;  %v10902_v54 = vadd.f32 %v10731_v41, %v990_v21  ;;  %v10919_v51 = vmul.f32 %v9712_v23, %v10786_v29 }
 0x130   : > { %13737 = vst [vmem:[#allocation19_spill] sm:$0xff] %v10894_v24  ;;  %v9716_v28 = vpop.eup %9715  ;;  %v1148_v32 = vadd.f32 1.0, %v9714_v27  ;;  %9735 = vpow2.f32 %v7577_v5  ;;  %v10905_v36 = vadd.f32 %v10731_v41, %v989_v26  ;;  %8735 = vmatprep.mubr.msk.f32.mxu0 %vm1788_vm1, %v10894_v24  ;;  %v8662_v18 = vpop.f32.mrb[26].mxu0 }
 0x131   : > { %v9718_v37 = vpop.eup %9717  ;;  %v1147_v38 = vadd.f32 1.0, %v9716_v28  ;;  %9737 = vpow2.f32 %v7576_v25  ;;  %v7579_v17 = vmul.f32 -1.442695, %v10902_v54  ;;  %8736 = vmatmul.mubr.msk.f32.gmra.mrb[72].mxu0 %vm1788_vm1, %v10899_v53  ;;  %v992_v40 = vmul.f32 %v8662_v18, %v10726_v39  ;;  %v928_v42 = vpop.f32.mrb[27].mxu0  ;;  %13740 = vst [vmem:[#allocation22_spill] sm:$0xff] %v10919_v51 }
 0x132   : > { %v9720_v47 = vpop.eup %9719  ;;  %v10914_v48 = vmul.f32 %v9718_v37, %v10789_v30  ;;  %9739 = vrcp.f32 %v1148_v32  ;;  %v7578_v61 = vmul.f32 -1.442695, %v10905_v36  ;;  %v991_v62 = vmul.f32 %v10726_v39, %v928_v42 }
 0x133   : > { %v9722_v49 = vpop.eup %9721  ;;  %9741 = vrcp.f32 %v1147_v38  ;;  %v10922_v52 = vadd.f32 %v10731_v41, %v992_v40  ;;  %v10937_v9 = vmul.f32 %v9720_v47, %v10796_v43 }
 0x134   : > { %13739 = vst [vmem:[#allocation21_spill] sm:$0xff] %v10914_v48  ;;  %v9724_v56 = vpop.eup %9723  ;;  %v1150_v57 = vadd.f32 1.0, %v9722_v49  ;;  %9743 = vpow2.f32 %v7579_v17  ;;  %v10925_v58 = vadd.f32 %v10731_v41, %v991_v62  ;;  %8738 = vmatprep.mubr.msk.f32.mxu0 %vm1788_vm1, %v10914_v48  ;;  %v8665_v30 = vpop.f32.mrb[28].mxu0 }
 0x135   : > { %v9726_v60 = vpop.eup %9725  ;;  %v10930_v2 = vmul.f32 %v9724_v56, %v10799_v44  ;;  %9745 = vpow2.f32 %v7578_v61  ;;  %v7581_v29 = vmul.f32 -1.442695, %v10922_v52  ;;  %8739 = vmatmul.mubr.msk.f32.gmra.mrb[74].mxu0 %vm1788_vm1, %v10919_v51  ;;  %v994_v3 = vmul.f32 %v8665_v30, %v10726_v39  ;;  %v938_v7 = vpop.f32.mrb[29].mxu0  ;;  %13742 = vst [vmem:[#allocation24_spill] sm:$0xff] %v10937_v9 }
 0x136   : > { %v9728_v8 = vpop.eup %9727  ;;  %9747 = vrcp.f32 %v1150_v57  ;;  %v1149_v45 = vadd.f32 1.0, %v9726_v60  ;;  %v993_v46 = vmul.f32 %v10726_v39, %v938_v7  ;;  %v7580_v14 = vmul.f32 -1.442695, %v10925_v58 }
 0x137   : > { %13741 = vst [vmem:[#allocation23_spill] sm:$0xff] %v10930_v2  ;;  %v9730_v6 = vpop.eup %9729  ;;  %v1152_v44 = vadd.f32 1.0, %v9728_v8  ;;  %9749 = vpow2.f32 %v7581_v29  ;;  %v10942_v20 = vadd.f32 %v10731_v41, %v994_v3  ;;  %8741 = vmatprep.mubr.msk.f32.mxu0 %vm1788_vm1, %v10930_v2 }
 0x138   : > { %v9732_v5 = vpop.eup %9731  ;;  %9751 = vrcp.f32 %v1149_v45  ;;  %v1151_v21 = vadd.f32 1.0, %v9730_v6  ;;  %v10947_v43 = vadd.f32 %v10731_v41, %v993_v46  ;;  %v8668_v22 = vpop.f32.mrb[30].mxu0 }
 0x139   : > { %v9734_v23 = vpop.eup %9733  ;;  %9753 = vrcp.f32 %v1152_v44  ;;  %v7583_v25 = vmul.f32 -1.442695, %v10942_v20  ;;  %8742 = vmatmul.mubr.msk.f32.gmra.mrb[76].mxu0 %vm1788_vm1, %v10937_v9  ;;  %v996_v26 = vmul.f32 %v8668_v22, %v10726_v39  ;;  %v948_v27 = vpop.f32.mrb[31].mxu0  ;;  %v10954_v32 = vmul.f32 %v9732_v5, %v10806_v59 }
 0x13a   : > { %v9736_v28 = vpop.eup %9735  ;;  %v10957_v18 = vmul.f32 %v9734_v23, %v10815_v1  ;;  %9755 = vrcp.f32 %v1151_v21  ;;  %v995_v37 = vmul.f32 %v10726_v39, %v948_v27  ;;  %v7582_v40 = vmul.f32 -1.442695, %v10947_v43 }
 0x13b   : > { %13743 = vst [vmem:[#allocation25_spill] sm:$0xff] %v10954_v32  ;;  %v9738_v38 = vpop.eup %9737  ;;  %v1154_v17 = vadd.f32 1.0, %v9736_v28  ;;  %9757 = vpow2.f32 %v7580_v14  ;;  %v10962_v42 = vadd.f32 %v10731_v41, %v996_v26 }
 0x13c   : > { %13744 = vst [vmem:[#allocation26_spill] sm:$0xff] %v10957_v18  ;;  %v9740_v47 = vpop.eup %9739  ;;  %v1153_v61 = vadd.f32 1.0, %v9738_v38  ;;  %9759 = vpow2.f32 %v7583_v25  ;;  %v10965_v59 = vadd.f32 %v10731_v41, %v995_v37  ;;  %8744 = vmatprep.mubr.msk.f32.mxu0 %vm1788_vm1, %v10957_v18  ;;  %v10969_v1 = vpop.f32.mrb[32].mxu0 }
 0x13d   : > { %v9742_v39 = vpop.eup %9741  ;;  %9761 = vrcp.f32 %v1154_v17  ;;  %v7585_v62 = vmul.f32 -1.442695, %v10962_v42  ;;  %8745 = vmatmul.mubr.msk.f32.gmra.mrb[78].mxu0 %vm1788_vm1, %v10954_v32  ;;  %v10974_v49 = vpop.f32.mrb[33].mxu0  ;;  %v10980_v30 = vmul.f32 %v9740_v47, %v10824_v13 }
 0x13e   : > { %v9744_v56 = vpop.eup %9743  ;;  %v10977_v57 = vmul.f32 %v9742_v39, %v10835_v19  ;;  %9763 = vrcp.f32 %v1153_v61  ;;  %v7584_v29 = vmul.f32 -1.442695, %v10965_v59 }
 0x13f   : > { %v9746_v41 = vpop.eup %9745  ;;  %13746 = vst [vmem:[#allocation28_spill] sm:$0xff] %v10980_v30  ;;  %v1156_v60 = vadd.f32 1.0, %v9744_v56  ;;  %9765 = vpow2.f32 %v7582_v40 }
 0x140   : > { %13745 = vst [vmem:[#allocation27_spill] sm:$0xff] %v10977_v57  ;;  %v9748_v3 = vpop.eup %9747  ;;  %v1155_v7 = vadd.f32 1.0, %v9746_v41  ;;  %9767 = vpow2.f32 %v7585_v62  ;;  %8747 = vmatprep.mubr.msk.f32.mxu0 %vm1788_vm1, %v10977_v57  ;;  %v10985_v8 = vpop.f32.mrb[34].mxu0 }
 0x141   : > { %v9750_v45 = vpop.eup %9749  ;;  %9769 = vrcp.f32 %v1156_v60  ;;  %8748 = vmatmul.mubr.msk.f32.gmra.mrb[80].mxu0 %vm1788_vm1, %v10980_v30  ;;  %v10989_v19 = vpop.f32.mrb[35].mxu0  ;;  %v10995_v5 = vmul.f32 %v9748_v3, %v10844_v31 }
 0x142   : > { %v9752_v13 = vpop.eup %9751  ;;  %9771 = vrcp.f32 %v1155_v7  ;;  %v1158_v44 = vadd.f32 1.0, %v9750_v45 }
 0x143   : > { %v9754_v46 = vpop.eup %9753  ;;  %v10992_v6 = vmul.f32 %v9752_v13, %v10855_v35  ;;  %9773 = vpow2.f32 %v7584_v29  ;;  %13748 = vst [vmem:[#allocation30_spill] sm:$0xff] %v10995_v5 }
 0x144   : > { %v9756_v14 = vpop.eup %9755  ;;  %v10997_v21 = vpop.f32.mrb[36].mxu0  ;;  %9775 = vrcp.f32 %v1158_v44 }
 0x145   : > { %13747 = vst [vmem:[#allocation29_spill] sm:$0xff] %v10992_v6  ;;  %13749 = vst [vmem:[#allocation31_spill] sm:$0xff] %v10997_v21  ;;  %v9758_v22 = vpop.eup %9757  ;;  %v11000_v23 = vmul.f32 %v9756_v14, %v10869_v55  ;;  %8750 = vmatprep.mubr.msk.f32.mxu0 %vm1788_vm1, %v10992_v6  ;;  %v11004_v25 = vpop.f32.mrb[37].mxu0  ;;  %v11011_v55 = vmul.f32 %v9754_v46, %v10864_v50 }
 0x146   : > { %13751 = vst [vmem:[#allocation33_spill] sm:$0xff] %v11004_v25  ;;  %v9760_v26 = vpop.eup %9759  ;;  %v1157_v35 = vadd.f32 1.0, %v9758_v22  ;;  %8751 = vmatmul.mubr.msk.f32.gmra.mrb[82].mxu0 %vm1788_vm1, %v10995_v5 }
 0x147   : > { %13750 = vst [vmem:[#allocation32_spill] sm:$0xff] %v11000_v23  ;;  %v9762_v27 = vpop.eup %9761  ;;  %v1160_v31 = vadd.f32 1.0, %v9760_v26  ;;  %8753 = vmatprep.mubr.msk.f32.mxu0 %vm1788_vm1, %v11000_v23  ;;  %13752 = vst [vmem:[#allocation34_spill] sm:$0xff] %v11011_v55 }
 0x148   : > { %v9764_v28 = vpop.eup %9763  ;;  %9777 = vrcp.f32 %v1157_v35  ;;  %v11013_v37 = vpop.f32.mrb[38].mxu0  ;;  %v11025_v56 = vmul.f32 %v9762_v27, %v10882_v11 }
 0x149   : > { %13753 = vst [vmem:[#allocation35_spill] sm:$0xff] %v11013_v37  ;;  %v9766_v38 = vpop.eup %9765  ;;  %v11016_v17 = vmul.f32 %v9764_v28, %v10885_v12  ;;  %v11018_v40 = vpop.f32.mrb[39].mxu0  ;;  %9779 = vrcp.f32 %v1160_v31  ;;  %v12002_v37 = vld [vmem:[%s13653_s17 + $0xc0] sm:$0xff] }
 0x14a   : > { %13755 = vst [vmem:[#allocation37_spill] sm:$0xff] %v11018_v40  ;;  %v9768_v47 = vpop.eup %9767  ;;  %v1159_v61 = vadd.f32 1.0, %v9766_v38  ;;  %8754 = vmatmul.mubr.msk.f32.gmra.mrb[84].mxu0 %vm1788_vm1, %v11011_v55  ;;  %13756 = vst [vmem:[#allocation38_spill] sm:$0xff] %v11025_v56 }
 0x14b   : > { %13754 = vst [vmem:[#allocation36_spill] sm:$0xff] %v11016_v17  ;;  %v9770_v39 = vpop.eup %9769  ;;  %v1162_v62 = vadd.f32 1.0, %v9768_v47  ;;  %8756 = vmatprep.mubr.msk.f32.mxu0 %vm1788_vm1, %v11016_v17 }
 0x14c   : > { %v9772_v50 = vpop.eup %9771  ;;  %9781 = vrcp.f32 %v1159_v61  ;;  %v11027_v12 = vpop.f32.mrb[40].mxu0  ;;  %v11039_v11 = vmul.f32 %v9770_v39, %v10902_v54 }
 0x14d   : > { %13757 = vst [vmem:[#allocation39_spill] sm:$0xff] %v11027_v12  ;;  %v9774_v41 = vpop.eup %9773  ;;  %v11030_v60 = vmul.f32 %v9772_v50, %v10905_v36  ;;  %v11032_v29 = vpop.f32.mrb[41].mxu0  ;;  %9783 = vrcp.f32 %v1162_v62 }
 0x14e   : > { %13759 = vst [vmem:[#allocation41_spill] sm:$0xff] %v11032_v29  ;;  %v1161_v3 = vadd.f32 1.0, %v9774_v41  ;;  %8757 = vmatmul.mubr.msk.f32.gmra.mrb[86].mxu0 %vm1788_vm1, %v11025_v56  ;;  %13760 = vst [vmem:[#allocation42_spill] sm:$0xff] %v11039_v11  ;;  %v9776_v45 = vpop.eup %9775 }
 0x14f   : > { %13758 = vst [vmem:[#allocation40_spill] sm:$0xff] %v11030_v60  ;;  %8759 = vmatprep.mubr.msk.f32.mxu0 %vm1788_vm1, %v11030_v60  ;;  %v11051_v44 = vmul.f32 %v9776_v45, %v10922_v52 }
 0x150   : > { %9785 = vrcp.f32 %v1161_v3  ;;  %v11041_v7 = vpop.f32.mrb[42].mxu0 }
 0x151   : > { %13761 = vst [vmem:[#allocation43_spill] sm:$0xff] %v11041_v7  ;;  %v11043_v13 = vpop.f32.mrb[43].mxu0  ;;  %13764 = vst [vmem:[#allocation46_spill] sm:$0xff] %v11051_v44 }
 0x152   : > { %13762 = vst [vmem:[#allocation44_spill] sm:$0xff] %v11043_v13  ;;  %v9778_v36 = vpop.eup %9777  ;;  %8760 = vmatmul.mubr.msk.f32.gmra.mrb[88].mxu0 %vm1788_vm1, %v11039_v11 }
 0x153   : > { %v11048_v46 = vmul.f32 %v9778_v36, %v10925_v58  ;;  %v9780_v54 = vpop.eup %9779 }
 0x154   : > { %v11053_v14 = vpop.f32.mrb[44].mxu0  ;;  %v11065_v58 = vmul.f32 %v9780_v54, %v10942_v20 }
 0x155   : > { %13763 = vst [vmem:[#allocation45_spill] sm:$0xff] %v11048_v46  ;;  %13765 = vst [vmem:[#allocation47_spill] sm:$0xff] %v11053_v14  ;;  %8762 = vmatprep.mubr.msk.f32.mxu0 %vm1788_vm1, %v11048_v46  ;;  %v11057_v22 = vpop.f32.mrb[45].mxu0 }
 0x156   : > { %13766 = vst [vmem:[#allocation48_spill] sm:$0xff] %v11057_v22  ;;  %v9782_v26 = vpop.eup %9781  ;;  %8763 = vmatmul.mubr.msk.f32.gmra.mrb[90].mxu0 %vm1788_vm1, %v11051_v44  ;;  %13768 = vst [vmem:[#allocation50_spill] sm:$0xff] %v11065_v58 }
 0x157   : > { %v11062_v35 = vmul.f32 %v9782_v26, %v10947_v43  ;;  %v9784_v27 = vpop.eup %9783 }
 0x158   : > { %v11067_v52 = vpop.f32.mrb[46].mxu0  ;;  %v11079_v43 = vmul.f32 %v9784_v27, %v10962_v42 }
 0x159   : > { %13767 = vst [vmem:[#allocation49_spill] sm:$0xff] %v11062_v35  ;;  %13769 = vst [vmem:[#allocation51_spill] sm:$0xff] %v11067_v52  ;;  %8765 = vmatprep.mubr.msk.f32.mxu0 %vm1788_vm1, %v11062_v35  ;;  %v11071_v31 = vpop.f32.mrb[47].mxu0  ;;  %v1827_v35 = vld [vmem:[%s13654_s18] sm:$0xff] }
 0x15a   : > { %13770 = vst [vmem:[#allocation52_spill] sm:$0xff] %v11071_v31  ;;  %v9786_v28 = vpop.eup %9785  ;;  %8766 = vmatmul.mubr.msk.f32.gmra.mrb[92].mxu0 %vm1788_vm1, %v11065_v58  ;;  %13772 = vst [vmem:[#allocation54_spill] sm:$0xff] %v11079_v43  ;;  %v7718_v58 = vld [vmem:[%s13646_s10 + $0x8] sm:$0xff] }
 0x15b   : > { %v11076_v38 = vmul.f32 %v9786_v28, %v10965_v59  ;;  %8771 = vmatprep.subr.mxu0 %v7718_v58 }
 0x15c   : > { %v11081_v20 = vpop.f32.mrb[48].mxu0  ;;  %8772 = vmatpush3.msra.mxu0 %v7718_v58  ;;  %v11138_v58 = vld [vmem:[%s13646_s10 + $0x18] sm:$0xff] }
 0x15d   : > { %13771 = vst [vmem:[#allocation53_spill] sm:$0xff] %v11076_v38  ;;  %13773 = vst [vmem:[#allocation55_spill] sm:$0xff] %v11081_v20  ;;  %8768 = vmatprep.mubr.msk.f32.mxu0 %vm1788_vm1, %v11076_v38  ;;  %v11085_v47 = vpop.f32.mrb[49].mxu0 }
 0x15e   : > { %13774 = vst [vmem:[#allocation56_spill] sm:$0xff] %v11085_v47  ;;  %8769 = vmatmul.mubr.msk.f32.gmra.mrb[94].mxu0 %vm1788_vm1, %v11079_v43  ;;  %v10429_v43 = vmov 0.0  }
 0x15f   : > { %1790 = vst.msk [vmem:[#allocation2 + $0x8] sm:$0xff] %vm1788_vm1, %v10429_v43  ;;  %1789 = vst.msk [vmem:[#allocation2] sm:$0xff] %vm1788_vm1, %v10429_v43 }
 0x160   : > { %v11089_v61 = vpop.f32.mrb[50].mxu0  ;;  %1791 = vst.msk [vmem:[#allocation2 + $0x10] sm:$0xff] %vm1788_vm1, %v10429_v43  ;;  %1792 = vst.msk [vmem:[#allocation2 + $0x118] sm:$0xff] %vm1788_vm1, %v10429_v43 }
 0x161   : > { %13775 = vst [vmem:[#allocation57_spill] sm:$0xff] %v11089_v61  ;;  %v11091_v39 = vpop.f32.mrb[51].mxu0  ;;  %1793 = vst.msk [vmem:[#allocation2 + $0x120] sm:$0xff] %vm1788_vm1, %v10429_v43 }
 0x162   : > { %13776 = vst [vmem:[#allocation58_spill] sm:$0xff] %v11091_v39  ;;  %1794 = vst.msk [vmem:[#allocation2 + $0x128] sm:$0xff] %vm1788_vm1, %v10429_v43  ;;  %v7783_v43 = vld [vmem:[%s13646_s10 + $0x10] sm:$0xff] }
 0x163   : > { %8871 = vmatprep.subr.mxu1 %v7783_v43 }
 0x164   : > { %v11093_v62 = vpop.f32.mrb[52].mxu0  ;;  %8872 = vmatpush3.msra.mxu1 %v7783_v43 }
 0x165   : > { %13777 = vst [vmem:[#allocation59_spill] sm:$0xff] %v11093_v62  ;;  %v11095_v59 = vpop.f32.mrb[53].mxu0  ;;  %8921 = vmatprep.subr.mxu1 %v11138_v58 }
 0x166   : > { %13778 = vst [vmem:[#allocation60_spill] sm:$0xff] %v11095_v59  ;;  %v2580_v38 = vld [vmem:[#allocation2 + $0x8] sm:$0xff] }
 0x167   : > { %8773 = vmatprep.mubr.msk.f32.mxu0 %vm1788_vm1, %v2580_v38  ;;  %v2581_v44 = vld [vmem:[#allocation2 + $0x10] sm:$0xff] }
 0x168   : > { %v11097_v42 = vpop.f32.mrb[54].mxu0  ;;  %8774 = vmatmul.mubr.msk.f32.vlgmr.msra.gmra.mrb[96].mxu0 %vm1788_vm1, %v2581_v44  ;;  %v3256_v11 = vld [vmem:[#allocation2 + $0x9] sm:$0xff]  ;;  %v2579_v44 = vld [vmem:[%s13646_s10] sm:$0xff] }
 0x169   : > { %13779 = vst [vmem:[#allocation61_spill] sm:$0xff] %v11097_v42  ;;  %v11099_v50 = vpop.f32.mrb[55].mxu0  ;;  %v3288_v46 = vmul.f32 %v3256_v11, %v1827_v35  ;;  %8821 = vmatprep.subr.mxu0 %v2579_v44  ;;  %v11147_v11 = vld [vmem:[%s13644_s8] ss:$0 sm:$0xff]  ;;  %v11361_v42 = vld [vmem:[%s13654_s18 + $0x38] sm:$0xff] }
 0x16a   : > { %13780 = vst [vmem:[#allocation62_spill] sm:$0xff] %v11099_v50  ;;  %8822 = vmatpush3.msra.mxu0 %v2579_v44 }
 0x16b   : > { %8873 = vmatprep.mubr.msk.f32.mxu1 %vm1788_vm1, %v3288_v46  ;;  %v11152_v46 = vld [vmem:[%s13645_s9] ss:$0 sm:$0xff] }
 0x16c   : > { %v11101_v41 = vpop.f32.mrb[56].mxu0 }
 0x16d   : > { %13781 = vst [vmem:[#allocation63_spill] sm:$0xff] %v11101_v41  ;;  %v11103_v3 = vpop.f32.mrb[57].mxu0 }
 0x16e   : > { %13782 = vst [vmem:[#allocation64_spill] sm:$0xff] %v11103_v3 }
 0x170   : > { %v11105_v45 = vpop.f32.mrb[58].mxu0 }
 0x171   : > { %13783 = vst [vmem:[#allocation65_spill] sm:$0xff] %v11105_v45  ;;  %v11107_v36 = vpop.f32.mrb[59].mxu0 }
 0x172   : > { %13784 = vst [vmem:[#allocation66_spill] sm:$0xff] %v11107_v36 }
 0x174   : > { %v11109_v54 = vpop.f32.mrb[60].mxu0 }
 0x175   : > { %13785 = vst [vmem:[#allocation67_spill] sm:$0xff] %v11109_v54  ;;  %v11111_v26 = vpop.f32.mrb[61].mxu0 }
 0x176   : > { %13786 = vst [vmem:[#allocation68_spill] sm:$0xff] %v11111_v26 }
 0x178   : > { %v11113_v27 = vpop.f32.mrb[62].mxu0 }
 0x179   : > { %13787 = vst [vmem:[#allocation69_spill] sm:$0xff] %v11113_v27  ;;  %v11115_v28 = vpop.f32.mrb[63].mxu0 }
 0x17a   : > { %13788 = vst [vmem:[#allocation70_spill] sm:$0xff] %v11115_v28 }
 0x1f2   : > { %v8725_v35 = vpop.f32.mrb[64].mxu0 }
 0x1f3   : > { %v2190_v38 = vmul.f32 %v8725_v35, %v11147_v11  ;;  %v2022_v43 = vpop.f32.mrb[65].mxu0 }
 0x1f4   : > { %v2189_v60 = vmul.f32 %v11147_v11, %v2022_v43 }
 0x1f5   : > { %v11157_v56 = vadd.f32 %v11152_v46, %v2190_v38 }
 0x1f6   : > { %v11160_v44 = vadd.f32 %v11152_v46, %v2189_v60  ;;  %v8728_v55 = vpop.f32.mrb[66].mxu0 }
 0x1f7   : > { %v7687_v17 = vmul.f32 -1.442695, %v11157_v56  ;;  %v2192_v5 = vmul.f32 %v8728_v55, %v11147_v11  ;;  %v2032_v23 = vpop.f32.mrb[67].mxu0 }
 0x1f8   : > { %v7686_v30 = vmul.f32 -1.442695, %v11160_v44  ;;  %v2191_v6 = vmul.f32 %v11147_v11, %v2032_v23 }
 0x1f9   : > { %9787 = vpow2.f32 %v7687_v17  ;;  %v11167_v35 = vadd.f32 %v11152_v46, %v2192_v5 }
 0x1fa   : > { %9789 = vpow2.f32 %v7686_v30  ;;  %v11170_v38 = vadd.f32 %v11152_v46, %v2191_v6  ;;  %v8731_v60 = vpop.f32.mrb[68].mxu0 }
 0x1fb   : > { %v7689_v43 = vmul.f32 -1.442695, %v11167_v35  ;;  %v2194_v32 = vmul.f32 %v8731_v60, %v11147_v11  ;;  %v2042_v57 = vpop.f32.mrb[69].mxu0 }
 0x1fc   : > { %v7688_v55 = vmul.f32 -1.442695, %v11170_v38  ;;  %v2193_v18 = vmul.f32 %v11147_v11, %v2042_v57 }
 0x1fd   : > { %9791 = vpow2.f32 %v7689_v43  ;;  %v11177_v23 = vadd.f32 %v11152_v46, %v2194_v32 }
 0x1fe   : > { %9793 = vpow2.f32 %v7688_v55  ;;  %v11180_v30 = vadd.f32 %v11152_v46, %v2193_v18 }
 0x1ff   : > { %v7691_v6 = vmul.f32 -1.442695, %v11177_v23 }
 0x200   : > { %v7690_v5 = vmul.f32 -1.442695, %v11180_v30  ;;  %v8734_v17 = vpop.f32.mrb[70].mxu0 }
 0x201   : > { %9795 = vpow2.f32 %v7691_v6  ;;  %v2196_v60 = vmul.f32 %v8734_v17, %v11147_v11  ;;  %v2052_v9 = vpop.f32.mrb[71].mxu0 }
 0x202   : > { %9797 = vpow2.f32 %v7690_v5  ;;  %v2195_v57 = vmul.f32 %v11147_v11, %v2052_v9 }
 0x203   : > { %v9788_v43 = vpop.eup %9787  ;;  %v11187_v32 = vadd.f32 %v11152_v46, %v2196_v60 }
 0x204   : > { %v9790_v55 = vpop.eup %9789  ;;  %v2356_v2 = vadd.f32 1.0, %v9788_v43  ;;  %v11190_v18 = vadd.f32 %v11152_v46, %v2195_v57  ;;  %v8737_v51 = vpop.f32.mrb[72].mxu0 }
 0x205   : > { %v2355_v48 = vadd.f32 1.0, %v9790_v55  ;;  %v7693_v53 = vmul.f32 -1.442695, %v11187_v32  ;;  %v2198_v6 = vmul.f32 %v8737_v51, %v11147_v11  ;;  %v2062_v17 = vpop.f32.mrb[73].mxu0 }
 0x206   : > { %9799 = vrcp.f32 %v2356_v2  ;;  %v7692_v5 = vmul.f32 -1.442695, %v11190_v18  ;;  %v2197_v9 = vmul.f32 %v11147_v11, %v2062_v17 }
 0x207   : > { %v9792_v24 = vpop.eup %9791  ;;  %9801 = vrcp.f32 %v2355_v48  ;;  %v11197_v60 = vadd.f32 %v11152_v46, %v2198_v6 }
 0x208   : > { %v9794_v43 = vpop.eup %9793  ;;  %v2358_v57 = vadd.f32 1.0, %v9792_v24  ;;  %9803 = vpow2.f32 %v7693_v53  ;;  %v11200_v55 = vadd.f32 %v11152_v46, %v2197_v9  ;;  %v8740_v10 = vpop.f32.mrb[74].mxu0 }
 0x209   : > { %v2357_v4 = vadd.f32 1.0, %v9794_v43  ;;  %9805 = vpow2.f32 %v7692_v5  ;;  %v7695_v51 = vmul.f32 -1.442695, %v11197_v60  ;;  %v2200_v2 = vmul.f32 %v8740_v10, %v11147_v11  ;;  %v2072_v33 = vpop.f32.mrb[75].mxu0 }
 0x20a   : > { %9807 = vrcp.f32 %v2358_v57  ;;  %v7694_v48 = vmul.f32 -1.442695, %v11200_v55  ;;  %v2199_v6 = vmul.f32 %v11147_v11, %v2072_v33 }
 0x20b   : > { %v9796_v17 = vpop.eup %9795  ;;  %9809 = vrcp.f32 %v2357_v4  ;;  %v11207_v24 = vadd.f32 %v11152_v46, %v2200_v2 }
 0x20c   : > { %v9798_v53 = vpop.eup %9797  ;;  %v2360_v9 = vadd.f32 1.0, %v9796_v17  ;;  %9811 = vpow2.f32 %v7695_v51  ;;  %v11210_v5 = vadd.f32 %v11152_v46, %v2199_v6  ;;  %v8743_v43 = vpop.f32.mrb[76].mxu0 }
 0x20d   : > { %v2359_v34 = vadd.f32 1.0, %v9798_v53  ;;  %9813 = vpow2.f32 %v7694_v48  ;;  %v7697_v10 = vmul.f32 -1.442695, %v11207_v24  ;;  %v2202_v57 = vmul.f32 %v8743_v43, %v11147_v11  ;;  %v2082_v15 = vpop.f32.mrb[77].mxu0 }
 0x20e   : > { %9815 = vrcp.f32 %v2360_v9  ;;  %v7696_v33 = vmul.f32 -1.442695, %v11210_v5  ;;  %v2201_v4 = vmul.f32 %v11147_v11, %v2082_v15 }
 0x20f   : > { %9817 = vrcp.f32 %v2359_v34  ;;  %v11217_v2 = vadd.f32 %v11152_v46, %v2202_v57 }
 0x210   : > { %v9800_v51 = vpop.eup %9799  ;;  %9819 = vpow2.f32 %v7697_v10  ;;  %v11220_v6 = vadd.f32 %v11152_v46, %v2201_v4  ;;  %v8746_v48 = vpop.f32.mrb[78].mxu0 }
 0x211   : > { %v9802_v17 = vpop.eup %9801  ;;  %v2452_v53 = vmul.f32 %v9800_v51, %v11157_v56  ;;  %9821 = vpow2.f32 %v7696_v33  ;;  %v7699_v9 = vmul.f32 -1.442695, %v11217_v2  ;;  %v2204_v43 = vmul.f32 %v8746_v48, %v11147_v11  ;;  %v2092_v16 = vpop.f32.mrb[79].mxu0 }
 0x212   : > { %v9804_v15 = vpop.eup %9803  ;;  %v2451_v34 = vmul.f32 %v9802_v17, %v11160_v44  ;;  %v7698_v57 = vmul.f32 -1.442695, %v11220_v6  ;;  %v2203_v10 = vmul.f32 %v11147_v11, %v2092_v16 }
 0x213   : > { %v9806_v0 = vpop.eup %9805  ;;  %2484 = vst.msk [vmem:[#allocation2 + $0x20] sm:$0xff] %vm1788_vm1, %v2452_v53  ;;  %v2362_v4 = vadd.f32 1.0, %v9804_v15  ;;  %9823 = vpow2.f32 %v7699_v9  ;;  %v11230_v56 = vadd.f32 %v11152_v46, %v2204_v43 }
 0x214   : > { %v9808_v33 = vpop.eup %9807  ;;  %2483 = vst.msk [vmem:[#allocation2 + $0x18] sm:$0xff] %vm1788_vm1, %v2451_v34  ;;  %v2361_v51 = vadd.f32 1.0, %v9806_v0  ;;  %9825 = vpow2.f32 %v7698_v57  ;;  %v11234_v48 = vadd.f32 %v11152_v46, %v2203_v10  ;;  %v8749_v44 = vpop.f32.mrb[80].mxu0 }
 0x215   : > { %v9810_v17 = vpop.eup %9809  ;;  %v2454_v16 = vmul.f32 %v9808_v33, %v11167_v35  ;;  %9827 = vrcp.f32 %v2362_v4  ;;  %v7701_v53 = vmul.f32 -1.442695, %v11230_v56  ;;  %v2206_v9 = vmul.f32 %v8749_v44, %v11147_v11  ;;  %v2102_v15 = vpop.f32.mrb[81].mxu0 }
 0x216   : > { %v9812_v43 = vpop.eup %9811  ;;  %v2453_v63 = vmul.f32 %v9810_v17, %v11170_v38  ;;  %9829 = vrcp.f32 %v2361_v51  ;;  %v7700_v0 = vmul.f32 -1.442695, %v11234_v48  ;;  %v2205_v34 = vmul.f32 %v11147_v11, %v2102_v15 }
 0x217   : > { %v9814_v57 = vpop.eup %9813  ;;  %2486 = vst.msk [vmem:[#allocation2 + $0x30] sm:$0xff] %vm1788_vm1, %v2454_v16  ;;  %v2364_v10 = vadd.f32 1.0, %v9812_v43  ;;  %9831 = vpow2.f32 %v7701_v53  ;;  %v11244_v35 = vadd.f32 %v11152_v46, %v2206_v9 }
 0x218   : > { %v9816_v4 = vpop.eup %9815  ;;  %2485 = vst.msk [vmem:[#allocation2 + $0x28] sm:$0xff] %vm1788_vm1, %v2453_v63  ;;  %v2363_v33 = vadd.f32 1.0, %v9814_v57  ;;  %9833 = vpow2.f32 %v7700_v0  ;;  %v11248_v38 = vadd.f32 %v11152_v46, %v2205_v34  ;;  %v11258_v0 = vld [vmem:[%s13654_s18 + $0x8] sm:$0xff] }
 0x219   : > { %v9818_v51 = vpop.eup %9817  ;;  %v2456_v44 = vmul.f32 %v9816_v4, %v11177_v23  ;;  %9835 = vrcp.f32 %v2364_v10  ;;  %v7703_v17 = vmul.f32 -1.442695, %v11244_v35  ;;  %v8752_v16 = vpop.f32.mrb[82].mxu0  ;;  %v1829_v23 = vld [vmem:[%s13654_s18 + $0x10] sm:$0xff] }
 0x21a   : > { %v9820_v15 = vpop.eup %9819  ;;  %v2455_v53 = vmul.f32 %v9818_v51, %v11180_v30  ;;  %9837 = vrcp.f32 %v2363_v33  ;;  %v7702_v9 = vmul.f32 -1.442695, %v11248_v38  ;;  %v2208_v63 = vmul.f32 %v8752_v16, %v11147_v11  ;;  %v2112_v43 = vpop.f32.mrb[83].mxu0  ;;  %v2583_v27 = vld [vmem:[#allocation2 + $0x20] sm:$0xff] }
 0x21b   : > { %v9822_v34 = vpop.eup %9821  ;;  %2488 = vst.msk [vmem:[#allocation2 + $0x40] sm:$0xff] %vm1788_vm1, %v2456_v44  ;;  %v2366_v57 = vadd.f32 1.0, %v9820_v15  ;;  %9839 = vpow2.f32 %v7703_v17  ;;  %v2207_v30 = vmul.f32 %v11147_v11, %v2112_v43  ;;  %v2582_v10 = vld [vmem:[#allocation2 + $0x18] sm:$0xff] }
 0x21c   : > { %v4481_v4 = vld [vmem:[#allocation2 + $0x19] sm:$0xff]  ;;  %v3257_v33 = vld [vmem:[#allocation2 + $0x11] sm:$0xff]  ;;  %2487 = vst.msk [vmem:[#allocation2 + $0x38] sm:$0xff] %vm1788_vm1, %v2455_v53  ;;  %v2365_v51 = vadd.f32 1.0, %v9822_v34  ;;  %9841 = vpow2.f32 %v7702_v9  ;;  %v11267_v16 = vadd.f32 %v11152_v46, %v2208_v63  ;;  %8776 = vmatprep.mubr.msk.f32.mxu0 %vm1788_vm1, %v2582_v10 }
 0x21d   : > { %v9824_v28 = vpop.eup %9823  ;;  %9843 = vrcp.f32 %v2366_v57  ;;  %v11271_v44 = vadd.f32 %v11152_v46, %v2207_v30  ;;  %v8755_v17 = vpop.f32.mrb[84].mxu0  ;;  %8777 = vmatmul.mubr.msk.f32.gmra.mrb[98].mxu0 %vm1788_vm1, %v2583_v27  ;;  %v3289_v15 = vmul.f32 %v3257_v33, %v11258_v0  ;;  %v3290_v43 = vmul.f32 %v4481_v4, %v1829_v23  ;;  %v11278_v53 = vld [vmem:[%s13650_s14] sm:$0xff] }
 0x21e   : > { %v9826_v9 = vpop.eup %9825  ;;  %9845 = vrcp.f32 %v2365_v51  ;;  %v2368_v63 = vadd.f32 1.0, %v9824_v28  ;;  %v7705_v34 = vmul.f32 -1.442695, %v11267_v16  ;;  %v2210_v57 = vmul.f32 %v8755_v17, %v11147_v11  ;;  %v2122_v30 = vpop.f32.mrb[85].mxu0  ;;  %v11285_v27 = vld [vmem:[%s13646_s10 + $0x20] sm:$0xff]  ;;  %9221 = vmatprep.subr.mxu0 %v11278_v53 }
 0x21f   : > { %v9828_v23 = vpop.eup %9827  ;;  %v2367_v10 = vadd.f32 1.0, %v9826_v9  ;;  %v7704_v4 = vmul.f32 -1.442695, %v11271_v44  ;;  %v2209_v33 = vmul.f32 %v11147_v11, %v2122_v30  ;;  %8874 = vmatmul.mubr.msk.f32.vlgmr.msra.gmra.mrb[0].mxu1 %vm1788_vm1, %v3289_v15  ;;  %v4482_v28 = vld [vmem:[#allocation2 + $0x21] sm:$0xff] }
 0x220   : > { %v2584_v51 = vld [vmem:[#allocation2 + $0x28] sm:$0xff]  ;;  %v9830_v54 = vpop.eup %9829  ;;  %v2458_v17 = vmul.f32 %v9828_v23, %v11187_v32  ;;  %9847 = vrcp.f32 %v2368_v63  ;;  %v11293_v26 = vadd.f32 %v11152_v46, %v2210_v57  ;;  %8922 = vmatpush3.msra.mxu1 %v11138_v58  ;;  %8876 = vmatprep.mubr.msk.f32.mxu1 %vm1788_vm1, %v3290_v43  ;;  %v11302_v36 = vmul.f32 %v4482_v28, %v11258_v0  ;;  %v2585_v32 = vld [vmem:[#allocation2 + $0x30] sm:$0xff]  ;;  %v11313_v57 = vld [vmem:[%s13654_s18 + $0x18] sm:$0xff] }
 0x221   : > { %v9832_v9 = vpop.eup %9831  ;;  %v2457_v45 = vmul.f32 %v9830_v54, %v11190_v18  ;;  %9849 = vrcp.f32 %v2367_v10  ;;  %v11299_v30 = vadd.f32 %v11152_v46, %v2209_v33  ;;  %v8758_v15 = vpop.f32.mrb[86].mxu0  ;;  %8779 = vmatprep.mubr.msk.f32.mxu0 %vm1788_vm1, %v2584_v51  ;;  %8971 = vmatprep.subr.mxu1 %v11285_v27 }
 0x222   : > { %13789 = vst [vmem:[#allocation71_spill] sm:$0xff] %v11302_v36  ;;  %v9834_v63 = vpop.eup %9833  ;;  %2490 = vst.msk [vmem:[#allocation2 + $0x50] sm:$0xff] %vm1788_vm1, %v2458_v17  ;;  %v2370_v58 = vadd.f32 1.0, %v9832_v9  ;;  %9851 = vpow2.f32 %v7705_v34  ;;  %v7707_v54 = vmul.f32 -1.442695, %v11293_v26  ;;  %v2212_v18 = vmul.f32 %v8758_v15, %v11147_v11  ;;  %v2132_v43 = vpop.f32.mrb[87].mxu0  ;;  %8780 = vmatmul.mubr.msk.f32.gmra.mrb[100].mxu0 %vm1788_vm1, %v2585_v32 }
 0x223   : > { %v9836_v23 = vpop.eup %9835  ;;  %2489 = vst.msk [vmem:[#allocation2 + $0x48] sm:$0xff] %vm1788_vm1, %v2457_v45  ;;  %v2369_v10 = vadd.f32 1.0, %v9834_v63  ;;  %9853 = vpow2.f32 %v7704_v4  ;;  %v7706_v33 = vmul.f32 -1.442695, %v11299_v30  ;;  %v5707_v34 = vld [vmem:[#allocation2 + $0x31] sm:$0xff]  ;;  %v2211_v51 = vmul.f32 %v11147_v11, %v2132_v43  ;;  %v5706_v63 = vld [vmem:[#allocation2 + $0x29] sm:$0xff] }
 0x224   : > { %v2586_v17 = vld [vmem:[#allocation2 + $0x38] sm:$0xff]  ;;  %v9838_v9 = vpop.eup %9837  ;;  %v2460_v15 = vmul.f32 %v9836_v23, %v11197_v60  ;;  %9855 = vrcp.f32 %v2370_v58  ;;  %v11320_v32 = vadd.f32 %v11152_v46, %v2212_v18  ;;  %v11323_v36 = vmul.f32 %v5707_v34, %v11258_v0  ;;  %v1831_v58 = vld [vmem:[%s13654_s18 + $0x20] sm:$0xff] }
 0x225   : > { %8782 = vmatprep.mubr.msk.f32.mxu0 %vm1788_vm1, %v2586_v17  ;;  %v9840_v45 = vpop.eup %9839  ;;  %v2459_v4 = vmul.f32 %v9838_v9, %v11200_v55  ;;  %9857 = vrcp.f32 %v2369_v10  ;;  %v11328_v43 = vadd.f32 %v11152_v46, %v2211_v51  ;;  %v8761_v41 = vpop.f32.mrb[88].mxu0  ;;  %v3291_v60 = vmul.f32 %v4482_v28, %v11313_v57  ;;  %v2587_v18 = vld [vmem:[#allocation2 + $0x40] sm:$0xff]  ;;  %v1832_v28 = vld [vmem:[%s13654_s18 + $0x28] sm:$0xff] }
 0x226   : > { %13790 = vst [vmem:[#allocation72_spill] sm:$0xff] %v11323_v36  ;;  %v9842_v0 = vpop.eup %9841  ;;  %2492 = vst.msk [vmem:[#allocation2 + $0x60] sm:$0xff] %vm1788_vm1, %v2460_v15  ;;  %v2372_v23 = vadd.f32 1.0, %v9840_v45  ;;  %9859 = vpow2.f32 %v7707_v54  ;;  %v7709_v55 = vmul.f32 -1.442695, %v11320_v32  ;;  %v2214_v10 = vmul.f32 %v8761_v41, %v11147_v11  ;;  %v2142_v17 = vpop.f32.mrb[89].mxu0  ;;  %8783 = vmatmul.mubr.msk.f32.gmra.mrb[102].mxu0 %vm1788_vm1, %v2587_v18 }
 0x227   : > { %v9844_v51 = vpop.eup %9843  ;;  %2491 = vst.msk [vmem:[#allocation2 + $0x58] sm:$0xff] %vm1788_vm1, %v2459_v4  ;;  %v2371_v9 = vadd.f32 1.0, %v9842_v0  ;;  %9861 = vpow2.f32 %v7706_v33  ;;  %v7708_v15 = vmul.f32 -1.442695, %v11328_v43  ;;  %8877 = vmatmul.mubr.msk.f32.gmra.mrb[2].mxu1 %vm1788_vm1, %v3291_v60  ;;  %v2213_v54 = vmul.f32 %v11147_v11, %v2142_v17  ;;  %v11348_v41 = vld [vmem:[%s13654_s18 + $0x30] sm:$0xff]  ;;  %v3262_v45 = vld [vmem:[#allocation2 + $0x39] sm:$0xff] }
 0x228   : > { %v9846_v18 = vpop.eup %9845  ;;  %v2462_v36 = vmul.f32 %v9844_v51, %v11207_v24  ;;  %9863 = vrcp.f32 %v2372_v23  ;;  %v11352_v4 = vadd.f32 %v11152_v46, %v2214_v10  ;;  %v3292_v33 = vmul.f32 %v5706_v63, %v1831_v58  ;;  %v11366_v24 = vld [vmem:[%s13654_s18 + $0x40] sm:$0xff] }
 0x229   : > { %v2461_v0 = vmul.f32 %v9846_v18, %v11210_v5  ;;  %9865 = vrcp.f32 %v2371_v9  ;;  %v11356_v60 = vadd.f32 %v11152_v46, %v2213_v54  ;;  %v8764_v17 = vpop.f32.mrb[90].mxu0  ;;  %v3293_v3 = vmul.f32 %v5707_v34, %v1832_v28  ;;  %v2589_v18 = vld [vmem:[#allocation2 + $0x50] sm:$0xff] }
 0x22a   : > { %v9848_v23 = vpop.eup %9847  ;;  %2494 = vst.msk [vmem:[#allocation2 + $0x70] sm:$0xff] %vm1788_vm1, %v2462_v36  ;;  %9867 = vpow2.f32 %v7709_v55  ;;  %v7711_v5 = vmul.f32 -1.442695, %v11352_v4  ;;  %8879 = vmatprep.mubr.msk.f32.mxu1 %vm1788_vm1, %v3292_v33  ;;  %v2216_v34 = vmul.f32 %v8764_v17, %v11147_v11  ;;  %v2152_v63 = vpop.f32.mrb[91].mxu0  ;;  %v3294_v58 = vmul.f32 %v3262_v45, %v11348_v41  ;;  %v2588_v10 = vld [vmem:[#allocation2 + $0x48] sm:$0xff] }
 0x22b   : > { %v3263_v28 = vld [vmem:[#allocation2 + $0x41] sm:$0xff]  ;;  %v11373_v51 = vld [vmem:[#allocation2 + $0x49] sm:$0xff]  ;;  %v9850_v9 = vpop.eup %9849  ;;  %2493 = vst.msk [vmem:[#allocation2 + $0x68] sm:$0xff] %vm1788_vm1, %v2461_v0  ;;  %v2464_v54 = vmul.f32 %v9848_v23, %v11217_v2  ;;  %9869 = vpow2.f32 %v7708_v15  ;;  %v7710_v36 = vmul.f32 -1.442695, %v11356_v60  ;;  %8880 = vmatmul.mubr.msk.f32.gmra.mrb[4].mxu1 %vm1788_vm1, %v3293_v3  ;;  %v2215_v55 = vmul.f32 %v11147_v11, %v2152_v63  ;;  %8785 = vmatprep.mubr.msk.f32.mxu0 %vm1788_vm1, %v2588_v10 }
 0x22c   : > { %v9852_v45 = vpop.eup %9851  ;;  %v2463_v33 = vmul.f32 %v9850_v9, %v11220_v6  ;;  %9871 = vpow2.f32 %v7711_v5  ;;  %v11383_v17 = vadd.f32 %v11152_v46, %v2216_v34  ;;  %8882 = vmatprep.mubr.msk.f32.mxu1 %vm1788_vm1, %v3294_v58  ;;  %8786 = vmatmul.mubr.msk.f32.gmra.mrb[104].mxu0 %vm1788_vm1, %v2589_v18  ;;  %v3295_v2 = vmul.f32 %v3263_v28, %v11361_v42  ;;  %v11397_v5 = vld [vmem:[%s13654_s18 + $0x48] sm:$0xff]  ;;  %v11402_v34 = vld [vmem:[%s13654_s18 + $0x50] sm:$0xff] }
 0x22d   : > { %v9854_v15 = vpop.eup %9853  ;;  %2496 = vst.msk [vmem:[#allocation2 + $0x80] sm:$0xff] %vm1788_vm1, %v2464_v54  ;;  %v2374_v3 = vadd.f32 1.0, %v9852_v45  ;;  %9873 = vpow2.f32 %v7710_v36  ;;  %v11390_v0 = vadd.f32 %v11152_v46, %v2215_v55  ;;  %v8767_v23 = vpop.f32.mrb[92].mxu0  ;;  %v3296_v6 = vmul.f32 %v11373_v51, %v11366_v24 }
 0x22e   : > { %v9856_v63 = vpop.eup %9855  ;;  %2495 = vst.msk [vmem:[#allocation2 + $0x78] sm:$0xff] %vm1788_vm1, %v2463_v33  ;;  %v2373_v58 = vadd.f32 1.0, %v9854_v15  ;;  %v7713_v10 = vmul.f32 -1.442695, %v11383_v17  ;;  %v2218_v28 = vmul.f32 %v8767_v23, %v11147_v11  ;;  %v2162_v9 = vpop.f32.mrb[93].mxu0  ;;  %v2590_v54 = vld [vmem:[#allocation2 + $0x58] sm:$0xff] }
 0x22f   : > { %v11407_v36 = vld [vmem:[#allocation2 + $0x51] sm:$0xff]  ;;  %v9858_v55 = vpop.eup %9857  ;;  %v2466_v18 = vmul.f32 %v9856_v63, %v11230_v56  ;;  %9875 = vrcp.f32 %v2374_v3  ;;  %v7712_v45 = vmul.f32 -1.442695, %v11390_v0  ;;  %8883 = vmatmul.mubr.msk.f32.gmra.mrb[6].mxu1 %vm1788_vm1, %v3295_v2  ;;  %v2217_v50 = vmul.f32 %v11147_v11, %v2162_v9  ;;  %8788 = vmatprep.mubr.msk.f32.mxu0 %vm1788_vm1, %v2590_v54  ;;  %v2591_v33 = vld [vmem:[#allocation2 + $0x60] sm:$0xff] }
 0x230   : > { %v11414_v15 = vld [vmem:[#allocation2 + $0x59] sm:$0xff]  ;;  %v9860_v23 = vpop.eup %9859  ;;  %v2465_v59 = vmul.f32 %v9858_v55, %v11234_v48  ;;  %9877 = vrcp.f32 %v2373_v58  ;;  %v11418_v62 = vadd.f32 %v11152_v46, %v2218_v28  ;;  %8885 = vmatprep.mubr.msk.f32.mxu1 %vm1788_vm1, %v3296_v6  ;;  %8789 = vmatmul.mubr.msk.f32.gmra.mrb[106].mxu0 %vm1788_vm1, %v2591_v33  ;;  %v3297_v56 = vmul.f32 %v11407_v36, %v11397_v5 }
 0x231   : > { %v9862_v2 = vpop.eup %9861  ;;  %2498 = vst.msk [vmem:[#allocation2 + $0x90] sm:$0xff] %vm1788_vm1, %v2466_v18  ;;  %v2376_v3 = vadd.f32 1.0, %v9860_v23  ;;  %9879 = vpow2.f32 %v7713_v10  ;;  %v11426_v63 = vadd.f32 %v11152_v46, %v2217_v50  ;;  %v8770_v48 = vpop.f32.mrb[94].mxu0  ;;  %v3298_v58 = vmul.f32 %v11414_v15, %v11402_v34  ;;  %v11433_v6 = vld [vmem:[%s13654_s18 + $0x58] sm:$0xff]  ;;  %v11438_v28 = vld [vmem:[%s13654_s18 + $0x60] sm:$0xff] }
 0x232   : > { %v9864_v9 = vpop.eup %9863  ;;  %2497 = vst.msk [vmem:[#allocation2 + $0x88] sm:$0xff] %vm1788_vm1, %v2465_v59  ;;  %v2375_v10 = vadd.f32 1.0, %v9862_v2  ;;  %9881 = vpow2.f32 %v7712_v45  ;;  %v7715_v50 = vmul.f32 -1.442695, %v11418_v62  ;;  %v2220_v54 = vmul.f32 %v8770_v48, %v11147_v11  ;;  %v2172_v55 = vpop.f32.mrb[95].mxu0  ;;  %v2592_v18 = vld [vmem:[#allocation2 + $0x68] sm:$0xff] }
 0x233   : > { %v11443_v33 = vld [vmem:[#allocation2 + $0x61] sm:$0xff]  ;;  %v9866_v23 = vpop.eup %9865  ;;  %v2468_v61 = vmul.f32 %v9864_v9, %v11244_v35  ;;  %9883 = vrcp.f32 %v2376_v3  ;;  %v7714_v39 = vmul.f32 -1.442695, %v11426_v63  ;;  %8886 = vmatmul.mubr.msk.f32.gmra.mrb[8].mxu1 %vm1788_vm1, %v3297_v56  ;;  %v2219_v59 = vmul.f32 %v11147_v11, %v2172_v55  ;;  %8791 = vmatprep.mubr.msk.f32.mxu0 %vm1788_vm1, %v2592_v18  ;;  %v2593_v45 = vld [vmem:[#allocation2 + $0x70] sm:$0xff] }
 0x234   : > { %v11450_v2 = vld [vmem:[#allocation2 + $0x69] sm:$0xff]  ;;  %v9868_v48 = vpop.eup %9867  ;;  %v2467_v20 = vmul.f32 %v9866_v23, %v11248_v38  ;;  %9885 = vrcp.f32 %v2375_v10  ;;  %v11454_v47 = vadd.f32 %v11152_v46, %v2220_v54  ;;  %8888 = vmatprep.mubr.msk.f32.mxu1 %vm1788_vm1, %v3298_v58  ;;  %8792 = vmatmul.mubr.msk.f32.gmra.mrb[108].mxu0 %vm1788_vm1, %v2593_v45  ;;  %v3299_v35 = vmul.f32 %v11443_v33, %v11433_v6 }
 0x235   : > { %v11463_v11 = vld [vmem:[%s13654_s18 + $0x68] sm:$0xff]  ;;  %v11468_v38 = vld [vmem:[%s13654_s18 + $0x70] sm:$0xff]  ;;  %v9870_v56 = vpop.eup %9869  ;;  %2500 = vst.msk [vmem:[#allocation2 + $0xa0] sm:$0xff] %vm1788_vm1, %v2468_v61  ;;  %v2378_v3 = vadd.f32 1.0, %v9868_v48  ;;  %9887 = vpow2.f32 %v7715_v50  ;;  %v11472_v58 = vadd.f32 %v11152_v46, %v2219_v59  ;;  %v3300_v9 = vmul.f32 %v11450_v2, %v11438_v28  ;;  %v2594_v10 = vld [vmem:[#allocation2 + $0x78] sm:$0xff] }
 0x236   : > { %v11476_v54 = vld [vmem:[#allocation2 + $0x71] sm:$0xff]  ;;  %v11478_v55 = vld [vmem:[#allocation2 + $0x79] sm:$0xff]  ;;  %v9872_v18 = vpop.eup %9871  ;;  %2499 = vst.msk [vmem:[#allocation2 + $0x98] sm:$0xff] %vm1788_vm1, %v2467_v20  ;;  %v2377_v23 = vadd.f32 1.0, %v9870_v56  ;;  %9889 = vpow2.f32 %v7714_v39  ;;  %8794 = vmatprep.mubr.msk.f32.mxu0 %vm1788_vm1, %v2594_v10  ;;  %v7717_v46 = vmul.f32 -1.442695, %v11454_v47 }
 0x237   : > { %v9874_v61 = vpop.eup %9873  ;;  %9891 = vrcp.f32 %v2378_v3  ;;  %v2380_v50 = vadd.f32 1.0, %v9872_v18  ;;  %8889 = vmatmul.mubr.msk.f32.gmra.mrb[10].mxu1 %vm1788_vm1, %v3299_v35  ;;  %v2595_v59 = vld [vmem:[#allocation2 + $0x80] sm:$0xff]  ;;  %v3301_v45 = vmul.f32 %v11476_v54, %v11463_v11  ;;  %v7716_v52 = vmul.f32 -1.442695, %v11472_v58  ;;  %v11494_v39 = vld [vmem:[%s13654_s18 + $0x78] sm:$0xff] }
 0x238   : > { %9893 = vrcp.f32 %v2377_v23  ;;  %v2379_v48 = vadd.f32 1.0, %v9874_v61  ;;  %8891 = vmatprep.mubr.msk.f32.mxu1 %vm1788_vm1, %v3300_v9  ;;  %8795 = vmatmul.mubr.msk.f32.gmra.mrb[110].mxu0 %vm1788_vm1, %v2595_v59  ;;  %v3302_v20 = vmul.f32 %v11478_v55, %v11468_v38  ;;  %v11499_v35 = vld [vmem:[%s13654_s18 + $0x80] sm:$0xff]  ;;  %v2597_v31 = vld [vmem:[#allocation2 + $0x90] sm:$0xff] }
 0x239   : > { %v9876_v56 = vpop.eup %9875  ;;  %9895 = vrcp.f32 %v2380_v50  ;;  %v2596_v3 = vld [vmem:[#allocation2 + $0x88] sm:$0xff] }
 0x23a   : > { %v11501_v10 = vld [vmem:[#allocation2 + $0x81] sm:$0xff]  ;;  %v11503_v9 = vld [vmem:[#allocation2 + $0x89] sm:$0xff]  ;;  %v9878_v18 = vpop.eup %9877  ;;  %v2470_v23 = vmul.f32 %v9876_v56, %v11267_v16  ;;  %9897 = vrcp.f32 %v2379_v48  ;;  %8797 = vmatprep.mubr.msk.f32.mxu0 %vm1788_vm1, %v2596_v3 }
 0x23b   : > { %v9880_v61 = vpop.eup %9879  ;;  %v2469_v59 = vmul.f32 %v9878_v18, %v11271_v44  ;;  %9899 = vpow2.f32 %v7717_v46  ;;  %8892 = vmatmul.mubr.msk.f32.gmra.mrb[12].mxu1 %vm1788_vm1, %v3301_v45  ;;  %v3303_v50 = vmul.f32 %v11501_v10, %v11494_v39  ;;  %v3304_v16 = vmul.f32 %v11503_v9, %v11499_v35  ;;  %v11519_v44 = vld [vmem:[%s13654_s18 + $0x88] sm:$0xff]  ;;  %v11524_v46 = vld [vmem:[%s13654_s18 + $0x90] sm:$0xff] }
 0x23c   : > { %v9882_v14 = vpop.eup %9881  ;;  %2502 = vst.msk [vmem:[#allocation2 + $0xb0] sm:$0xff] %vm1788_vm1, %v2470_v23  ;;  %v2382_v22 = vadd.f32 1.0, %v9880_v61  ;;  %9901 = vpow2.f32 %v7716_v52  ;;  %8894 = vmatprep.mubr.msk.f32.mxu1 %vm1788_vm1, %v3302_v20  ;;  %8798 = vmatmul.mubr.msk.f32.gmra.mrb[112].mxu0 %vm1788_vm1, %v2597_v31  ;;  %v2599_v61 = vld [vmem:[#allocation2 + $0xa0] sm:$0xff] }
 0x23d   : > { %v9884_v45 = vpop.eup %9883  ;;  %2501 = vst.msk [vmem:[#allocation2 + $0xa8] sm:$0xff] %vm1788_vm1, %v2469_v59  ;;  %v2381_v52 = vadd.f32 1.0, %v9882_v14  ;;  %v2598_v48 = vld [vmem:[#allocation2 + $0x98] sm:$0xff] }
 0x23e   : > { %v11527_v20 = vld [vmem:[#allocation2 + $0x91] sm:$0xff]  ;;  %v11529_v31 = vld [vmem:[#allocation2 + $0x99] sm:$0xff]  ;;  %v9886_v56 = vpop.eup %9885  ;;  %v2472_v3 = vmul.f32 %v9884_v45, %v11293_v26  ;;  %9903 = vrcp.f32 %v2382_v22  ;;  %8800 = vmatprep.mubr.msk.f32.mxu0 %vm1788_vm1, %v2598_v48 }
 0x23f   : > { %v9888_v18 = vpop.eup %9887  ;;  %v2471_v23 = vmul.f32 %v9886_v56, %v11299_v30  ;;  %9905 = vrcp.f32 %v2381_v52  ;;  %8895 = vmatmul.mubr.msk.f32.gmra.mrb[14].mxu1 %vm1788_vm1, %v3303_v50  ;;  %v3305_v14 = vmul.f32 %v11527_v20, %v11519_v44  ;;  %v3306_v22 = vmul.f32 %v11529_v31, %v11524_v46  ;;  %v11547_v52 = vld [vmem:[%s13654_s18 + $0x98] sm:$0xff] }
 0x240   : > { %v9890_v59 = vpop.eup %9889  ;;  %2504 = vst.msk [vmem:[#allocation2 + $0xc0] sm:$0xff] %vm1788_vm1, %v2472_v3  ;;  %v2384_v7 = vadd.f32 1.0, %v9888_v18  ;;  %8897 = vmatprep.mubr.msk.f32.mxu1 %vm1788_vm1, %v3304_v16  ;;  %8801 = vmatmul.mubr.msk.f32.gmra.mrb[114].mxu0 %vm1788_vm1, %v2599_v61  ;;  %v11552_v16 = vld [vmem:[%s13654_s18 + $0xa0] sm:$0xff] }
 0x241   : > { %v9892_v26 = vpop.eup %9891  ;;  %2503 = vst.msk [vmem:[#allocation2 + $0xb8] sm:$0xff] %vm1788_vm1, %v2471_v23  ;;  %v2383_v30 = vadd.f32 1.0, %v9890_v59 }
 0x242   : > { %v9894_v50 = vpop.eup %9893  ;;  %v2474_v45 = vmul.f32 %v9892_v26, %v11320_v32  ;;  %9907 = vrcp.f32 %v2384_v7 }
 0x243   : > { %v9896_v48 = vpop.eup %9895  ;;  %v2473_v56 = vmul.f32 %v9894_v50, %v11328_v43  ;;  %9909 = vrcp.f32 %v2383_v30  ;;  %8898 = vmatmul.mubr.msk.f32.gmra.mrb[16].mxu1 %vm1788_vm1, %v3305_v14  ;;  %v2601_v14 = vld [vmem:[#allocation2 + $0xb0] sm:$0xff]  ;;  %v11575_v30 = vld [vmem:[%s13654_s18 + $0xa8] sm:$0xff] }
 0x244   : > { %v9898_v3 = vpop.eup %9897  ;;  %2506 = vst.msk [vmem:[#allocation2 + $0xd0] sm:$0xff] %vm1788_vm1, %v2474_v45  ;;  %v2476_v7 = vmul.f32 %v9896_v48, %v11352_v4  ;;  %8900 = vmatprep.mubr.msk.f32.mxu1 %vm1788_vm1, %v3306_v22  ;;  %v2600_v32 = vld [vmem:[#allocation2 + $0xa8] sm:$0xff] }
 0x245   : > { %v11559_v18 = vld [vmem:[#allocation2 + $0xa1] sm:$0xff]  ;;  %v11561_v23 = vld [vmem:[#allocation2 + $0xa9] sm:$0xff]  ;;  %v9900_v61 = vpop.eup %9899  ;;  %2505 = vst.msk [vmem:[#allocation2 + $0xc8] sm:$0xff] %vm1788_vm1, %v2473_v56  ;;  %v2475_v43 = vmul.f32 %v9898_v3, %v11356_v60  ;;  %8803 = vmatprep.mubr.msk.f32.mxu0 %vm1788_vm1, %v2600_v32 }
 0x246   : > { %v3307_v59 = vmul.f32 %v11559_v18, %v11547_v52  ;;  %v3308_v4 = vmul.f32 %v11561_v23, %v11552_v16  ;;  %v9902_v22 = vpop.eup %9901  ;;  %2508 = vst.msk [vmem:[#allocation2 + $0xe0] sm:$0xff] %vm1788_vm1, %v2476_v7  ;;  %v2386_v26 = vadd.f32 1.0, %v9900_v61  ;;  %8804 = vmatmul.mubr.msk.f32.gmra.mrb[116].mxu0 %vm1788_vm1, %v2601_v14  ;;  %v11580_v60 = vld [vmem:[%s13654_s18 + $0xb0] sm:$0xff] }
 0x247   : > { %2507 = vst.msk [vmem:[#allocation2 + $0xd8] sm:$0xff] %vm1788_vm1, %v2475_v43  ;;  %v2385_v50 = vadd.f32 1.0, %v9902_v22  ;;  %v2603_v61 = vld [vmem:[#allocation2 + $0xc0] sm:$0xff] }
 0x248   : > { %8901 = vmatmul.mubr.msk.f32.gmra.mrb[18].mxu1 %vm1788_vm1, %v3307_v59  ;;  %v9904_v45 = vpop.eup %9903  ;;  %9911 = vrcp.f32 %v2386_v26  ;;  %v2602_v48 = vld [vmem:[#allocation2 + $0xb8] sm:$0xff] }
 0x249   : > { %8903 = vmatprep.mubr.msk.f32.mxu1 %vm1788_vm1, %v3308_v4  ;;  %v11585_v56 = vld [vmem:[#allocation2 + $0xb1] sm:$0xff]  ;;  %v11587_v3 = vld [vmem:[#allocation2 + $0xb9] sm:$0xff]  ;;  %v9906_v7 = vpop.eup %9905  ;;  %v2478_v32 = vmul.f32 %v9904_v45, %v11383_v17  ;;  %9913 = vrcp.f32 %v2385_v50  ;;  %8806 = vmatprep.mubr.msk.f32.mxu0 %vm1788_vm1, %v2602_v48  ;;  %v11622_v48 = vmul.f32 %v11373_v51, %v11348_v41 }
 0x24a   : > { %v3309_v43 = vmul.f32 %v11585_v56, %v11575_v30  ;;  %v3310_v14 = vmul.f32 %v11587_v3, %v11580_v60  ;;  %v2477_v59 = vmul.f32 %v9906_v7, %v11390_v0  ;;  %8807 = vmatmul.mubr.msk.f32.gmra.mrb[118].mxu0 %vm1788_vm1, %v2603_v61  ;;  %v11600_v4 = vld [vmem:[%s13654_s18 + $0xb8] sm:$0xff]  ;;  %v11605_v17 = vld [vmem:[%s13654_s18 + $0xc0] sm:$0xff]  ;;  %v11612_v0 = vld [vmem:[%s13654_s18 + $0xc8] sm:$0xff]  ;;  %v11626_v7 = vmul.f32 %v11407_v36, %v11361_v42 }
 0x24b   : > { %2510 = vst.msk [vmem:[#allocation2 + $0xf0] sm:$0xff] %vm1788_vm1, %v2478_v32  ;;  %13791 = vst [vmem:[#allocation73_spill] sm:$0xff] %v11622_v48  ;;  %v11637_v41 = vld [vmem:[%s13654_s18 + $0xd0] sm:$0xff]  ;;  %v11641_v42 = vmul.f32 %v11414_v15, %v11366_v24 }
 0x24c   : > { %8904 = vmatmul.mubr.msk.f32.gmra.mrb[20].mxu1 %vm1788_vm1, %v3309_v43  ;;  %v9908_v22 = vpop.eup %9907  ;;  %2509 = vst.msk [vmem:[#allocation2 + $0xe8] sm:$0xff] %vm1788_vm1, %v2477_v59  ;;  %v2604_v26 = vld [vmem:[#allocation2 + $0xc8] sm:$0xff]  ;;  %13792 = vst [vmem:[#allocation74_spill] sm:$0xff] %v11626_v7  ;;  %v2605_v43 = vld [vmem:[#allocation2 + $0xd0] sm:$0xff] }
 0x24d   : > { %8906 = vmatprep.mubr.msk.f32.mxu1 %vm1788_vm1, %v3310_v14  ;;  %v11616_v50 = vld [vmem:[#allocation2 + $0xc1] sm:$0xff]  ;;  %v11618_v45 = vld [vmem:[#allocation2 + $0xc9] sm:$0xff]  ;;  %v9910_v32 = vpop.eup %9909  ;;  %v2480_v61 = vmul.f32 %v9908_v22, %v11418_v62  ;;  %8809 = vmatprep.mubr.msk.f32.mxu0 %vm1788_vm1, %v2604_v26  ;;  %13793 = vst [vmem:[#allocation75_spill] sm:$0xff] %v11641_v42 }
 0x24e   : > { %v3311_v14 = vmul.f32 %v11616_v50, %v11600_v4  ;;  %v3312_v59 = vmul.f32 %v11618_v45, %v11605_v17  ;;  %v2479_v62 = vmul.f32 %v9910_v32, %v11426_v63  ;;  %8810 = vmatmul.mubr.msk.f32.gmra.mrb[120].mxu0 %vm1788_vm1, %v2605_v43  ;;  %v2606_v51 = vld [vmem:[#allocation2 + $0xd8] sm:$0xff]  ;;  %v2607_v15 = vld [vmem:[#allocation2 + $0xe0] sm:$0xff]  ;;  %v11668_v43 = vmul.f32 %v11450_v2, %v11402_v34 }
 0x24f   : > { %v3281_v36 = vld [vmem:[#allocation2 + $0xd1] sm:$0xff]  ;;  %v3282_v22 = vld [vmem:[#allocation2 + $0xd9] sm:$0xff]  ;;  %2512 = vst.msk [vmem:[#allocation2 + $0x100] sm:$0xff] %vm1788_vm1, %v2480_v61  ;;  %8812 = vmatprep.mubr.msk.f32.mxu0 %vm1788_vm1, %v2606_v51  ;;  %v11664_v61 = vmul.f32 %v11443_v33, %v11397_v5  ;;  %v11681_v51 = vmul.f32 %v11501_v10, %v11463_v11  ;;  %v11685_v5 = vmul.f32 %v11503_v9, %v11468_v38  ;;  %v11700_v38 = vld [vmem:[%s13654_s18 + $0xe8] sm:$0xff] }
 0x250   : > { %8907 = vmatmul.mubr.msk.f32.gmra.mrb[22].mxu1 %vm1788_vm1, %v3311_v14  ;;  %v3313_v26 = vmul.f32 %v3281_v36, %v11612_v0  ;;  %2511 = vst.msk [vmem:[#allocation2 + $0xf8] sm:$0xff] %vm1788_vm1, %v2479_v62  ;;  %v3314_v24 = vmul.f32 %v3282_v22, %v11637_v41  ;;  %v11655_v63 = vld [vmem:[%s13654_s18 + $0xd8] sm:$0xff]  ;;  %v11660_v32 = vld [vmem:[%s13654_s18 + $0xe0] sm:$0xff]  ;;  %13795 = vst [vmem:[#allocation77_spill] sm:$0xff] %v11668_v43  ;;  %v11672_v14 = vmul.f32 %v11476_v54, %v11433_v6 }
 0x251   : > { %8909 = vmatprep.mubr.msk.f32.mxu1 %vm1788_vm1, %v3312_v59  ;;  %13794 = vst [vmem:[#allocation76_spill] sm:$0xff] %v11664_v61  ;;  %v11676_v59 = vmul.f32 %v11478_v55, %v11438_v28  ;;  %13798 = vst [vmem:[#allocation80_spill] sm:$0xff] %v11681_v51  ;;  %v11689_v34 = vmul.f32 %v11527_v20, %v11494_v39  ;;  %v11693_v6 = vmul.f32 %v11529_v31, %v11499_v35  ;;  %v2515_v20 = vld [vmem:[#allocation2 + $0x7] sm:$0xff]  ;;  %v2516_v31 = vld [vmem:[#allocation2 + $0xf] sm:$0xff] }
 0x252   : > { %13796 = vst [vmem:[#allocation78_spill] sm:$0xff] %v11672_v14  ;;  %v9912_v62 = vpop.eup %9911  ;;  %8813 = vmatmul.mubr.msk.f32.gmra.mrb[122].mxu0 %vm1788_vm1, %v2607_v15  ;;  %13799 = vst [vmem:[#allocation81_spill] sm:$0xff] %v11685_v5  ;;  %v11704_v55 = vmul.f32 %v11559_v18, %v11519_v44  ;;  %v11708_v39 = vmul.f32 %v11561_v23, %v11524_v46  ;;  %v1857_v44 = vld [vmem:[%s13654_s18 + $0xf0] sm:$0xff]  ;;  %v11725_v46 = vld [vmem:[%s13653_s17] sm:$0xff] }
 0x253   : > { %13797 = vst [vmem:[#allocation79_spill] sm:$0xff] %v11676_v59  ;;  %13800 = vst [vmem:[#allocation82_spill] sm:$0xff] %v11689_v34  ;;  %v9914_v28 = vpop.eup %9913  ;;  %v2482_v33 = vmul.f32 %v9912_v62, %v11454_v47  ;;  %v2608_v2 = vld [vmem:[#allocation2 + $0xe8] sm:$0xff]  ;;  %v11712_v47 = vmul.f32 %v11585_v56, %v11547_v52  ;;  %v11731_v52 = vld [vmem:[%s13653_s17 + $0x10] sm:$0xff]  ;;  %v11752_v62 = vmul.f32 %v11587_v3, %v11552_v16 }
 0x254   : > { %13801 = vst [vmem:[#allocation83_spill] sm:$0xff] %v11693_v6  ;;  %8910 = vmatmul.mubr.msk.f32.gmra.mrb[24].mxu1 %vm1788_vm1, %v3313_v26  ;;  %v3283_v11 = vld [vmem:[#allocation2 + $0xe1] sm:$0xff]  ;;  %v3284_v54 = vld [vmem:[#allocation2 + $0xe9] sm:$0xff]  ;;  %13802 = vst [vmem:[#allocation84_spill] sm:$0xff] %v11704_v55  ;;  %v2481_v35 = vmul.f32 %v9914_v28, %v11472_v58  ;;  %8815 = vmatprep.mubr.msk.f32.mxu0 %vm1788_vm1, %v2608_v2  ;;  %v11756_v28 = vmul.f32 %v11616_v50, %v11575_v30 }
 0x255   : > { %13803 = vst [vmem:[#allocation85_spill] sm:$0xff] %v11708_v39  ;;  %13804 = vst [vmem:[#allocation86_spill] sm:$0xff] %v11712_v47  ;;  %8912 = vmatprep.mubr.msk.f32.mxu1 %vm1788_vm1, %v3314_v24  ;;  %v3315_v10 = vmul.f32 %v3283_v11, %v11655_v63  ;;  %v3316_v9 = vmul.f32 %v3284_v54, %v11660_v32  ;;  %v2609_v58 = vld [vmem:[#allocation2 + $0xf0] sm:$0xff]  ;;  %v11742_v56 = vld [vmem:[%s13653_s17 + $0x8] sm:$0xff]  ;;  %v11763_v2 = vmul.f32 %v3281_v36, %v11600_v4 }
 0x256   : > { %2514 = vst.msk [vmem:[#allocation2 + $0x110] sm:$0xff] %vm1788_vm1, %v2482_v33  ;;  %v11733_v18 = vld [vmem:[#allocation2 + $0x17] sm:$0xff]  ;;  %2513 = vst.msk [vmem:[#allocation2 + $0x108] sm:$0xff] %vm1788_vm1, %v2481_v35  ;;  %8816 = vmatmul.mubr.msk.f32.gmra.mrb[124].mxu0 %vm1788_vm1, %v2609_v58  ;;  %v11744_v26 = vld [vmem:[#allocation2 + $0x3f] sm:$0xff]  ;;  %v11760_v33 = vmul.f32 %v11618_v45, %v11580_v60  ;;  %v2547_v39 = vmul.f32 %v2515_v20, %v11725_v46  ;;  %v11773_v30 = vmul.f32 %v3282_v22, %v11605_v17 }
 0x257   : > { %v11735_v23 = vld [vmem:[#allocation2 + $0x37] sm:$0xff]  ;;  %v11746_v24 = vld [vmem:[#allocation2 + $0x47] sm:$0xff]  ;;  %v11748_v15 = vld [vmem:[#allocation2 + $0x4f] sm:$0xff]  ;;  %13805 = vst [vmem:[#allocation87_spill] sm:$0xff] %v11752_v62  ;;  %v11776_v60 = vmul.f32 %v3283_v11, %v11612_v0  ;;  %v11779_v3 = vmul.f32 %v3284_v54, %v11637_v41  ;;  %v3707_v42 = vmul.f32 %v11733_v18, %v11725_v46 }
 0x258   : > { %13806 = vst [vmem:[#allocation88_spill] sm:$0xff] %v11756_v28  ;;  %13807 = vst [vmem:[#allocation89_spill] sm:$0xff] %v11760_v33  ;;  %8913 = vmatmul.mubr.msk.f32.gmra.mrb[26].mxu1 %vm1788_vm1, %v3315_v10  ;;  %v2610_v35 = vld [vmem:[#allocation2 + $0xf8] sm:$0xff]  ;;  %v11787_v45 = vld [vmem:[%s13653_s17 + $0x20] sm:$0xff]  ;;  %v2548_v10 = vmul.f32 %v2516_v31, %v11742_v56  ;;  %v11867_v6 = vmul.f32 %v11735_v23, %v11731_v52 }
 0x259   : > { %13808 = vst [vmem:[#allocation90_spill] sm:$0xff] %v11763_v2  ;;  %v3285_v58 = vld [vmem:[#allocation2 + $0xf1] sm:$0xff]  ;;  %v3286_v47 = vld [vmem:[#allocation2 + $0xf9] sm:$0xff]  ;;  %13809 = vst [vmem:[#allocation91_spill] sm:$0xff] %v11773_v30  ;;  %8915 = vmatprep.mubr.msk.f32.mxu1 %vm1788_vm1, %v3316_v9  ;;  %8818 = vmatprep.mubr.msk.f32.mxu0 %vm1788_vm1, %v2610_v35 }
 0x25a   : > { %v11770_v16 = vld [vmem:[%s13653_s17 + $0x18] sm:$0xff]  ;;  %13810 = vst [vmem:[#allocation92_spill] sm:$0xff] %v11776_v60  ;;  %13811 = vst [vmem:[#allocation93_spill] sm:$0xff] %v11779_v3  ;;  %v3317_v4 = vmul.f32 %v3285_v58, %v11700_v38  ;;  %v3318_v50 = vmul.f32 %v3286_v47, %v1857_v44  ;;  %v11792_v17 = vld [vmem:[%s13653_s17 + $0x28] sm:$0xff]  ;;  %v11806_v11 = vmul.f32 %v3285_v58, %v11655_v63 }
 0x25b   : > { %v11797_v0 = vld [vmem:[%s13653_s17 + $0x30] sm:$0xff]  ;;  %v11801_v36 = vld [vmem:[#allocation2 + $0x5f] sm:$0xff]  ;;  %v11803_v22 = vld [vmem:[#allocation2 + $0x67] sm:$0xff]  ;;  %v2549_v60 = vmul.f32 %v11733_v18, %v11731_v52  ;;  %v11863_v55 = vmul.f32 %v3286_v47, %v11660_v32  ;;  %13820 = vst [vmem:[#allocation102_spill] sm:$0xff] %v11867_v6  ;;  %v11871_v34 = vmul.f32 %v11744_v26, %v11770_v16  ;;  %v11883_v47 = vmul.f32 %v11746_v24, %v11787_v45 }
 0x25c   : > { %v11799_v41 = vld [vmem:[#allocation2 + $0x57] sm:$0xff]  ;;  %13812 = vst [vmem:[#allocation94_spill] sm:$0xff] %v11806_v11  ;;  %v2611_v54 = vld [vmem:[#allocation2 + $0x100] sm:$0xff]  ;;  %v11827_v31 = vld [vmem:[%s13653_s17 + $0x48] sm:$0xff]  ;;  %8916 = vmatmul.mubr.msk.f32.gmra.mrb[28].mxu1 %vm1788_vm1, %v3317_v4  ;;  %v11887_v6 = vmul.f32 %v11748_v15, %v11792_v17 }
 0x25d   : > { %v1858_v9 = vld [vmem:[%s13654_s18 + $0xf8] sm:$0xff]  ;;  %v11812_v20 = vld [vmem:[#allocation2 + $0x27] sm:$0xff]  ;;  %v11832_v58 = vld [vmem:[%s13653_s17 + $0x50] sm:$0xff]  ;;  %8819 = vmatmul.mubr.msk.f32.gmra.mrb[126].mxu0 %vm1788_vm1, %v2611_v54  ;;  %13819 = vst [vmem:[#allocation101_spill] sm:$0xff] %v11863_v55  ;;  %8918 = vmatprep.mubr.msk.f32.mxu1 %vm1788_vm1, %v3318_v50 }
 0x25e   : > { %v2518_v44 = vld [vmem:[#allocation2 + $0x1f] sm:$0xff]  ;;  %v11834_v11 = vld [vmem:[#allocation2 + $0x6f] sm:$0xff]  ;;  %v11836_v3 = vld [vmem:[#allocation2 + $0x77] sm:$0xff]  ;;  %13821 = vst [vmem:[#allocation103_spill] sm:$0xff] %v11871_v34  ;;  %8823 = vmatprep.mubr.msk.f32.mxu0 %vm1788_vm1, %v2547_v39  ;;  %v11891_v34 = vmul.f32 %v11799_v41, %v11797_v0  ;;  %v2551_v40 = vmul.f32 %v11812_v20, %v11787_v45 }
 0x25f   : > { %v11817_v35 = vld [vmem:[%s13653_s17 + $0x38] sm:$0xff]  ;;  %v11822_v63 = vld [vmem:[%s13653_s17 + $0x40] sm:$0xff]  ;;  %13813 = vst [vmem:[#allocation95_spill] sm:$0xff] %v11834_v11  ;;  %13814 = vst [vmem:[#allocation96_spill] sm:$0xff] %v11836_v3  ;;  %v11920_v14 = vmul.f32 %v11834_v11, %v11827_v31  ;;  %v11924_v43 = vmul.f32 %v11836_v3, %v11832_v58  ;;  %v2550_v29 = vmul.f32 %v2518_v44, %v11770_v16 }
 0x260   : > { %v11844_v30 = vld [vmem:[%s13653_s17 + $0x58] sm:$0xff]  ;;  %v11849_v2 = vld [vmem:[%s13653_s17 + $0x60] sm:$0xff]  ;;  %v11854_v33 = vld [vmem:[%s13653_s17 + $0x68] sm:$0xff]  ;;  %13824 = vst [vmem:[#allocation106_spill] sm:$0xff] %v11883_v47  ;;  %v11916_v50 = vmul.f32 %v11803_v22, %v11822_v63  ;;  %v3708_v3 = vmul.f32 %v2518_v44, %v11742_v56 }
 0x261   : > { %13815 = vst [vmem:[#allocation97_spill] sm:$0xff] %v11854_v33  ;;  %v11856_v28 = vld [vmem:[#allocation2 + $0x7f] sm:$0xff]  ;;  %v11858_v54 = vld [vmem:[#allocation2 + $0x87] sm:$0xff]  ;;  %v11860_v62 = vld [vmem:[#allocation2 + $0x8f] sm:$0xff]  ;;  %8824 = vmatmul.mubr.msk.f32.vlgmr.msra.gmra.mrb[96].mxu0 %vm1788_vm1, %v2548_v10 }
 0x262   : > { %13816 = vst [vmem:[#allocation98_spill] sm:$0xff] %v11856_v28  ;;  %13817 = vst [vmem:[#allocation99_spill] sm:$0xff] %v11858_v54  ;;  %v11875_v5 = vld [vmem:[#allocation2 + $0x97] sm:$0xff]  ;;  %v11877_v51 = vld [vmem:[#allocation2 + $0x9f] sm:$0xff]  ;;  %v11954_v7 = vmul.f32 %v11856_v28, %v11844_v30  ;;  %v11958_v48 = vmul.f32 %v11858_v54, %v11849_v2  ;;  %v11962_v13 = vmul.f32 %v11860_v62, %v11854_v33  ;;  %8826 = vmatprep.mubr.msk.f32.mxu0 %vm1788_vm1, %v2549_v60 }
 0x263   : > { %13818 = vst [vmem:[#allocation100_spill] sm:$0xff] %v11860_v62  ;;  %13822 = vst [vmem:[#allocation104_spill] sm:$0xff] %v11877_v51  ;;  %v11879_v59 = vld [vmem:[#allocation2 + $0xa7] sm:$0xff]  ;;  %v11897_v39 = vld [vmem:[%s13653_s17 + $0x70] sm:$0xff]  ;;  %9222 = vmatpush3.msra.mxu0 %v11278_v53 }
 0x264   : > { %13823 = vst [vmem:[#allocation105_spill] sm:$0xff] %v11879_v59  ;;  %13825 = vst [vmem:[#allocation107_spill] sm:$0xff] %v11887_v6  ;;  %v11902_v4 = vld [vmem:[%s13653_s17 + $0x78] sm:$0xff]  ;;  %v11904_v47 = vld [vmem:[#allocation2 + $0xaf] sm:$0xff]  ;;  %v12018_v56 = vmul.f32 %v11875_v5, %v11897_v39 }
 0x265   : > { %13826 = vst [vmem:[#allocation108_spill] sm:$0xff] %v11891_v34  ;;  %v11906_v55 = vld [vmem:[#allocation2 + $0xb7] sm:$0xff]  ;;  %v11908_v6 = vld [vmem:[#allocation2 + $0xbf] sm:$0xff]  ;;  %v11912_v34 = vmul.f32 %v11801_v36, %v11817_v35  ;;  %13829 = vst [vmem:[#allocation111_spill] sm:$0xff] %v11916_v50  ;;  %v12022_v60 = vmul.f32 %v11877_v51, %v11902_v4  ;;  %8827 = vmatmul.mubr.msk.f32.gmra.mrb[98].mxu0 %vm1788_vm1, %v2550_v29 }
 0x266   : > { %13827 = vst [vmem:[#allocation109_spill] sm:$0xff] %v11908_v6  ;;  %13830 = vst [vmem:[#allocation112_spill] sm:$0xff] %v11920_v14  ;;  %v3287_v61 = vld [vmem:[#allocation2 + $0x101] sm:$0xff]  ;;  %v11941_v14 = vld [vmem:[%s13653_s17 + $0x90] sm:$0xff]  ;;  %8829 = vmatprep.mubr.msk.f32.mxu0 %vm1788_vm1, %v2551_v40 }
 0x267   : > { %13828 = vst [vmem:[#allocation110_spill] sm:$0xff] %v11912_v34  ;;  %13831 = vst [vmem:[#allocation113_spill] sm:$0xff] %v11924_v43  ;;  %v11931_v34 = vld [vmem:[%s13653_s17 + $0x80] sm:$0xff]  ;;  %v11936_v50 = vld [vmem:[%s13653_s17 + $0x88] sm:$0xff]  ;;  %v3319_v12 = vmul.f32 %v3287_v61, %v1858_v9  ;;  %v11995_v28 = vmul.f32 %v3287_v61, %v11700_v38 }
 0x268   : > { %v11946_v43 = vld [vmem:[%s13653_s17 + $0x98] sm:$0xff]  ;;  %v11948_v46 = vld [vmem:[#allocation2 + $0xc7] sm:$0xff]  ;;  %v11950_v18 = vld [vmem:[#allocation2 + $0xcf] sm:$0xff]  ;;  %13832 = vst [vmem:[#allocation114_spill] sm:$0xff] %v11954_v7  ;;  %v12036_v53 = vmul.f32 %v11879_v59, %v11931_v34 }
 0x269   : > { %13833 = vst [vmem:[#allocation115_spill] sm:$0xff] %v11958_v48  ;;  %13834 = vst [vmem:[#allocation116_spill] sm:$0xff] %v11962_v13  ;;  %v11971_v7 = vld [vmem:[%s13653_s17 + $0xa0] sm:$0xff]  ;;  %v11976_v48 = vld [vmem:[%s13653_s17 + $0xa8] sm:$0xff]  ;;  %8919 = vmatmul.mubr.msk.f32.gmra.mrb[30].mxu1 %vm1788_vm1, %v3319_v12  ;;  %v12044_v12 = vmul.f32 %v11906_v55, %v11941_v14 }
 0x26a   : > { %v11981_v10 = vld [vmem:[%s13653_s17 + $0xb0] sm:$0xff]  ;;  %v11986_v9 = vld [vmem:[%s13653_s17 + $0xb8] sm:$0xff]  ;;  %v11992_v54 = vld [vmem:[#allocation2 + $0xe7] sm:$0xff]  ;;  %13836 = vst [vmem:[#allocation118_spill] sm:$0xff] %v11995_v28  ;;  %8923 = vmatprep.mubr.msk.f32.mxu1 %vm1788_vm1, %v3707_v42 }
 0x26b   : > { %v11988_v13 = vld [vmem:[#allocation2 + $0xd7] sm:$0xff]  ;;  %v11990_v62 = vld [vmem:[#allocation2 + $0xdf] sm:$0xff]  ;;  %v12007_v11 = vld [vmem:[%s13653_s17 + $0xc8] sm:$0xff]  ;;  %13837 = vst [vmem:[#allocation119_spill] sm:$0xff] %v12018_v56  ;;  %v12040_v56 = vmul.f32 %v11904_v47, %v11936_v50 }
 0x26c   : > { %13835 = vst [vmem:[#allocation117_spill] sm:$0xff] %v11990_v62  ;;  %v12009_v33 = vld [vmem:[#allocation2 + $0xef] sm:$0xff]  ;;  %v12011_v25 = vld [vmem:[#allocation2 + $0xf7] sm:$0xff]  ;;  %v12013_v61 = vld [vmem:[#allocation2 + $0xff] sm:$0xff]  ;;  %v12070_v42 = vmul.f32 %v11990_v62, %v11986_v9  ;;  %v3709_v62 = vmul.f32 %v11812_v20, %v11731_v52  ;;  %v2553_v52 = vmul.f32 %v11735_v23, %v11797_v0 }
 0x26d   : > { %13838 = vst [vmem:[#allocation120_spill] sm:$0xff] %v12022_v60  ;;  %v12028_v44 = vld [vmem:[%s13653_s17 + $0xd0] sm:$0xff]  ;;  %v12030_v28 = vld [vmem:[#allocation2 + $0x107] sm:$0xff]  ;;  %13839 = vst [vmem:[#allocation121_spill] sm:$0xff] %v12036_v53  ;;  %v12048_v60 = vmul.f32 %v11908_v6, %v11946_v43  ;;  %8924 = vmatmul.mubr.msk.f32.vlgmr.msra.gmra.mrb[0].mxu1 %vm1788_vm1, %v3708_v3 }
 0x26e   : > { %v12032_v21 = vld [vmem:[#allocation2 + $0x10f] sm:$0xff]  ;;  %13840 = vst [vmem:[#allocation122_spill] sm:$0xff] %v12040_v56  ;;  %13841 = vst [vmem:[#allocation123_spill] sm:$0xff] %v12044_v12  ;;  %v12054_v59 = vld [vmem:[%s13653_s17 + $0xd8] sm:$0xff]  ;;  %v12058_v56 = vmul.f32 %v11948_v46, %v11971_v7  ;;  %v12062_v12 = vmul.f32 %v11950_v18, %v11976_v48  ;;  %v12093_v29 = vmul.f32 %v12011_v25, %v12028_v44  ;;  %8972 = vmatpush3.msra.mxu1 %v11285_v27 }
 0x26f   : > { %13842 = vst [vmem:[#allocation124_spill] sm:$0xff] %v12048_v60  ;;  %v2520_v51 = vld [vmem:[#allocation2 + $0x2f] sm:$0xff]  ;;  %v4486_v53 = vld [vmem:[#allocation2 + $0x41] sm:$0xff]  ;;  %v12066_v60 = vmul.f32 %v11988_v13, %v11981_v10  ;;  %13846 = vst [vmem:[#allocation128_spill] sm:$0xff] %v12070_v42  ;;  %v12097_v42 = vmul.f32 %v12013_v61, %v12054_v59  ;;  %8926 = vmatprep.mubr.msk.f32.mxu1 %vm1788_vm1, %v3709_v62  ;;  %v3711_v27 = vmul.f32 %v11735_v23, %v11787_v45 }
 0x270   : > { %13843 = vst [vmem:[#allocation125_spill] sm:$0xff] %v12058_v56  ;;  %13844 = vst [vmem:[#allocation126_spill] sm:$0xff] %v12062_v12  ;;  %v12076_v6 = vld [vmem:[%s13653_s17 + $0xe0] sm:$0xff]  ;;  %v12081_v56 = vld [vmem:[%s13653_s17 + $0xe8] sm:$0xff]  ;;  %v12085_v12 = vmul.f32 %v11992_v54, %v12002_v37  ;;  %v2552_v40 = vmul.f32 %v2520_v51, %v11792_v17  ;;  %v3710_v20 = vmul.f32 %v2520_v51, %v11770_v16 }
 0x271   : > { %13845 = vst [vmem:[#allocation127_spill] sm:$0xff] %v12066_v60  ;;  %v12089_v60 = vmul.f32 %v12009_v33, %v12007_v11  ;;  %13849 = vst [vmem:[#allocation131_spill] sm:$0xff] %v12093_v29  ;;  %v12113_v29 = vmul.f32 %v12032_v21, %v12081_v56  ;;  %v12130_v3 = vld [vmem:[%s13641_s5] ss:$0 sm:$0xff]  ;;  %v2554_v62 = vmul.f32 %v11744_v26, %v11817_v35 }
 0x272   : > { %13847 = vst [vmem:[#allocation129_spill] sm:$0xff] %v12085_v12  ;;  %13850 = vst [vmem:[#allocation132_spill] sm:$0xff] %v12097_v42  ;;  %v12105_v12 = vld [vmem:[%s13646_s10 + $0x28] sm:$0xff]  ;;  %v12118_v42 = vmul.f32 %v4486_v53, %v11313_v57  ;;  %8830 = vmatmul.mubr.msk.f32.gmra.mrb[100].mxu0 %vm1788_vm1, %v2552_v40  ;;  %8927 = vmatmul.mubr.msk.f32.gmra.mrb[2].mxu1 %vm1788_vm1, %v3710_v20  ;;  %v4512_v53 = vld [vmem:[#allocation2 + $0x111] sm:$0xff]  ;;  %v2555_v51 = vmul.f32 %v11746_v24, %v11822_v63 }
 0x273   : > { %13848 = vst [vmem:[#allocation130_spill] sm:$0xff] %v12089_v60  ;;  %v12109_v60 = vmul.f32 %v12030_v28, %v12076_v6  ;;  %9021 = vmatprep.subr.mxu1 %v12105_v12  ;;  %8832 = vmatprep.mubr.msk.f32.mxu0 %vm1788_vm1, %v2553_v52  ;;  %v4511_v57 = vld [vmem:[#allocation2 + $0x109] sm:$0xff]  ;;  %v1495_v16 = vmul.f32 %v10969_v1, %v12130_v3  ;;  %v12152_v40 = vld [vmem:[%s13642_s6] ss:$0 sm:$0xff] }
 0x274   : > { %8929 = vmatprep.mubr.msk.f32.mxu1 %vm1788_vm1, %v3711_v27  ;;  %v3712_v23 = vmul.f32 %v11744_v26, %v11792_v17  ;;  %v12147_v45 = vmul.f32 %v4511_v57, %v11660_v32  ;;  %v3713_v52 = vmul.f32 %v11746_v24, %v11797_v0  ;;  %v12158_v1 = vmul.f32 %v4512_v53, %v11700_v38 }
 0x275   : > { %v1494_v20 = vmul.f32 %v12130_v3, %v10974_v49  ;;  %v2556_v32 = vmul.f32 %v11748_v15, %v11827_v31  ;;  %v1497_v26 = vmul.f32 %v10985_v8, %v12130_v3  ;;  %v2557_v17 = vmul.f32 %v11799_v41, %v11832_v58 }
 0x276   : > { %8833 = vmatmul.mubr.msk.f32.gmra.mrb[102].mxu0 %vm1788_vm1, %v2554_v62  ;;  %8930 = vmatmul.mubr.msk.f32.gmra.mrb[4].mxu1 %vm1788_vm1, %v3712_v23  ;;  %v12171_v24 = vadd.f32 %v12152_v40, %v1495_v16  ;;  %v3714_v49 = vmul.f32 %v11748_v15, %v11817_v35  ;;  %v3715_v38 = vmul.f32 %v11799_v41, %v11822_v63  ;;  %v13851_v35 = vld [vmem:[#allocation31_spill] sm:$0xff]  ;;  %v13852_v16 = vld [vmem:[#allocation33_spill] sm:$0xff] }
 0x277   : > { %8835 = vmatprep.mubr.msk.f32.mxu0 %vm1788_vm1, %v2555_v51  ;;  %8932 = vmatprep.mubr.msk.f32.mxu1 %vm1788_vm1, %v3713_v52  ;;  %v12180_v8 = vadd.f32 %v12152_v40, %v1494_v20  ;;  %v1496_v0 = vmul.f32 %v12130_v3, %v10989_v19  ;;  %v2558_v27 = vmul.f32 %v11801_v36, %v11844_v30  ;;  %v13853_v52 = vld [vmem:[#allocation97_spill] sm:$0xff]  ;;  %v13854_v20 = vld [vmem:[#allocation95_spill] sm:$0xff] }
 0x278   : > { %v12188_v57 = vadd.f32 %v12152_v40, %v1497_v26  ;;  %v2559_v15 = vmul.f32 %v11803_v22, %v11849_v2  ;;  %v7621_v41 = vmul.f32 -1.442695, %v12171_v24  ;;  %v1499_v63 = vmul.f32 %v13851_v35, %v12130_v3 }
 0x279   : > { %v3716_v19 = vmul.f32 %v11801_v36, %v11827_v31  ;;  %v3717_v62 = vmul.f32 %v11803_v22, %v11832_v58  ;;  %v7620_v53 = vmul.f32 -1.442695, %v12180_v8  ;;  %v12204_v51 = vadd.f32 %v12152_v40, %v1496_v0  ;;  %v13855_v31 = vld [vmem:[#allocation35_spill] sm:$0xff]  ;;  %v13856_v22 = vld [vmem:[#allocation96_spill] sm:$0xff] }
 0x27a   : > { %8836 = vmatmul.mubr.msk.f32.gmra.mrb[104].mxu0 %vm1788_vm1, %v2556_v32  ;;  %8933 = vmatmul.mubr.msk.f32.gmra.mrb[6].mxu1 %vm1788_vm1, %v3714_v49  ;;  %v1498_v23 = vmul.f32 %v12130_v3, %v13852_v16  ;;  %v2560_v32 = vmul.f32 %v13854_v20, %v13853_v52  ;;  %v7623_v36 = vmul.f32 -1.442695, %v12188_v57  ;;  %v1501_v26 = vmul.f32 %v13855_v31, %v12130_v3 }
 0x27b   : > { %8838 = vmatprep.mubr.msk.f32.mxu0 %vm1788_vm1, %v2557_v17  ;;  %8935 = vmatprep.mubr.msk.f32.mxu1 %vm1788_vm1, %v3715_v38  ;;  %v2561_v58 = vmul.f32 %v13856_v22, %v11897_v39  ;;  %9915 = vpow2.f32 %v7621_v41  ;;  %v12218_v17 = vadd.f32 %v12152_v40, %v1499_v63  ;;  %v3718_v49 = vmul.f32 %v13854_v20, %v11844_v30  ;;  %v13858_v30 = vld [vmem:[#allocation37_spill] sm:$0xff] }
 0x27c   : > { %v3719_v38 = vmul.f32 %v13856_v22, %v11849_v2  ;;  %9917 = vpow2.f32 %v7620_v53  ;;  %v7622_v0 = vmul.f32 -1.442695, %v12204_v51  ;;  %v12234_v35 = vadd.f32 %v12152_v40, %v1501_v26  ;;  %v13859_v2 = vld [vmem:[#allocation99_spill] sm:$0xff]  ;;  %v13860_v20 = vld [vmem:[#allocation41_spill] sm:$0xff] }
 0x27d   : > { %9919 = vpow2.f32 %v7623_v36  ;;  %v1500_v63 = vmul.f32 %v12130_v3, %v13858_v30  ;;  %v3721_v16 = vmul.f32 %v13859_v2, %v11897_v39  ;;  %v13861_v36 = vld [vmem:[#allocation100_spill] sm:$0xff]  ;;  %v2565_v39 = vmul.f32 %v11875_v5, %v11941_v14 }
 0x27e   : > { %8839 = vmatmul.mubr.msk.f32.gmra.mrb[106].mxu0 %vm1788_vm1, %v2558_v27  ;;  %8936 = vmatmul.mubr.msk.f32.gmra.mrb[8].mxu1 %vm1788_vm1, %v3716_v19  ;;  %v12228_v27 = vadd.f32 %v12152_v40, %v1498_v23  ;;  %v2563_v19 = vmul.f32 %v13859_v2, %v11931_v34  ;;  %v2564_v31 = vmul.f32 %v13861_v36, %v11936_v50  ;;  %9921 = vpow2.f32 %v7622_v0 }
 0x27f   : > { %8841 = vmatprep.mubr.msk.f32.mxu0 %vm1788_vm1, %v2559_v15  ;;  %8938 = vmatprep.mubr.msk.f32.mxu1 %vm1788_vm1, %v3717_v62  ;;  %v13857_v15 = vld [vmem:[#allocation98_spill] sm:$0xff]  ;;  %v7625_v62 = vmul.f32 -1.442695, %v12218_v17  ;;  %v7627_v26 = vmul.f32 -1.442695, %v12234_v35  ;;  %v3722_v22 = vmul.f32 %v13861_v36, %v11902_v4  ;;  %v13866_v36 = vld [vmem:[#allocation43_spill] sm:$0xff] }
 0x280   : > { %v2562_v41 = vmul.f32 %v13857_v15, %v11902_v4  ;;  %v3720_v53 = vmul.f32 %v13857_v15, %v13853_v52  ;;  %v7624_v23 = vmul.f32 -1.442695, %v12228_v27  ;;  %v12256_v52 = vadd.f32 %v12152_v40, %v1500_v63  ;;  %v13864_v63 = vld [vmem:[#allocation44_spill] sm:$0xff] }
 0x281   : > { %9923 = vpow2.f32 %v7625_v62  ;;  %v1504_v2 = vmul.f32 %v12130_v3, %v13864_v63 }
 0x282   : > { %8842 = vmatmul.mubr.msk.f32.gmra.mrb[108].mxu0 %vm1788_vm1, %v2560_v32  ;;  %8939 = vmatmul.mubr.msk.f32.gmra.mrb[10].mxu1 %vm1788_vm1, %v3718_v49  ;;  %v1502_v32 = vmul.f32 %v12130_v3, %v13860_v20  ;;  %9925 = vpow2.f32 %v7624_v23  ;;  %v7626_v4 = vmul.f32 -1.442695, %v12256_v52 }
 0x283   : > { %8844 = vmatprep.mubr.msk.f32.mxu0 %vm1788_vm1, %v2561_v58  ;;  %8941 = vmatprep.mubr.msk.f32.mxu1 %vm1788_vm1, %v3719_v38  ;;  %v3723_v58 = vmul.f32 %v11875_v5, %v11931_v34  ;;  %v13862_v38 = vld [vmem:[#allocation39_spill] sm:$0xff]  ;;  %9927 = vpow2.f32 %v7627_v26  ;;  %v13865_v5 = vld [vmem:[#allocation105_spill] sm:$0xff] }
 0x284   : > { %v1503_v0 = vmul.f32 %v13862_v38, %v12130_v3  ;;  %v12270_v15 = vadd.f32 %v12152_v40, %v1502_v32  ;;  %v2567_v34 = vmul.f32 %v13865_v5, %v11971_v7  ;;  %v3725_v23 = vmul.f32 %v13865_v5, %v11941_v14  ;;  %v13867_v38 = vld [vmem:[#allocation48_spill] sm:$0xff]  ;;  %v13869_v5 = vld [vmem:[#allocation47_spill] sm:$0xff] }
 0x285   : > { %v9916_v49 = vpop.eup %9915  ;;  %9929 = vpow2.f32 %v7626_v4  ;;  %v2569_v14 = vmul.f32 %v11906_v55, %v11981_v10 }
 0x286   : > { %8845 = vmatmul.mubr.msk.f32.gmra.mrb[110].mxu0 %vm1788_vm1, %v2562_v41  ;;  %8942 = vmatmul.mubr.msk.f32.gmra.mrb[12].mxu1 %vm1788_vm1, %v3720_v53  ;;  %v13863_v41 = vld [vmem:[#allocation104_spill] sm:$0xff]  ;;  %v12288_v20 = vadd.f32 %v12152_v40, %v1503_v0  ;;  %v7628_v32 = vmul.f32 -1.442695, %v12270_v15  ;;  %v1506_v0 = vmul.f32 %v12130_v3, %v13867_v38 }
 0x287   : > { %8847 = vmatprep.mubr.msk.f32.mxu0 %vm1788_vm1, %v2563_v19  ;;  %8944 = vmatprep.mubr.msk.f32.mxu1 %vm1788_vm1, %v3721_v16  ;;  %v2566_v30 = vmul.f32 %v13863_v41, %v11946_v43  ;;  %v9918_v19 = vpop.eup %9917  ;;  %v3724_v62 = vmul.f32 %v13863_v41, %v11936_v50  ;;  %v1661_v16 = vadd.f32 1.0, %v9916_v49  ;;  %v2568_v50 = vmul.f32 %v11904_v47, %v11976_v48 }
 0x288   : > { %v9920_v53 = vpop.eup %9919  ;;  %v1660_v26 = vadd.f32 1.0, %v9918_v19  ;;  %v3727_v41 = vmul.f32 %v11906_v55, %v11971_v7  ;;  %v7629_v4 = vmul.f32 -1.442695, %v12288_v20  ;;  %v2571_v7 = vmul.f32 %v11948_v46, %v12002_v37 }
 0x289   : > { %v9922_v49 = vpop.eup %9921  ;;  %9931 = vrcp.f32 %v1661_v16 }
 0x28a   : > { %8848 = vmatmul.mubr.msk.f32.gmra.mrb[112].mxu0 %vm1788_vm1, %v2564_v31  ;;  %8945 = vmatmul.mubr.msk.f32.gmra.mrb[14].mxu1 %vm1788_vm1, %v3722_v22  ;;  %v1505_v31 = vmul.f32 %v13866_v36, %v12130_v3  ;;  %v1663_v22 = vadd.f32 1.0, %v9920_v53  ;;  %9933 = vpow2.f32 %v7628_v32  ;;  %v1662_v19 = vadd.f32 1.0, %v9922_v49  ;;  %v13870_v32 = vld [vmem:[#allocation52_spill] sm:$0xff] }
 0x28b   : > { %8850 = vmatprep.mubr.msk.f32.mxu0 %vm1788_vm1, %v2565_v39  ;;  %8947 = vmatprep.mubr.msk.f32.mxu1 %vm1788_vm1, %v3723_v58  ;;  %v12297_v39 = vadd.f32 %v12152_v40, %v1504_v2  ;;  %v3726_v58 = vmul.f32 %v11904_v47, %v11946_v43  ;;  %v13868_v43 = vld [vmem:[#allocation109_spill] sm:$0xff]  ;;  %9935 = vrcp.f32 %v1660_v26  ;;  %v1508_v36 = vmul.f32 %v12130_v3, %v13870_v32  ;;  %v13871_v26 = vld [vmem:[#allocation51_spill] sm:$0xff]  ;;  %v13872_v49 = vld [vmem:[#allocation56_spill] sm:$0xff] }
 0x28c   : > { %v12312_v63 = vadd.f32 %v12152_v40, %v1505_v31  ;;  %v2570_v47 = vmul.f32 %v13868_v43, %v11986_v9  ;;  %9937 = vrcp.f32 %v1663_v22  ;;  %v3729_v31 = vmul.f32 %v11948_v46, %v11981_v10 }
 0x28d   : > { %v7630_v2 = vmul.f32 -1.442695, %v12297_v39  ;;  %9939 = vpow2.f32 %v7629_v4  ;;  %v2573_v46 = vmul.f32 %v11988_v13, %v12028_v44  ;;  %v1510_v38 = vmul.f32 %v12130_v3, %v13872_v49 }
 0x28e   : > { %8851 = vmatmul.mubr.msk.f32.gmra.mrb[114].mxu0 %vm1788_vm1, %v2566_v30  ;;  %8948 = vmatmul.mubr.msk.f32.gmra.mrb[16].mxu1 %vm1788_vm1, %v3724_v62  ;;  %v9924_v30 = vpop.eup %9923  ;;  %v3728_v62 = vmul.f32 %v13868_v43, %v11976_v48  ;;  %v2572_v48 = vmul.f32 %v11950_v18, %v12007_v11  ;;  %v12353_v4 = vadd.f32 %v12152_v40, %v1508_v36  ;;  %v13875_v36 = vld [vmem:[#allocation58_spill] sm:$0xff] }
 0x28f   : > { %8853 = vmatprep.mubr.msk.f32.mxu0 %vm1788_vm1, %v2567_v34  ;;  %8950 = vmatprep.mubr.msk.f32.mxu1 %vm1788_vm1, %v3725_v23  ;;  %v1507_v34 = vmul.f32 %v13869_v5, %v12130_v3  ;;  %v9926_v55 = vpop.eup %9925  ;;  %v1665_v16 = vadd.f32 1.0, %v9924_v30  ;;  %v12327_v23 = vadd.f32 %v12152_v40, %v1506_v0  ;;  %9941 = vpow2.f32 %v7630_v2  ;;  %v13873_v2 = vld [vmem:[#allocation55_spill] sm:$0xff] }
 0x290   : > { %v9928_v53 = vpop.eup %9927  ;;  %v1664_v22 = vadd.f32 1.0, %v9926_v55  ;;  %9943 = vrcp.f32 %v1662_v19  ;;  %v3730_v0 = vmul.f32 %v11950_v18, %v11986_v9  ;;  %v3731_v43 = vmul.f32 %v11988_v13, %v12002_v37  ;;  %v13874_v18 = vld [vmem:[#allocation117_spill] sm:$0xff] }
 0x291   : > { %v1667_v10 = vadd.f32 1.0, %v9928_v53  ;;  %9945 = vrcp.f32 %v1665_v16  ;;  %v7632_v30 = vmul.f32 -1.442695, %v12327_v23  ;;  %v1511_v5 = vmul.f32 %v13873_v2, %v12130_v3  ;;  %v12381_v53 = vld [vmem:[%s13653_s17 + $0xf0] sm:$0xff] }
 0x292   : > { %8854 = vmatmul.mubr.msk.f32.gmra.mrb[116].mxu0 %vm1788_vm1, %v2568_v50  ;;  %8951 = vmatmul.mubr.msk.f32.gmra.mrb[18].mxu1 %vm1788_vm1, %v3726_v58  ;;  %v7631_v50 = vmul.f32 -1.442695, %v12312_v63  ;;  %v12341_v58 = vadd.f32 %v12152_v40, %v1507_v34  ;;  %v2574_v9 = vmul.f32 %v13874_v18, %v12054_v59  ;;  %v2575_v37 = vmul.f32 %v11992_v54, %v12076_v6 }
 0x293   : > { %8856 = vmatprep.mubr.msk.f32.mxu0 %vm1788_vm1, %v2569_v14  ;;  %8953 = vmatprep.mubr.msk.f32.mxu1 %vm1788_vm1, %v3727_v41  ;;  %v1509_v14 = vmul.f32 %v13871_v26, %v12130_v3  ;;  %v9930_v41 = vpop.eup %9929  ;;  %v12373_v19 = vadd.f32 %v12152_v40, %v1510_v38  ;;  %v7634_v32 = vmul.f32 -1.442695, %v12353_v4 }
 0x294   : > { %9947 = vpow2.f32 %v7631_v50  ;;  %v12366_v34 = vpop.eup %9931  ;;  %v1666_v55 = vadd.f32 1.0, %v9930_v41  ;;  %v3733_v50 = vmul.f32 %v11992_v54, %v12028_v44  ;;  %v2577_v54 = vmul.f32 %v12011_v25, %v12381_v53  ;;  %v12406_v44 = vld [vmem:[%s13653_s17 + $0xf8] sm:$0xff] }
 0x295   : > { %9949 = vrcp.f32 %v1664_v22  ;;  %v9934_v13 = vpop.eup %9933  ;;  %v7636_v38 = vmul.f32 -1.442695, %v12373_v19 }
 0x296   : > { %8857 = vmatmul.mubr.msk.f32.gmra.mrb[118].mxu0 %vm1788_vm1, %v2570_v47  ;;  %8954 = vmatmul.mubr.msk.f32.gmra.mrb[20].mxu1 %vm1788_vm1, %v3728_v62  ;;  %v12359_v47 = vadd.f32 %v12152_v40, %v1509_v14  ;;  %9951 = vrcp.f32 %v1667_v10  ;;  %v3732_v62 = vmul.f32 %v13874_v18, %v12007_v11  ;;  %v9936_v16 = vpop.eup %9935  ;;  %v12393_v14 = vadd.f32 %v12152_v40, %v1511_v5  ;;  %v13878_v5 = vld [vmem:[#allocation60_spill] sm:$0xff] }
 0x297   : > { %8859 = vmatprep.mubr.msk.f32.mxu0 %vm1788_vm1, %v2571_v7  ;;  %8956 = vmatprep.mubr.msk.f32.mxu1 %vm1788_vm1, %v3729_v31  ;;  %v7633_v7 = vmul.f32 -1.442695, %v12341_v58  ;;  %9953 = vpow2.f32 %v7632_v30  ;;  %v1512_v31 = vmul.f32 %v12130_v3, %v13875_v36  ;;  %v12389_v26 = vpop.eup %9937  ;;  %v1668_v10 = vadd.f32 1.0, %v9934_v13 }
 0x298   : > { %v7635_v11 = vmul.f32 -1.442695, %v12359_v47  ;;  %v9940_v49 = vpop.eup %9939  ;;  %v3734_v30 = vmul.f32 %v12009_v33, %v12054_v59  ;;  %v1514_v18 = vmul.f32 %v12130_v3, %v13878_v5  ;;  %v2578_v59 = vmul.f32 %v12013_v61, %v12406_v44 }
 0x299   : > { %9955 = vpow2.f32 %v7633_v7  ;;  %v12415_v2 = vadd.f32 %v12152_v40, %v1512_v31  ;;  %v3736_v36 = vmul.f32 %v12013_v61, %v12081_v56  ;;  %v1759_v5 = vmul.f32 %v12389_v26, %v12188_v57 }
 0x29a   : > { %8860 = vmatmul.mubr.msk.f32.gmra.mrb[120].mxu0 %vm1788_vm1, %v2572_v48  ;;  %8957 = vmatmul.mubr.msk.f32.gmra.mrb[22].mxu1 %vm1788_vm1, %v3730_v0  ;;  %v13876_v48 = vld [vmem:[#allocation57_spill] sm:$0xff]  ;;  %9957 = vrcp.f32 %v1666_v55  ;;  %v13877_v0 = vld [vmem:[#allocation59_spill] sm:$0xff]  ;;  %v1756_v55 = vmul.f32 %v9936_v16, %v12180_v8  ;;  %v12441_v8 = vadd.f32 %v12152_v40, %v1514_v18  ;;  %v13879_v16 = vld [vmem:[#allocation62_spill] sm:$0xff] }
 0x29b   : > { %8862 = vmatprep.mubr.msk.f32.mxu0 %vm1788_vm1, %v2573_v46  ;;  %8959 = vmatprep.mubr.msk.f32.mxu1 %vm1788_vm1, %v3731_v43  ;;  %v1513_v22 = vmul.f32 %v13876_v48, %v12130_v3  ;;  %v2576_v46 = vmul.f32 %v12009_v33, %v12081_v56  ;;  %v1515_v41 = vmul.f32 %v13877_v0, %v12130_v3  ;;  %v9942_v43 = vpop.eup %9941  ;;  %9959 = vpow2.f32 %v7634_v32 }
 0x29c   : > { %v9944_v7 = vpop.eup %9943  ;;  %9961 = vpow2.f32 %v7635_v11  ;;  %v1516_v11 = vmul.f32 %v12130_v3, %v13879_v16  ;;  %v3737_v48 = vmul.f32 %v12030_v28, %v12381_v53  ;;  %v7640_v0 = vmul.f32 -1.442695, %v12441_v8 }
 0x29d   : > { %v12424_v13 = vadd.f32 %v12152_v40, %v1513_v22  ;;  %v12429_v33 = vpop.eup %9945  ;;  %9963 = vrcp.f32 %v1668_v10  ;;  %v12434_v32 = vadd.f32 %v12152_v40, %v1515_v41  ;;  %v1758_v10 = vmul.f32 %v9944_v7, %v12204_v51  ;;  %v13881_v41 = vld [vmem:[#allocation64_spill] sm:$0xff] }
 0x29e   : > { %8863 = vmatmul.mubr.msk.f32.gmra.mrb[122].mxu0 %vm1788_vm1, %v2574_v9  ;;  %8960 = vmatmul.mubr.msk.f32.gmra.mrb[24].mxu1 %vm1788_vm1, %v3732_v62  ;;  %v3735_v9 = vmul.f32 %v12011_v25, %v12076_v6  ;;  %v1669_v62 = vadd.f32 1.0, %v9940_v49  ;;  %v9948_v25 = vpop.eup %9947  ;;  %v1670_v6 = vadd.f32 1.0, %v9942_v43  ;;  %9965 = vpow2.f32 %v7636_v38  ;;  %v13880_v49 = vld [vmem:[#allocation61_spill] sm:$0xff] }
 0x29f   : > { %8865 = vmatprep.mubr.msk.f32.mxu0 %vm1788_vm1, %v2575_v37  ;;  %8962 = vmatprep.mubr.msk.f32.mxu1 %vm1788_vm1, %v3733_v50  ;;  %v7637_v37 = vmul.f32 -1.442695, %v12393_v14  ;;  %v9950_v31 = vpop.eup %9949  ;;  %v7638_v50 = vmul.f32 -1.442695, %v12415_v2  ;;  %v7639_v61 = vmul.f32 -1.442695, %v12424_v13  ;;  %v1517_v38 = vmul.f32 %v13880_v49, %v12130_v3 }
 0x2a0   : > { %v12448_v22 = vpop.eup %9951  ;;  %v7641_v28 = vmul.f32 -1.442695, %v12434_v32  ;;  %v12464_v51 = vadd.f32 %v12152_v40, %v1516_v11  ;;  %v1760_v7 = vmul.f32 %v9950_v31, %v12228_v27  ;;  %v4095_v31 = vld [vmem:[#allocation2 + $0x20] sm:$0xff]  ;;  %v1761_v11 = vmul.f32 %v12429_v33, %v12218_v17 }
 0x2a1   : > { %9967 = vpow2.f32 %v7637_v37  ;;  %v9954_v56 = vpop.eup %9953  ;;  %v13884_v17 = vld [vmem:[#allocation65_spill] sm:$0xff] }
 0x2a2   : > { %8866 = vmatmul.mubr.msk.f32.gmra.mrb[124].mxu0 %vm1788_vm1, %v2576_v46  ;;  %8963 = vmatmul.mubr.msk.f32.gmra.mrb[26].mxu1 %vm1788_vm1, %v3734_v30  ;;  %v1757_v46 = vmul.f32 %v12366_v34, %v12171_v24  ;;  %9969 = vrcp.f32 %v1669_v62  ;;  %v3738_v24 = vmul.f32 %v12032_v21, %v12406_v44  ;;  %v1518_v30 = vmul.f32 %v12130_v3, %v13881_v41  ;;  %v4094_v21 = vld [vmem:[#allocation2 + $0x18] sm:$0xff]  ;;  %v13882_v62 = vld [vmem:[#allocation63_spill] sm:$0xff] }
 0x2a3   : > { %8868 = vmatprep.mubr.msk.f32.mxu0 %vm1788_vm1, %v2577_v54  ;;  %8965 = vmatprep.mubr.msk.f32.mxu1 %vm1788_vm1, %v3735_v9  ;;  %v1671_v54 = vadd.f32 1.0, %v9948_v25  ;;  %9971 = vrcp.f32 %v1670_v6  ;;  %v9956_v34 = vpop.eup %9955  ;;  %v1672_v18 = vadd.f32 1.0, %v9954_v56  ;;  %v1519_v57 = vmul.f32 %v13882_v62, %v12130_v3  ;;  %v13883_v6 = vld [vmem:[#allocation66_spill] sm:$0xff] }
 0x2a4   : > { %9973 = vpow2.f32 %v7638_v50  ;;  %v9958_v43 = vpop.eup %9957  ;;  %v7642_v25 = vmul.f32 -1.442695, %v12464_v51  ;;  %v12482_v27 = vadd.f32 %v12152_v40, %v1518_v30  ;;  %v12490_v50 = vld [vmem:[%s13646_s10 + $0x30] sm:$0xff]  ;;  %v10299_v56 = vld [vmem:[#allocation2 + $0x28] sm:$0xff]  ;;  %v1521_v33 = vmul.f32 %v13884_v17, %v12130_v3 }
 0x2a5   : > { %9975 = vpow2.f32 %v7639_v61  ;;  %v9960_v9 = vpop.eup %9959  ;;  %v10300_v30 = vld [vmem:[#allocation2 + $0x30] sm:$0xff] }
 0x2a6   : > { %8869 = vmatmul.mubr.msk.f32.gmra.mrb[126].mxu0 %vm1788_vm1, %v2578_v59  ;;  %8966 = vmatmul.mubr.msk.f32.gmra.mrb[28].mxu1 %vm1788_vm1, %v3736_v36  ;;  %9977 = vrcp.f32 %v1671_v54  ;;  %v9962_v37 = vpop.eup %9961  ;;  %v1673_v59 = vadd.f32 1.0, %v9956_v34  ;;  %v1520_v36 = vmul.f32 %v12130_v3, %v13883_v6 }
 0x2a7   : > { %9223 = vmatprep.mubr.msk.f32.mxu0 %vm1788_vm1, %v1756_v55  ;;  %8968 = vmatprep.mubr.msk.f32.mxu1 %vm1788_vm1, %v3737_v48  ;;  %9979 = vpow2.f32 %v7641_v28  ;;  %v12475_v55 = vadd.f32 %v12152_v40, %v1517_v38  ;;  %v9964_v26 = vpop.eup %9963  ;;  %v1674_v48 = vadd.f32 1.0, %v9960_v9  ;;  %v1675_v61 = vadd.f32 1.0, %v9962_v37  ;;  %v13885_v38 = vld [vmem:[#allocation68_spill] sm:$0xff] }
 0x2a8   : > { %9981 = vpow2.f32 %v7640_v0  ;;  %v9966_v16 = vpop.eup %9965  ;;  %v12500_v28 = vadd.f32 %v12152_v40, %v1519_v57  ;;  %v12508_v49 = vadd.f32 %v12152_v40, %v1520_v36  ;;  %v1763_v0 = vmul.f32 %v12448_v22, %v12234_v35  ;;  %v13886_v35 = vld [vmem:[#allocation67_spill] sm:$0xff]  ;;  %v13887_v57 = vld [vmem:[#allocation70_spill] sm:$0xff] }
 0x2a9   : > { %9983 = vrcp.f32 %v1672_v18  ;;  %v7643_v54 = vmul.f32 -1.442695, %v12475_v55  ;;  %v1676_v41 = vadd.f32 1.0, %v9966_v16  ;;  %v12520_v37 = vadd.f32 %v12152_v40, %v1521_v33 }
 0x2aa   : > { %9224 = vmatmul.mubr.msk.f32.vlgmr.msra.gmra.mrb[128].mxu0 %vm1788_vm1, %v1757_v46  ;;  %8969 = vmatmul.mubr.msk.f32.gmra.mrb[30].mxu1 %vm1788_vm1, %v3738_v24  ;;  %v1762_v46 = vmul.f32 %v9958_v43, %v12256_v52  ;;  %9985 = vrcp.f32 %v1673_v59  ;;  %v1522_v24 = vmul.f32 %v12130_v3, %v13885_v38  ;;  %v1523_v22 = vmul.f32 %v13886_v35, %v12130_v3  ;;  %v10304_v38 = vld [vmem:[#allocation2 + $0x50] sm:$0xff]  ;;  %v10307_v35 = vld [vmem:[#allocation2 + $0x68] sm:$0xff] }
 0x2ab   : > { %9226 = vmatprep.mubr.msk.f32.mxu0 %vm1788_vm1, %v1758_v10  ;;  %8973 = vmatprep.mubr.msk.f32.mxu1 %vm1788_vm1, %v4094_v21  ;;  %v9968_v10 = vpop.eup %9967  ;;  %9987 = vpow2.f32 %v7642_v25  ;;  %v10301_v21 = vld [vmem:[#allocation2 + $0x38] sm:$0xff] }
 0x2ac   : > { %v9970_v52 = vpop.eup %9969  ;;  %9989 = vrcp.f32 %v1674_v48  ;;  %v1677_v18 = vadd.f32 1.0, %v9968_v10  ;;  %v12527_v62 = vadd.f32 %v12152_v40, %v1522_v24  ;;  %v12538_v10 = vadd.f32 %v12152_v40, %v1523_v22 }
 0x2ad   : > { %v9972_v34 = vpop.eup %9971  ;;  %9991 = vrcp.f32 %v1675_v61  ;;  %v1765_v6 = vmul.f32 %v9970_v52, %v12288_v20  ;;  %v13888_v20 = vld [vmem:[#allocation69_spill] sm:$0xff] }
 0x2ae   : > { %9227 = vmatmul.mubr.msk.f32.gmra.mrb[130].mxu0 %vm1788_vm1, %v1759_v5  ;;  %8974 = vmatmul.mubr.msk.f32.vlgmr.msra.gmra.mrb[0].mxu1 %vm1788_vm1, %v4095_v31  ;;  %v9974_v43 = vpop.eup %9973  ;;  %v1764_v5 = vmul.f32 %v9964_v26, %v12270_v15  ;;  %9993 = vpow2.f32 %v7643_v54  ;;  %v7646_v15 = vmul.f32 -1.442695, %v12508_v49  ;;  %v1524_v26 = vmul.f32 %v12130_v3, %v13887_v57  ;;  %v10302_v31 = vld [vmem:[#allocation2 + $0x40] sm:$0xff] }
 0x2af   : > { %9229 = vmatprep.mubr.msk.f32.mxu0 %vm1788_vm1, %v1760_v7  ;;  %9022 = vmatpush3.msra.mxu1 %v12105_v12  ;;  %v7644_v12 = vmul.f32 -1.442695, %v12482_v27  ;;  %v9976_v9 = vpop.eup %9975  ;;  %v7645_v7 = vmul.f32 -1.442695, %v12500_v28  ;;  %v1678_v36 = vadd.f32 1.0, %v9974_v43  ;;  %v1525_v54 = vmul.f32 %v13888_v20, %v12130_v3 }
 0x2b0   : > { %8976 = vmatprep.mubr.msk.f32.mxu1 %vm1788_vm1, %v10299_v56  ;;  %9071 = vmatprep.subr.mxu1 %v12490_v50  ;;  %v9978_v59 = vpop.eup %9977  ;;  %v1679_v48 = vadd.f32 1.0, %v9976_v9  ;;  %v7647_v56 = vmul.f32 -1.442695, %v12520_v37  ;;  %v12545_v17 = vadd.f32 %v12152_v40, %v1524_v26  ;;  %v10306_v9 = vld [vmem:[#allocation2 + $0x60] sm:$0xff] }
 0x2b1   : > { %9995 = vpow2.f32 %v7644_v12  ;;  %v9980_v25 = vpop.eup %9979  ;;  %v1767_v52 = vmul.f32 %v9978_v59, %v12312_v63  ;;  %v12554_v43 = vadd.f32 %v12152_v40, %v1525_v54  ;;  %v10311_v54 = vld [vmem:[#allocation2 + $0x88] sm:$0xff] }
 0x2b2   : > { %9230 = vmatmul.mubr.msk.f32.gmra.mrb[132].mxu0 %vm1788_vm1, %v1761_v11  ;;  %8977 = vmatmul.mubr.msk.f32.gmra.mrb[2].mxu1 %vm1788_vm1, %v10300_v30  ;;  %9997 = vrcp.f32 %v1676_v41  ;;  %v9982_v16 = vpop.eup %9981  ;;  %v1766_v11 = vmul.f32 %v9972_v34, %v12297_v39  ;;  %v7648_v39 = vmul.f32 -1.442695, %v12527_v62  ;;  %v1681_v34 = vadd.f32 1.0, %v9980_v25  ;;  %v10308_v25 = vld [vmem:[#allocation2 + $0x70] sm:$0xff] }
 0x2b3   : > { %9232 = vmatprep.mubr.msk.f32.mxu0 %vm1788_vm1, %v1762_v46  ;;  %8979 = vmatprep.mubr.msk.f32.mxu1 %vm1788_vm1, %v10301_v21  ;;  %9999 = vrcp.f32 %v1677_v18  ;;  %v10303_v46 = vld [vmem:[#allocation2 + $0x48] sm:$0xff]  ;;  %v9984_v61 = vpop.eup %9983  ;;  %v1680_v12 = vadd.f32 1.0, %v9982_v16  ;;  %v7649_v30 = vmul.f32 -1.442695, %v12538_v10  ;;  %v7651_v59 = vmul.f32 -1.442695, %v12554_v43 }
 0x2b4   : > { %10001 = vpow2.f32 %v7645_v7  ;;  %v9986_v33 = vpop.eup %9985  ;;  %v1768_v3 = vmul.f32 %v9984_v61, %v12327_v23 }
 0x2b5   : > { %10003 = vpow2.f32 %v7646_v15  ;;  %v9988_v24 = vpop.eup %9987  ;;  %v1769_v18 = vmul.f32 %v9986_v33, %v12341_v58 }
 0x2b6   : > { %9233 = vmatmul.mubr.msk.f32.gmra.mrb[134].mxu0 %vm1788_vm1, %v1763_v0  ;;  %8980 = vmatmul.mubr.msk.f32.gmra.mrb[4].mxu1 %vm1788_vm1, %v10302_v31  ;;  %10005 = vrcp.f32 %v1678_v36  ;;  %v10305_v0 = vld [vmem:[#allocation2 + $0x58] sm:$0xff]  ;;  %v9990_v41 = vpop.eup %9989  ;;  %v1682_v21 = vadd.f32 1.0, %v9988_v24  ;;  %v10312_v24 = vld [vmem:[#allocation2 + $0x90] sm:$0xff] }
 0x2b7   : > { %9235 = vmatprep.mubr.msk.f32.mxu0 %vm1788_vm1, %v1764_v5  ;;  %8982 = vmatprep.mubr.msk.f32.mxu1 %vm1788_vm1, %v10303_v46  ;;  %10007 = vrcp.f32 %v1679_v48  ;;  %v9992_v63 = vpop.eup %9991  ;;  %v7650_v5 = vmul.f32 -1.442695, %v12545_v17  ;;  %v1770_v40 = vmul.f32 %v9990_v41, %v12353_v4  ;;  %v10309_v31 = vld [vmem:[#allocation2 + $0x78] sm:$0xff] }
 0x2b8   : > { %10009 = vpow2.f32 %v7647_v56  ;;  %v9994_v23 = vpop.eup %9993  ;;  %v1771_v26 = vmul.f32 %v9992_v63, %v12359_v47  ;;  %v10310_v56 = vld [vmem:[#allocation2 + $0x80] sm:$0xff] }
 0x2b9   : > { %10011 = vpow2.f32 %v7648_v39  ;;  %v1683_v58 = vadd.f32 1.0, %v9994_v23 }
 0x2ba   : > { %9236 = vmatmul.mubr.msk.f32.gmra.mrb[136].mxu0 %vm1788_vm1, %v1765_v6  ;;  %8983 = vmatmul.mubr.msk.f32.gmra.mrb[6].mxu1 %vm1788_vm1, %v10304_v38  ;;  %10013 = vrcp.f32 %v1680_v12 }
 0x2bb   : > { %9238 = vmatprep.mubr.msk.f32.mxu0 %vm1788_vm1, %v1766_v11  ;;  %8985 = vmatprep.mubr.msk.f32.mxu1 %vm1788_vm1, %v10305_v0  ;;  %v9996_v7 = vpop.eup %9995  ;;  %10015 = vrcp.f32 %v1681_v34  ;;  %v10313_v34 = vld [vmem:[#allocation2 + $0x98] sm:$0xff] }
 0x2bc   : > { %v9998_v22 = vpop.eup %9997  ;;  %10017 = vpow2.f32 %v7649_v30  ;;  %v1684_v4 = vadd.f32 1.0, %v9996_v7  ;;  %v10316_v7 = vld [vmem:[#allocation2 + $0xb0] sm:$0xff] }
 0x2bd   : > { %v10000_v15 = vpop.eup %9999  ;;  %10019 = vpow2.f32 %v7650_v5  ;;  %v1772_v36 = vmul.f32 %v9998_v22, %v12373_v19  ;;  %v10314_v5 = vld [vmem:[#allocation2 + $0xa0] sm:$0xff] }
 0x2be   : > { %9239 = vmatmul.mubr.msk.f32.gmra.mrb[138].mxu0 %vm1788_vm1, %v1767_v52  ;;  %8986 = vmatmul.mubr.msk.f32.gmra.mrb[8].mxu1 %vm1788_vm1, %v10306_v9  ;;  %v10002_v57 = vpop.eup %10001  ;;  %10021 = vrcp.f32 %v1682_v21  ;;  %v1773_v46 = vmul.f32 %v10000_v15, %v12393_v14  ;;  %v10318_v15 = vld [vmem:[#allocation2 + $0xc0] sm:$0xff] }
 0x2bf   : > { %9241 = vmatprep.mubr.msk.f32.mxu0 %vm1788_vm1, %v1768_v3  ;;  %8988 = vmatprep.mubr.msk.f32.mxu1 %vm1788_vm1, %v10307_v35  ;;  %v10004_v6 = vpop.eup %10003  ;;  %10023 = vpow2.f32 %v7651_v59  ;;  %v1685_v48 = vadd.f32 1.0, %v10002_v57  ;;  %v10319_v57 = vld [vmem:[#allocation2 + $0xc8] sm:$0xff] }
 0x2c0   : > { %v10006_v16 = vpop.eup %10005  ;;  %10025 = vrcp.f32 %v1683_v58  ;;  %v1686_v61 = vadd.f32 1.0, %v10004_v6  ;;  %v10321_v6 = vld [vmem:[#allocation2 + $0xd8] sm:$0xff] }
 0x2c1   : > { %v10008_v11 = vpop.eup %10007  ;;  %10027 = vrcp.f32 %v1684_v4  ;;  %v1774_v20 = vmul.f32 %v10006_v16, %v12415_v2  ;;  %v10320_v4 = vld [vmem:[#allocation2 + $0xd0] sm:$0xff] }
 0x2c2   : > { %9242 = vmatmul.mubr.msk.f32.gmra.mrb[140].mxu0 %vm1788_vm1, %v1769_v18  ;;  %8989 = vmatmul.mubr.msk.f32.gmra.mrb[10].mxu1 %vm1788_vm1, %v10308_v25  ;;  %v10010_v47 = vpop.eup %10009  ;;  %10029 = vrcp.f32 %v1685_v48  ;;  %v1775_v12 = vmul.f32 %v10008_v11, %v12424_v13  ;;  %v10315_v18 = vld [vmem:[#allocation2 + $0xa8] sm:$0xff]  ;;  %v10324_v48 = vld [vmem:[#allocation2 + $0xf0] sm:$0xff] }
 0x2c3   : > { %9244 = vmatprep.mubr.msk.f32.mxu0 %vm1788_vm1, %v1770_v40  ;;  %8991 = vmatprep.mubr.msk.f32.mxu1 %vm1788_vm1, %v10309_v31  ;;  %v10012_v19 = vpop.eup %10011  ;;  %v1687_v52 = vadd.f32 1.0, %v10010_v47  ;;  %10031 = vrcp.f32 %v1686_v61  ;;  %v10322_v31 = vld [vmem:[#allocation2 + $0xe0] sm:$0xff]  ;;  %v10323_v11 = vld [vmem:[#allocation2 + $0xe8] sm:$0xff]  ;;  %v10325_v47 = vld [vmem:[#allocation2 + $0xf8] sm:$0xff] }
 0x2c4   : > { %v10014_v39 = vpop.eup %10013  ;;  %v1688_v38 = vadd.f32 1.0, %v10012_v19  ;;  %v4483_v19 = vld [vmem:[#allocation2 + $0x29] sm:$0xff] }
 0x2c5   : > { %v10016_v33 = vpop.eup %10015  ;;  %v1776_v3 = vmul.f32 %v10014_v39, %v12441_v8  ;;  %10033 = vrcp.f32 %v1687_v52  ;;  %v4484_v39 = vld [vmem:[#allocation2 + $0x31] sm:$0xff] }
 0x2c6   : > { %9245 = vmatmul.mubr.msk.f32.gmra.mrb[142].mxu0 %vm1788_vm1, %v1771_v26  ;;  %8992 = vmatmul.mubr.msk.f32.gmra.mrb[12].mxu1 %vm1788_vm1, %v10310_v56  ;;  %v10018_v14 = vpop.eup %10017  ;;  %v1777_v13 = vmul.f32 %v10016_v33, %v12434_v32  ;;  %10035 = vrcp.f32 %v1688_v38  ;;  %v12629_v56 = vld [vmem:[#allocation2 + $0x110] sm:$0xff]  ;;  %v7948_v33 = vld [vmem:[%s13646_s10 + $0x38] sm:$0xff] }
 0x2c7   : > { %9247 = vmatprep.mubr.msk.f32.mxu0 %vm1788_vm1, %v1772_v36  ;;  %8994 = vmatprep.mubr.msk.f32.mxu1 %vm1788_vm1, %v10311_v54  ;;  %v10020_v2 = vpop.eup %10019  ;;  %v1689_v41 = vadd.f32 1.0, %v10018_v14  ;;  %v13889_v52 = vld [vmem:[#allocation71_spill] sm:$0xff]  ;;  %v12645_v14 = vld [vmem:[#allocation2 + $0x39] sm:$0xff] }
 0x2c8   : > { %v10022_v0 = vpop.eup %10021  ;;  %v1690_v63 = vadd.f32 1.0, %v10020_v2 }
 0x2c9   : > { %v10024_v30 = vpop.eup %10023  ;;  %v1778_v8 = vmul.f32 %v10022_v0, %v12464_v51  ;;  %10037 = vrcp.f32 %v1689_v41  ;;  %v10317_v51 = vld [vmem:[#allocation2 + $0xb8] sm:$0xff]  ;;  %v13890_v0 = vld [vmem:[#allocation73_spill] sm:$0xff]  ;;  %v13891_v41 = vld [vmem:[#allocation74_spill] sm:$0xff] }
 0x2ca   : > { %9248 = vmatmul.mubr.msk.f32.gmra.mrb[144].mxu0 %vm1788_vm1, %v1773_v46  ;;  %8995 = vmatmul.mubr.msk.f32.gmra.mrb[14].mxu1 %vm1788_vm1, %v10312_v24  ;;  %v10026_v23 = vpop.eup %10025  ;;  %v1691_v9 = vadd.f32 1.0, %v10024_v30  ;;  %10039 = vrcp.f32 %v1690_v63  ;;  %v10328_v46 = vld [vmem:[#allocation2 + $0x19] sm:$0xff]  ;;  %v13892_v30 = vld [vmem:[#allocation75_spill] sm:$0xff] }
 0x2cb   : > { %9250 = vmatprep.mubr.msk.f32.mxu0 %vm1788_vm1, %v1774_v20  ;;  %8997 = vmatprep.mubr.msk.f32.mxu1 %vm1788_vm1, %v10313_v34  ;;  %v10028_v21 = vpop.eup %10027  ;;  %v1779_v32 = vmul.f32 %v10026_v23, %v12475_v55  ;;  %v12637_v20 = vld [vmem:[%s13654_s18 + $0x10] sm:$0xff]  ;;  %v12655_v24 = vld [vmem:[%s13654_s18 + $0x20] sm:$0xff] }
 0x2cc   : > { %v10030_v40 = vpop.eup %10029  ;;  %v1780_v35 = vmul.f32 %v10028_v21, %v12482_v27  ;;  %10041 = vrcp.f32 %v1691_v9  ;;  %v4515_v54 = vmul.f32 %v12637_v20, %v4483_v19  ;;  %v4517_v2 = vmul.f32 %v12655_v24, %v12645_v14  ;;  %v13894_v63 = vld [vmem:[#allocation77_spill] sm:$0xff]  ;;  %v13896_v23 = vld [vmem:[#allocation79_spill] sm:$0xff]  ;;  %v13899_v21 = vld [vmem:[#allocation82_spill] sm:$0xff] }
 0x2cd   : > { %v10032_v22 = vpop.eup %10031  ;;  %v1781_v59 = vmul.f32 %v10030_v40, %v12500_v28  ;;  %v13900_v9 = vld [vmem:[#allocation83_spill] sm:$0xff]  ;;  %v13903_v40 = vld [vmem:[#allocation86_spill] sm:$0xff] }
 0x2ce   : > { %9251 = vmatmul.mubr.msk.f32.gmra.mrb[146].mxu0 %vm1788_vm1, %v1775_v12  ;;  %8998 = vmatmul.mubr.msk.f32.gmra.mrb[16].mxu1 %vm1788_vm1, %v10314_v5  ;;  %v1782_v58 = vmul.f32 %v10032_v22, %v12508_v49  ;;  %v10330_v12 = vld [vmem:[%s13654_s18 + $0x18] sm:$0xff]  ;;  %v13895_v5 = vld [vmem:[#allocation78_spill] sm:$0xff]  ;;  %v13906_v22 = vld [vmem:[#allocation89_spill] sm:$0xff] }
 0x2cf   : > { %9253 = vmatprep.mubr.msk.f32.mxu0 %vm1788_vm1, %v1776_v3  ;;  %9000 = vmatprep.mubr.msk.f32.mxu1 %vm1788_vm1, %v10315_v18  ;;  %v10034_v55 = vpop.eup %10033  ;;  %v4516_v38 = vmul.f32 %v10330_v12, %v4484_v39  ;;  %v10333_v3 = vld [vmem:[#allocation2 + $0x41] sm:$0xff]  ;;  %v13917_v19 = vld [vmem:[#allocation107_spill] sm:$0xff] }
 0x2d0   : > { %v10036_v27 = vpop.eup %10035  ;;  %v1783_v26 = vmul.f32 %v10034_v55, %v12520_v37  ;;  %v13898_v18 = vld [vmem:[#allocation81_spill] sm:$0xff]  ;;  %v13909_v55 = vld [vmem:[#allocation92_spill] sm:$0xff]  ;;  %v13919_v39 = vld [vmem:[#allocation110_spill] sm:$0xff] }
 0x2d1   : > { %v1784_v25 = vmul.f32 %v10036_v27, %v12527_v62  ;;  %v13912_v27 = vld [vmem:[#allocation101_spill] sm:$0xff] }
 0x2d2   : > { %9254 = vmatmul.mubr.msk.f32.gmra.mrb[148].mxu0 %vm1788_vm1, %v1777_v13  ;;  %9001 = vmatmul.mubr.msk.f32.gmra.mrb[18].mxu1 %vm1788_vm1, %v10316_v7  ;;  %v13893_v13 = vld [vmem:[#allocation76_spill] sm:$0xff]  ;;  %v13902_v7 = vld [vmem:[#allocation85_spill] sm:$0xff] }
 0x2d3   : > { %9256 = vmatprep.mubr.msk.f32.mxu0 %vm1788_vm1, %v1778_v8  ;;  %9003 = vmatprep.mubr.msk.f32.mxu1 %vm1788_vm1, %v10317_v51  ;;  %v10038_v28 = vpop.eup %10037  ;;  %v13897_v8 = vld [vmem:[#allocation80_spill] sm:$0xff] }
 0x2d4   : > { %v10040_v49 = vpop.eup %10039  ;;  %v1785_v36 = vmul.f32 %v10038_v28, %v12538_v10  ;;  %v10326_v10 = vld [vmem:[#allocation2 + $0x100] sm:$0xff]  ;;  %v13905_v51 = vld [vmem:[#allocation88_spill] sm:$0xff] }
 0x2d5   : > { %v1786_v16 = vmul.f32 %v10040_v49, %v12545_v17  ;;  %v12619_v17 = vld [vmem:[#allocation2 + $0x108] sm:$0xff]  ;;  %v10337_v49 = vld [vmem:[#allocation2 + $0x111] sm:$0xff] }
 0x2d6   : > { %9257 = vmatmul.mubr.msk.f32.gmra.mrb[150].mxu0 %vm1788_vm1, %v1779_v32  ;;  %9004 = vmatmul.mubr.msk.f32.gmra.mrb[20].mxu1 %vm1788_vm1, %v10318_v15  ;;  %v10042_v37 = vpop.eup %10041  ;;  %v13901_v32 = vld [vmem:[#allocation84_spill] sm:$0xff]  ;;  %v13908_v15 = vld [vmem:[#allocation91_spill] sm:$0xff] }
 0x2d7   : > { %9259 = vmatprep.mubr.msk.f32.mxu0 %vm1788_vm1, %v1780_v35  ;;  %9006 = vmatprep.mubr.msk.f32.mxu1 %vm1788_vm1, %v10319_v57  ;;  %v1787_v62 = vmul.f32 %v10042_v37, %v12554_v43  ;;  %v12626_v43 = vld [vmem:[%s13654_s18] sm:$0xff]  ;;  %v13904_v35 = vld [vmem:[#allocation87_spill] sm:$0xff]  ;;  %v13911_v57 = vld [vmem:[#allocation94_spill] sm:$0xff] }
 0x2d8   : > { %v4513_v61 = vmul.f32 %v10328_v46, %v12626_v43  ;;  %v10339_v37 = vld [vmem:[#allocation2 + $0x27] sm:$0xff]  ;;  %v13915_v46 = vld [vmem:[#allocation103_spill] sm:$0xff] }
 0x2da   : > { %9260 = vmatmul.mubr.msk.f32.gmra.mrb[152].mxu0 %vm1788_vm1, %v1781_v59  ;;  %9007 = vmatmul.mubr.msk.f32.gmra.mrb[22].mxu1 %vm1788_vm1, %v10320_v4  ;;  %v13907_v59 = vld [vmem:[#allocation90_spill] sm:$0xff] }
 0x2db   : > { %9262 = vmatprep.mubr.msk.f32.mxu0 %vm1788_vm1, %v1782_v58  ;;  %9009 = vmatprep.mubr.msk.f32.mxu1 %vm1788_vm1, %v10321_v6  ;;  %v13910_v58 = vld [vmem:[#allocation93_spill] sm:$0xff]  ;;  %v10335_v4 = vld [vmem:[#allocation2 + $0x109] sm:$0xff]  ;;  %v12726_v6 = vld [vmem:[%s13654_s18 + $0xf8] sm:$0xff] }
 0x2de   : > { %9263 = vmatmul.mubr.msk.f32.gmra.mrb[154].mxu0 %vm1788_vm1, %v1783_v26  ;;  %9010 = vmatmul.mubr.msk.f32.gmra.mrb[24].mxu1 %vm1788_vm1, %v10322_v31  ;;  %v12717_v26 = vld [vmem:[%s13654_s18 + $0xf0] sm:$0xff]  ;;  %v10338_v31 = vld [vmem:[%s13653_s17] sm:$0xff] }
 0x2df   : > { %9265 = vmatprep.mubr.msk.f32.mxu0 %vm1788_vm1, %v1784_v25  ;;  %9012 = vmatprep.mubr.msk.f32.mxu1 %vm1788_vm1, %v10323_v11  ;;  %v4543_v28 = vmul.f32 %v10335_v4, %v12717_v26  ;;  %v13913_v25 = vld [vmem:[#allocation118_spill] sm:$0xff] }
 0x2e0   : > { %v10340_v11 = vld [vmem:[%s13653_s17 + $0x8] sm:$0xff] }
 0x2e2   : > { %9266 = vmatmul.mubr.msk.f32.gmra.mrb[156].mxu0 %vm1788_vm1, %v1785_v36  ;;  %9013 = vmatmul.mubr.msk.f32.gmra.mrb[26].mxu1 %vm1788_vm1, %v10324_v48  ;;  %v4544_v36 = vmul.f32 %v10337_v49, %v12726_v6 }
 0x2e3   : > { %9268 = vmatprep.mubr.msk.f32.mxu0 %vm1788_vm1, %v1786_v16  ;;  %9015 = vmatprep.mubr.msk.f32.mxu1 %vm1788_vm1, %v10325_v47  ;;  %v4932_v16 = vmul.f32 %v10339_v37, %v10338_v31  ;;  %v12740_v47 = vld [vmem:[%s13646_s10 + $0x40] sm:$0xff]  ;;  %v13937_v31 = vld [vmem:[#allocation130_spill] sm:$0xff]  ;;  %v13938_v37 = vld [vmem:[#allocation131_spill] sm:$0xff] }
 0x2e6   : > { %9269 = vmatmul.mubr.msk.f32.gmra.mrb[158].mxu0 %vm1788_vm1, %v1787_v62  ;;  %9016 = vmatmul.mubr.msk.f32.gmra.mrb[28].mxu1 %vm1788_vm1, %v10326_v10  ;;  %v10341_v62 = vld [vmem:[#allocation2 + $0x2f] sm:$0xff] }
 0x2e7   : > { %9018 = vmatprep.mubr.msk.f32.mxu1 %vm1788_vm1, %v12619_v17  ;;  %v4933_v48 = vmul.f32 %v10341_v62, %v10340_v11  ;;  %v13914_v10 = vld [vmem:[#allocation102_spill] sm:$0xff]  ;;  %v13939_v62 = vld [vmem:[#allocation132_spill] sm:$0xff] }
 0x2ea   : > { %9019 = vmatmul.mubr.msk.f32.gmra.mrb[30].mxu1 %vm1788_vm1, %v12629_v56 }
 0x2eb   : > { %9023 = vmatprep.mubr.msk.f32.mxu1 %vm1788_vm1, %v4513_v61  ;;  %v13916_v61 = vld [vmem:[#allocation106_spill] sm:$0xff] }
 0x2ee   : > { %9024 = vmatmul.mubr.msk.f32.vlgmr.msra.gmra.mrb[0].mxu1 %vm1788_vm1, %v13889_v52 }
 0x2ef   : > { %9072 = vmatpush3.msra.mxu1 %v12490_v50  ;;  %9026 = vmatprep.mubr.msk.f32.mxu1 %vm1788_vm1, %v4515_v54  ;;  %v12664_v50 = vld [vmem:[%s13654_s18 + $0x28] sm:$0xff]  ;;  %v13918_v54 = vld [vmem:[#allocation108_spill] sm:$0xff] }
 0x2f0   : > { %9121 = vmatprep.subr.mxu1 %v7948_v33  ;;  %v4518_v34 = vmul.f32 %v10333_v3, %v12664_v50 }
 0x2f2   : > { %9027 = vmatmul.mubr.msk.f32.gmra.mrb[2].mxu1 %vm1788_vm1, %v4516_v38  ;;  %v13921_v38 = vld [vmem:[#allocation112_spill] sm:$0xff] }
 0x2f3   : > { %9029 = vmatprep.mubr.msk.f32.mxu1 %vm1788_vm1, %v4517_v2  ;;  %v13922_v2 = vld [vmem:[#allocation113_spill] sm:$0xff] }
 0x2f6   : > { %9030 = vmatmul.mubr.msk.f32.gmra.mrb[4].mxu1 %vm1788_vm1, %v4518_v34 }
 0x2f7   : > { %9032 = vmatprep.mubr.msk.f32.mxu1 %vm1788_vm1, %v13890_v0  ;;  %v13923_v0 = vld [vmem:[#allocation114_spill] sm:$0xff] }
 0x2fa   : > { %9033 = vmatmul.mubr.msk.f32.gmra.mrb[6].mxu1 %vm1788_vm1, %v13891_v41  ;;  %v13924_v41 = vld [vmem:[#allocation115_spill] sm:$0xff] }
 0x2fb   : > { %9035 = vmatprep.mubr.msk.f32.mxu1 %vm1788_vm1, %v13892_v30 }
 0x2fe   : > { %9036 = vmatmul.mubr.msk.f32.gmra.mrb[8].mxu1 %vm1788_vm1, %v13893_v13 }
 0x2ff   : > { %9038 = vmatprep.mubr.msk.f32.mxu1 %vm1788_vm1, %v13894_v63  ;;  %v13925_v63 = vld [vmem:[#allocation116_spill] sm:$0xff] }
 0x302   : > { %9039 = vmatmul.mubr.msk.f32.gmra.mrb[10].mxu1 %vm1788_vm1, %v13895_v5  ;;  %v13926_v5 = vld [vmem:[#allocation119_spill] sm:$0xff] }
 0x303   : > { %9041 = vmatprep.mubr.msk.f32.mxu1 %vm1788_vm1, %v13896_v23 }
 0x306   : > { %9042 = vmatmul.mubr.msk.f32.gmra.mrb[12].mxu1 %vm1788_vm1, %v13897_v8 }
 0x307   : > { %9044 = vmatprep.mubr.msk.f32.mxu1 %vm1788_vm1, %v13898_v18  ;;  %v13927_v18 = vld [vmem:[#allocation120_spill] sm:$0xff] }
 0x30a   : > { %9045 = vmatmul.mubr.msk.f32.gmra.mrb[14].mxu1 %vm1788_vm1, %v13899_v21  ;;  %v13928_v21 = vld [vmem:[#allocation121_spill] sm:$0xff] }
 0x30b   : > { %9047 = vmatprep.mubr.msk.f32.mxu1 %vm1788_vm1, %v13900_v9 }
 0x30e   : > { %9048 = vmatmul.mubr.msk.f32.gmra.mrb[16].mxu1 %vm1788_vm1, %v13901_v32 }
 0x30f   : > { %9050 = vmatprep.mubr.msk.f32.mxu1 %vm1788_vm1, %v13902_v7  ;;  %v13929_v7 = vld [vmem:[#allocation122_spill] sm:$0xff] }
 0x312   : > { %9051 = vmatmul.mubr.msk.f32.gmra.mrb[18].mxu1 %vm1788_vm1, %v13903_v40  ;;  %v13930_v40 = vld [vmem:[#allocation123_spill] sm:$0xff] }
 0x313   : > { %9053 = vmatprep.mubr.msk.f32.mxu1 %vm1788_vm1, %v13904_v35 }
 0x316   : > { %9054 = vmatmul.mubr.msk.f32.gmra.mrb[20].mxu1 %vm1788_vm1, %v13905_v51 }
 0x317   : > { %9056 = vmatprep.mubr.msk.f32.mxu1 %vm1788_vm1, %v13906_v22  ;;  %v13931_v22 = vld [vmem:[#allocation124_spill] sm:$0xff] }
 0x31a   : > { %9057 = vmatmul.mubr.msk.f32.gmra.mrb[22].mxu1 %vm1788_vm1, %v13907_v59  ;;  %v13932_v59 = vld [vmem:[#allocation125_spill] sm:$0xff] }
 0x31b   : > { %9059 = vmatprep.mubr.msk.f32.mxu1 %vm1788_vm1, %v13908_v15 }
 0x31e   : > { %9060 = vmatmul.mubr.msk.f32.gmra.mrb[24].mxu1 %vm1788_vm1, %v13909_v55 }
 0x31f   : > { %9062 = vmatprep.mubr.msk.f32.mxu1 %vm1788_vm1, %v13910_v58  ;;  %v13933_v58 = vld [vmem:[#allocation126_spill] sm:$0xff] }
 0x322   : > { %9063 = vmatmul.mubr.msk.f32.gmra.mrb[26].mxu1 %vm1788_vm1, %v13911_v57  ;;  %v13934_v57 = vld [vmem:[#allocation127_spill] sm:$0xff] }
 0x323   : > { %9065 = vmatprep.mubr.msk.f32.mxu1 %vm1788_vm1, %v13912_v27 }
 0x326   : > { %9066 = vmatmul.mubr.msk.f32.gmra.mrb[28].mxu1 %vm1788_vm1, %v13913_v25  ;;  %v13936_v25 = vld [vmem:[#allocation129_spill] sm:$0xff] }
 0x327   : > { %9068 = vmatprep.mubr.msk.f32.mxu1 %vm1788_vm1, %v4543_v28  ;;  %v13935_v28 = vld [vmem:[#allocation128_spill] sm:$0xff] }
 0x32a   : > { %9069 = vmatmul.mubr.msk.f32.gmra.mrb[30].mxu1 %vm1788_vm1, %v4544_v36 }
 0x32b   : > { %9073 = vmatprep.mubr.msk.f32.mxu1 %vm1788_vm1, %v4932_v16 }
 0x32e   : > { %9074 = vmatmul.mubr.msk.f32.vlgmr.msra.gmra.mrb[0].mxu1 %vm1788_vm1, %v4933_v48  ;;  %v4930_v48 = vld [vmem:[#allocation2 + $0x117] sm:$0xff] }
 0x32f   : > { %9122 = vmatpush3.msra.mxu1 %v7948_v33  ;;  %9076 = vmatprep.mubr.msk.f32.mxu1 %vm1788_vm1, %v13914_v10  ;;  %v13920_v33 = vld [vmem:[#allocation111_spill] sm:$0xff] }
 0x330   : > { %9171 = vmatprep.subr.mxu1 %v12740_v47 }
 0x332   : > { %9077 = vmatmul.mubr.msk.f32.gmra.mrb[2].mxu1 %vm1788_vm1, %v13915_v46  ;;  %v4931_v46 = vld [vmem:[#allocation2 + $0x11f] sm:$0xff] }
 0x333   : > { %9079 = vmatprep.mubr.msk.f32.mxu1 %vm1788_vm1, %v13916_v61 }
 0x334   : > { %v12758_v52 = vpop.f32.mrb[96].mxu0 }
 0x335   : > { %v12760_v12 = vpop.f32.mrb[97].mxu0 }
 0x336   : > { %9080 = vmatmul.mubr.msk.f32.gmra.mrb[4].mxu1 %vm1788_vm1, %v13917_v19  ;;  %v4962_v19 = vmul.f32 %v4930_v48, %v12381_v53  ;;  %v5334_v48 = vld [vmem:[#allocation2 + $0xa0] sm:$0xff] }
 0x337   : > { %9082 = vmatprep.mubr.msk.f32.mxu1 %vm1788_vm1, %v13918_v54  ;;  %v4963_v54 = vmul.f32 %v4931_v46, %v12406_v44  ;;  %v5320_v44 = vld [vmem:[#allocation2 + $0x30] sm:$0xff]  ;;  %v5335_v46 = vld [vmem:[#allocation2 + $0xa8] sm:$0xff] }
 0x338   : > { %v12766_v3 = vpop.f32.mrb[98].mxu0 }
 0x339   : > { %v12768_v34 = vpop.f32.mrb[99].mxu0 }
 0x33a   : > { %9083 = vmatmul.mubr.msk.f32.gmra.mrb[6].mxu1 %vm1788_vm1, %v13919_v39 }
 0x33b   : > { %9085 = vmatprep.mubr.msk.f32.mxu1 %vm1788_vm1, %v13920_v33 }
 0x33e   : > { %9086 = vmatmul.mubr.msk.f32.gmra.mrb[8].mxu1 %vm1788_vm1, %v13921_v38  ;;  %v6459_v38 = vld [vmem:[%s13649_s13] sm:$0xff] }
 0x33f   : > { %9088 = vmatprep.mubr.msk.f32.mxu1 %vm1788_vm1, %v13922_v2  ;;  %9271 = vmatprep.subr.mxu0 %v6459_v38  ;;  %v5321_v2 = vld [vmem:[#allocation2 + $0x38] sm:$0xff] }
 0x340   : > { %9272 = vmatpush3.msra.mxu0 %v6459_v38  ;;  %v5339_v38 = vld [vmem:[#allocation2 + $0xc8] sm:$0xff] }
 0x342   : > { %9089 = vmatmul.mubr.msk.f32.gmra.mrb[10].mxu1 %vm1788_vm1, %v13923_v0 }
 0x343   : > { %9091 = vmatprep.mubr.msk.f32.mxu1 %vm1788_vm1, %v13924_v41 }
 0x345   : > { %v12774_v30 = vpop.f32.mrb[100].mxu0 }
 0x346   : > { %v12776_v13 = vpop.f32.mrb[101].mxu0  ;;  %9092 = vmatmul.mubr.msk.f32.gmra.mrb[12].mxu1 %vm1788_vm1, %v13925_v63  ;;  %v5322_v63 = vld [vmem:[#allocation2 + $0x40] sm:$0xff] }
 0x347   : > { %9094 = vmatprep.mubr.msk.f32.mxu1 %vm1788_vm1, %v13926_v5  ;;  %v5323_v5 = vld [vmem:[#allocation2 + $0x48] sm:$0xff] }
 0x349   : > { %v12782_v23 = vpop.f32.mrb[102].mxu0 }
 0x34a   : > { %v12784_v8 = vpop.f32.mrb[103].mxu0  ;;  %9095 = vmatmul.mubr.msk.f32.gmra.mrb[14].mxu1 %vm1788_vm1, %v13927_v18 }
 0x34b   : > { %9097 = vmatprep.mubr.msk.f32.mxu1 %vm1788_vm1, %v13928_v21 }
 0x34d   : > { %v12790_v9 = vpop.f32.mrb[104].mxu0 }
 0x34e   : > { %v12792_v32 = vpop.f32.mrb[105].mxu0  ;;  %9098 = vmatmul.mubr.msk.f32.gmra.mrb[16].mxu1 %vm1788_vm1, %v13929_v7  ;;  %v5324_v7 = vld [vmem:[#allocation2 + $0x50] sm:$0xff] }
 0x34f   : > { %9100 = vmatprep.mubr.msk.f32.mxu1 %vm1788_vm1, %v13930_v40 }
 0x351   : > { %v12798_v35 = vpop.f32.mrb[106].mxu0 }
 0x352   : > { %v12800_v51 = vpop.f32.mrb[107].mxu0  ;;  %9101 = vmatmul.mubr.msk.f32.gmra.mrb[18].mxu1 %vm1788_vm1, %v13931_v22 }
 0x353   : > { %9103 = vmatprep.mubr.msk.f32.mxu1 %vm1788_vm1, %v13932_v59  ;;  %v5326_v59 = vld [vmem:[#allocation2 + $0x60] sm:$0xff] }
 0x355   : > { %v12806_v15 = vpop.f32.mrb[108].mxu0 }
 0x356   : > { %v12808_v55 = vpop.f32.mrb[109].mxu0  ;;  %9104 = vmatmul.mubr.msk.f32.gmra.mrb[20].mxu1 %vm1788_vm1, %v13933_v58  ;;  %v5327_v58 = vld [vmem:[#allocation2 + $0x68] sm:$0xff] }
 0x357   : > { %9106 = vmatprep.mubr.msk.f32.mxu1 %vm1788_vm1, %v13934_v57  ;;  %v5328_v57 = vld [vmem:[#allocation2 + $0x70] sm:$0xff] }
 0x359   : > { %v12814_v27 = vpop.f32.mrb[110].mxu0 }
 0x35a   : > { %v12816_v4 = vpop.f32.mrb[111].mxu0  ;;  %9107 = vmatmul.mubr.msk.f32.gmra.mrb[22].mxu1 %vm1788_vm1, %v13935_v28  ;;  %v5329_v28 = vld [vmem:[#allocation2 + $0x78] sm:$0xff] }
 0x35b   : > { %9109 = vmatprep.mubr.msk.f32.mxu1 %vm1788_vm1, %v13936_v25  ;;  %v5330_v25 = vld [vmem:[#allocation2 + $0x80] sm:$0xff] }
 0x35d   : > { %v12822_v49 = vpop.f32.mrb[112].mxu0 }
 0x35e   : > { %v12824_v36 = vpop.f32.mrb[113].mxu0  ;;  %9110 = vmatmul.mubr.msk.f32.gmra.mrb[24].mxu1 %vm1788_vm1, %v13937_v31  ;;  %v5331_v31 = vld [vmem:[#allocation2 + $0x88] sm:$0xff] }
 0x35f   : > { %9112 = vmatprep.mubr.msk.f32.mxu1 %vm1788_vm1, %v13938_v37  ;;  %v5332_v37 = vld [vmem:[#allocation2 + $0x90] sm:$0xff] }
 0x361   : > { %v12830_v16 = vpop.f32.mrb[114].mxu0 }
 0x362   : > { %v12832_v11 = vpop.f32.mrb[115].mxu0  ;;  %9113 = vmatmul.mubr.msk.f32.gmra.mrb[26].mxu1 %vm1788_vm1, %v13939_v62  ;;  %v5333_v62 = vld [vmem:[#allocation2 + $0x98] sm:$0xff] }
 0x363   : > { %9115 = vmatprep.mubr.msk.f32.mxu1 %vm1788_vm1, %v12109_v60  ;;  %v5319_v60 = vld [vmem:[#allocation2 + $0x28] sm:$0xff] }
 0x365   : > { %v12838_v10 = vpop.f32.mrb[116].mxu0 }
 0x366   : > { %v12840_v61 = vpop.f32.mrb[117].mxu0  ;;  %9116 = vmatmul.mubr.msk.f32.gmra.mrb[28].mxu1 %vm1788_vm1, %v12113_v29 }
 0x367   : > { %9118 = vmatprep.mubr.msk.f32.mxu1 %vm1788_vm1, %v4962_v19  ;;  %v5336_v19 = vld [vmem:[#allocation2 + $0xb0] sm:$0xff] }
 0x369   : > { %v12847_v39 = vpop.f32.mrb[118].mxu0 }
 0x36a   : > { %v12849_v33 = vpop.f32.mrb[119].mxu0  ;;  %9119 = vmatmul.mubr.msk.f32.gmra.mrb[30].mxu1 %vm1788_vm1, %v4963_v54  ;;  %v5337_v54 = vld [vmem:[#allocation2 + $0xb8] sm:$0xff] }
 0x36b   : > { %9123 = vmatprep.mubr.msk.f32.mxu1 %vm1788_vm1, %v5319_v60  ;;  %v5338_v60 = vld [vmem:[#allocation2 + $0xc0] sm:$0xff] }
 0x36d   : > { %v12856_v53 = vpop.f32.mrb[120].mxu0 }
 0x36e   : > { %v12858_v29 = vpop.f32.mrb[121].mxu0  ;;  %9124 = vmatmul.mubr.msk.f32.vlgmr.msra.gmra.mrb[0].mxu1 %vm1788_vm1, %v5320_v44  ;;  %v5340_v44 = vld [vmem:[#allocation2 + $0xd0] sm:$0xff] }
 0x36f   : > { %9172 = vmatpush3.msra.mxu1 %v12740_v47  ;;  %9126 = vmatprep.mubr.msk.f32.mxu1 %vm1788_vm1, %v5321_v2  ;;  %v5325_v47 = vld [vmem:[#allocation2 + $0x58] sm:$0xff] }
 0x370   : > { %v5341_v2 = vld [vmem:[#allocation2 + $0xd8] sm:$0xff] }
 0x371   : > { %v12863_v0 = vpop.f32.mrb[122].mxu0 }
 0x372   : > { %v12865_v41 = vpop.f32.mrb[123].mxu0  ;;  %9127 = vmatmul.mubr.msk.f32.gmra.mrb[2].mxu1 %vm1788_vm1, %v5322_v63  ;;  %v5342_v63 = vld [vmem:[#allocation2 + $0xe0] sm:$0xff] }
 0x373   : > { %9129 = vmatprep.mubr.msk.f32.mxu1 %vm1788_vm1, %v5323_v5  ;;  %v5343_v5 = vld [vmem:[#allocation2 + $0xe8] sm:$0xff] }
 0x375   : > { %v12869_v18 = vpop.f32.mrb[124].mxu0 }
 0x376   : > { %v12871_v21 = vpop.f32.mrb[125].mxu0  ;;  %9130 = vmatmul.mubr.msk.f32.gmra.mrb[4].mxu1 %vm1788_vm1, %v5324_v7  ;;  %v5344_v7 = vld [vmem:[#allocation2 + $0xf0] sm:$0xff] }
 0x377   : > { %9132 = vmatprep.mubr.msk.f32.mxu1 %vm1788_vm1, %v5325_v47  ;;  %v5345_v47 = vld [vmem:[#allocation2 + $0xf8] sm:$0xff] }
 0x379   : > { %v12875_v40 = vpop.f32.mrb[126].mxu0 }
 0x37a   : > { %v12877_v22 = vpop.f32.mrb[127].mxu0  ;;  %9133 = vmatmul.mubr.msk.f32.gmra.mrb[6].mxu1 %vm1788_vm1, %v5326_v59  ;;  %v5346_v59 = vld [vmem:[#allocation2 + $0x100] sm:$0xff] }
 0x37b   : > { %9135 = vmatprep.mubr.msk.f32.mxu1 %vm1788_vm1, %v5327_v58  ;;  %v5349_v58 = vld [vmem:[#allocation2 + $0x118] sm:$0xff] }
 0x37e   : > { %9136 = vmatmul.mubr.msk.f32.gmra.mrb[8].mxu1 %vm1788_vm1, %v5328_v57  ;;  %v5350_v57 = vld [vmem:[#allocation2 + $0x120] sm:$0xff] }
 0x37f   : > { %9138 = vmatprep.mubr.msk.f32.mxu1 %vm1788_vm1, %v5329_v28  ;;  %v10342_v28 = vld [vmem:[#allocation2 + $0x29] sm:$0xff] }
 0x382   : > { %9139 = vmatmul.mubr.msk.f32.gmra.mrb[10].mxu1 %vm1788_vm1, %v5330_v25  ;;  %v5738_v25 = vmul.f32 %v10342_v28, %v12626_v43  ;;  %v5712_v43 = vld [vmem:[#allocation2 + $0x59] sm:$0xff] }
 0x383   : > { %9141 = vmatprep.mubr.msk.f32.mxu1 %vm1788_vm1, %v5331_v31  ;;  %v5740_v31 = vmul.f32 %v12637_v20, %v12645_v14  ;;  %v10343_v20 = vld [vmem:[%s13654_s18 + $0x30] sm:$0xff] }
 0x384   : > { %v5744_v14 = vmul.f32 %v10343_v20, %v5712_v43  ;;  %v5721_v43 = vld [vmem:[#allocation2 + $0xa1] sm:$0xff]  ;;  %v10352_v20 = vld [vmem:[%s13654_s18 + $0x78] sm:$0xff] }
 0x386   : > { %9142 = vmatmul.mubr.msk.f32.gmra.mrb[12].mxu1 %vm1788_vm1, %v5332_v37  ;;  %v13940_v37 = vld [vmem:[#allocation72_spill] sm:$0xff] }
 0x387   : > { %9144 = vmatprep.mubr.msk.f32.mxu1 %vm1788_vm1, %v5333_v62  ;;  %v5711_v62 = vld [vmem:[#allocation2 + $0x51] sm:$0xff] }
 0x38a   : > { %9145 = vmatmul.mubr.msk.f32.gmra.mrb[14].mxu1 %vm1788_vm1, %v5334_v48  ;;  %v5743_v48 = vmul.f32 %v12664_v50, %v5711_v62  ;;  %v10345_v50 = vld [vmem:[%s13654_s18 + $0x40] sm:$0xff] }
 0x38b   : > { %9147 = vmatprep.mubr.msk.f32.mxu1 %vm1788_vm1, %v5335_v46  ;;  %v5713_v46 = vld [vmem:[#allocation2 + $0x61] sm:$0xff] }
 0x38e   : > { %9148 = vmatmul.mubr.msk.f32.gmra.mrb[16].mxu1 %vm1788_vm1, %v5336_v19  ;;  %v5714_v19 = vld [vmem:[#allocation2 + $0x69] sm:$0xff] }
 0x38f   : > { %9150 = vmatprep.mubr.msk.f32.mxu1 %vm1788_vm1, %v5337_v54  ;;  %v5746_v54 = vmul.f32 %v10345_v50, %v5714_v19  ;;  %v10354_v50 = vld [vmem:[%s13654_s18 + $0x88] sm:$0xff] }
 0x392   : > { %9151 = vmatmul.mubr.msk.f32.gmra.mrb[18].mxu1 %vm1788_vm1, %v5338_v60  ;;  %v5715_v60 = vld [vmem:[#allocation2 + $0x71] sm:$0xff] }
 0x393   : > { %9153 = vmatprep.mubr.msk.f32.mxu1 %vm1788_vm1, %v5339_v38  ;;  %v5716_v38 = vld [vmem:[#allocation2 + $0x79] sm:$0xff] }
 0x396   : > { %9154 = vmatmul.mubr.msk.f32.gmra.mrb[20].mxu1 %vm1788_vm1, %v5340_v44  ;;  %v10346_v44 = vld [vmem:[%s13654_s18 + $0x48] sm:$0xff] }
 0x397   : > { %9156 = vmatprep.mubr.msk.f32.mxu1 %vm1788_vm1, %v5341_v2  ;;  %v5747_v2 = vmul.f32 %v10346_v44, %v5715_v60  ;;  %v10355_v60 = vld [vmem:[%s13654_s18 + $0x90] sm:$0xff]  ;;  %v5725_v44 = vld [vmem:[#allocation2 + $0xc1] sm:$0xff] }
 0x39a   : > { %9157 = vmatmul.mubr.msk.f32.gmra.mrb[22].mxu1 %vm1788_vm1, %v5342_v63  ;;  %v10347_v63 = vld [vmem:[%s13654_s18 + $0x50] sm:$0xff] }
 0x39b   : > { %9159 = vmatprep.mubr.msk.f32.mxu1 %vm1788_vm1, %v5343_v5  ;;  %v5748_v5 = vmul.f32 %v10347_v63, %v5716_v38  ;;  %v10356_v63 = vld [vmem:[%s13654_s18 + $0x98] sm:$0xff] }
 0x39e   : > { %9160 = vmatmul.mubr.msk.f32.gmra.mrb[24].mxu1 %vm1788_vm1, %v5344_v7  ;;  %v5717_v7 = vld [vmem:[#allocation2 + $0x81] sm:$0xff] }
 0x39f   : > { %9162 = vmatprep.mubr.msk.f32.mxu1 %vm1788_vm1, %v5345_v47  ;;  %v5718_v47 = vld [vmem:[#allocation2 + $0x89] sm:$0xff] }
 0x3a2   : > { %9163 = vmatmul.mubr.msk.f32.gmra.mrb[26].mxu1 %vm1788_vm1, %v5346_v59  ;;  %v10348_v59 = vld [vmem:[%s13654_s18 + $0x58] sm:$0xff] }
 0x3a3   : > { %9165 = vmatprep.mubr.msk.f32.mxu1 %vm1788_vm1, %v12619_v17  ;;  %v5710_v17 = vld [vmem:[#allocation2 + $0x49] sm:$0xff] }
 0x3a6   : > { %9166 = vmatmul.mubr.msk.f32.gmra.mrb[28].mxu1 %vm1788_vm1, %v12629_v56  ;;  %v5742_v56 = vmul.f32 %v12655_v24, %v5710_v17 }
 0x3a7   : > { %9168 = vmatprep.mubr.msk.f32.mxu1 %vm1788_vm1, %v5349_v58  ;;  %v5749_v58 = vmul.f32 %v10348_v59, %v5717_v7  ;;  %v10357_v7 = vld [vmem:[%s13654_s18 + $0xa0] sm:$0xff]  ;;  %v5727_v59 = vld [vmem:[#allocation2 + $0xd1] sm:$0xff] }
 0x3aa   : > { %9169 = vmatmul.mubr.msk.f32.gmra.mrb[30].mxu1 %vm1788_vm1, %v5350_v57  ;;  %v10349_v57 = vld [vmem:[%s13654_s18 + $0x60] sm:$0xff] }
 0x3ab   : > { %9173 = vmatprep.mubr.msk.f32.mxu1 %vm1788_vm1, %v5738_v25  ;;  %v5750_v28 = vmul.f32 %v10349_v57, %v5718_v47  ;;  %v5719_v25 = vld [vmem:[#allocation2 + $0x91] sm:$0xff]  ;;  %v10358_v57 = vld [vmem:[%s13654_s18 + $0xa8] sm:$0xff] }
 0x3ae   : > { %9174 = vmatmul.mubr.msk.f32.vlgmr.msra.gmra.mrb[0].mxu1 %vm1788_vm1, %v13940_v37  ;;  %v10350_v37 = vld [vmem:[%s13654_s18 + $0x68] sm:$0xff] }
 0x3af   : > { %9176 = vmatprep.mubr.msk.f32.mxu1 %vm1788_vm1, %v5740_v31  ;;  %v5720_v31 = vld [vmem:[#allocation2 + $0x99] sm:$0xff]  ;;  %v5751_v17 = vmul.f32 %v10350_v37, %v5719_v25  ;;  %v10359_v25 = vld [vmem:[%s13654_s18 + $0xb0] sm:$0xff]  ;;  %v5729_v37 = vld [vmem:[#allocation2 + $0xe1] sm:$0xff] }
 0x3b2   : > { %9177 = vmatmul.mubr.msk.f32.gmra.mrb[2].mxu1 %vm1788_vm1, %v12118_v42  ;;  %v10344_v42 = vld [vmem:[%s13654_s18 + $0x38] sm:$0xff] }
 0x3b3   : > { %9179 = vmatprep.mubr.msk.f32.mxu1 %vm1788_vm1, %v5742_v56  ;;  %v5745_v24 = vmul.f32 %v10344_v42, %v5713_v46  ;;  %v10351_v56 = vld [vmem:[%s13654_s18 + $0x70] sm:$0xff]  ;;  %v10353_v46 = vld [vmem:[%s13654_s18 + $0x80] sm:$0xff] }
 0x3b4   : > { %v5752_v62 = vmul.f32 %v10351_v56, %v5720_v31  ;;  %v5723_v42 = vld [vmem:[#allocation2 + $0xb1] sm:$0xff] }
 0x3b5   : > { %v10360_v56 = vld [vmem:[%s13654_s18 + $0xb8] sm:$0xff] }
 0x3b6   : > { %9180 = vmatmul.mubr.msk.f32.gmra.mrb[4].mxu1 %vm1788_vm1, %v5743_v48  ;;  %v5722_v48 = vld [vmem:[#allocation2 + $0xa9] sm:$0xff] }
 0x3b7   : > { %9182 = vmatprep.mubr.msk.f32.mxu1 %vm1788_vm1, %v5744_v14  ;;  %v5753_v14 = vmul.f32 %v10352_v20, %v5721_v43  ;;  %v5754_v19 = vmul.f32 %v10353_v46, %v5722_v48  ;;  %v10361_v43 = vld [vmem:[%s13654_s18 + $0xc0] sm:$0xff]  ;;  %v5731_v20 = vld [vmem:[#allocation2 + $0xf1] sm:$0xff]  ;;  %v10362_v46 = vld [vmem:[%s13654_s18 + $0xc8] sm:$0xff] }
 0x3ba   : > { %9183 = vmatmul.mubr.msk.f32.gmra.mrb[6].mxu1 %vm1788_vm1, %v5745_v24  ;;  %v5724_v24 = vld [vmem:[#allocation2 + $0xb9] sm:$0xff] }
 0x3bb   : > { %9185 = vmatprep.mubr.msk.f32.mxu1 %vm1788_vm1, %v5746_v54  ;;  %v5755_v54 = vmul.f32 %v10354_v50, %v5723_v42  ;;  %v5756_v38 = vmul.f32 %v10355_v60, %v5724_v24  ;;  %v10363_v42 = vld [vmem:[%s13654_s18 + $0xd0] sm:$0xff]  ;;  %v5733_v50 = vld [vmem:[#allocation2 + $0x101] sm:$0xff] }
 0x3be   : > { %9186 = vmatmul.mubr.msk.f32.gmra.mrb[8].mxu1 %vm1788_vm1, %v5747_v2  ;;  %v5726_v2 = vld [vmem:[#allocation2 + $0xc9] sm:$0xff] }
 0x3bf   : > { %9188 = vmatprep.mubr.msk.f32.mxu1 %vm1788_vm1, %v5748_v5  ;;  %v5757_v5 = vmul.f32 %v10356_v63, %v5725_v44  ;;  %v5758_v47 = vmul.f32 %v10357_v7, %v5726_v2  ;;  %v5737_v2 = vld [vmem:[#allocation2 + $0x121] sm:$0xff]  ;;  %v13018_v7 = vld [vmem:[%s13647_s11] ss:$0 sm:$0xff] }
 0x3c0   : > { %v5769_v63 = vmul.f32 %v12726_v6, %v5737_v2 }
 0x3c2   : > { %9189 = vmatmul.mubr.msk.f32.gmra.mrb[10].mxu1 %vm1788_vm1, %v5749_v58  ;;  %v5728_v58 = vld [vmem:[#allocation2 + $0xd9] sm:$0xff] }
 0x3c3   : > { %9191 = vmatprep.mubr.msk.f32.mxu1 %vm1788_vm1, %v5750_v28  ;;  %v5759_v28 = vmul.f32 %v10358_v57, %v5727_v59  ;;  %v5760_v31 = vmul.f32 %v10359_v25, %v5728_v58 }
 0x3c6   : > { %9192 = vmatmul.mubr.msk.f32.gmra.mrb[12].mxu1 %vm1788_vm1, %v5751_v17  ;;  %v5730_v17 = vld [vmem:[#allocation2 + $0xe9] sm:$0xff] }
 0x3c7   : > { %9194 = vmatprep.mubr.msk.f32.mxu1 %vm1788_vm1, %v5752_v62  ;;  %v5761_v62 = vmul.f32 %v10360_v56, %v5729_v37  ;;  %v5762_v48 = vmul.f32 %v10361_v43, %v5730_v17 }
 0x3ca   : > { %9195 = vmatmul.mubr.msk.f32.gmra.mrb[14].mxu1 %vm1788_vm1, %v5753_v14  ;;  %v5732_v14 = vld [vmem:[#allocation2 + $0xf9] sm:$0xff] }
 0x3cb   : > { %9197 = vmatprep.mubr.msk.f32.mxu1 %vm1788_vm1, %v5754_v19  ;;  %v5763_v19 = vmul.f32 %v10362_v46, %v5731_v20  ;;  %v5764_v24 = vmul.f32 %v10363_v42, %v5732_v14 }
 0x3ce   : > { %9198 = vmatmul.mubr.msk.f32.gmra.mrb[16].mxu1 %vm1788_vm1, %v5755_v54  ;;  %v10364_v54 = vld [vmem:[%s13654_s18 + $0xd8] sm:$0xff] }
 0x3cf   : > { %9200 = vmatprep.mubr.msk.f32.mxu1 %vm1788_vm1, %v5756_v38  ;;  %v5765_v60 = vmul.f32 %v10364_v54, %v5733_v50  ;;  %v5736_v38 = vld [vmem:[#allocation2 + $0x119] sm:$0xff] }
 0x3d0   : > { %v5768_v44 = vmul.f32 %v12717_v26, %v5736_v38  ;;  %v13024_v26 = vld [vmem:[%s13648_s12] ss:$0 sm:$0xff] }
 0x3d2   : > { %9201 = vmatmul.mubr.msk.f32.gmra.mrb[18].mxu1 %vm1788_vm1, %v5757_v5 }
 0x3d3   : > { %9203 = vmatprep.mubr.msk.f32.mxu1 %vm1788_vm1, %v5758_v47 }
 0x3d6   : > { %9204 = vmatmul.mubr.msk.f32.gmra.mrb[20].mxu1 %vm1788_vm1, %v5759_v28 }
 0x3d7   : > { %9206 = vmatprep.mubr.msk.f32.mxu1 %vm1788_vm1, %v5760_v31 }
 0x3da   : > { %9207 = vmatmul.mubr.msk.f32.gmra.mrb[22].mxu1 %vm1788_vm1, %v5761_v62 }
 0x3db   : > { %9209 = vmatprep.mubr.msk.f32.mxu1 %vm1788_vm1, %v5762_v48 }
 0x3de   : > { %9210 = vmatmul.mubr.msk.f32.gmra.mrb[24].mxu1 %vm1788_vm1, %v5763_v19 }
 0x3df   : > { %9212 = vmatprep.mubr.msk.f32.mxu1 %vm1788_vm1, %v5764_v24 }
 0x3e2   : > { %9213 = vmatmul.mubr.msk.f32.gmra.mrb[26].mxu1 %vm1788_vm1, %v5765_v60 }
 0x3e3   : > { %9215 = vmatprep.mubr.msk.f32.mxu1 %vm1788_vm1, %v12147_v45 }
 0x3e6   : > { %9216 = vmatmul.mubr.msk.f32.gmra.mrb[28].mxu1 %vm1788_vm1, %v12158_v1 }
 0x3e7   : > { %9218 = vmatprep.mubr.msk.f32.mxu1 %vm1788_vm1, %v5768_v44 }
 0x3ea   : > { %9219 = vmatmul.mubr.msk.f32.gmra.mrb[30].mxu1 %vm1788_vm1, %v5769_v63 }
 0x481   : > { %v9175_v5 = vpop.f32.mrb[0].mxu1 }
 0x482   : > { %v9329_v45 = vadd.f32 %v9175_v5, %v12758_v52  ;;  %v5934_v47 = vpop.f32.mrb[1].mxu1 }
 0x483   : > { %v9330_v1 = vadd.f32 %v5934_v47, %v12760_v12 }
 0x484   : > { %v6134_v6 = vmul.f32 %v9329_v45, %v13018_v7 }
 0x485   : > { %v6133_v59 = vmul.f32 %v9330_v1, %v13018_v7  ;;  %v9178_v58 = vpop.f32.mrb[2].mxu1 }
 0x486   : > { %v13030_v57 = vadd.f32 %v13024_v26, %v6134_v6  ;;  %v9331_v28 = vadd.f32 %v9178_v58, %v12766_v3  ;;  %v5944_v25 = vpop.f32.mrb[3].mxu1 }
 0x487   : > { %v13034_v52 = vadd.f32 %v13024_v26, %v6133_v59  ;;  %v9332_v31 = vadd.f32 %v5944_v25, %v12768_v34 }
 0x488   : > { %v8017_v37 = vmul.f32 -1.442695, %v13030_v57  ;;  %v6136_v12 = vmul.f32 %v9331_v28, %v13018_v7 }
 0x489   : > { %v8016_v17 = vmul.f32 -1.442695, %v13034_v52  ;;  %v6135_v56 = vmul.f32 %v9332_v31, %v13018_v7  ;;  %v9181_v62 = vpop.f32.mrb[4].mxu1 }
 0x48a   : > { %10043 = vpow2.f32 %v8017_v37  ;;  %v13042_v43 = vadd.f32 %v13024_v26, %v6136_v12  ;;  %v9333_v3 = vadd.f32 %v9181_v62, %v12774_v30  ;;  %v5954_v48 = vpop.f32.mrb[5].mxu1 }
 0x48b   : > { %10045 = vpow2.f32 %v8016_v17  ;;  %v13046_v20 = vadd.f32 %v13024_v26, %v6135_v56  ;;  %v9334_v34 = vadd.f32 %v5954_v48, %v12776_v13 }
 0x48c   : > { %v8019_v14 = vmul.f32 -1.442695, %v13042_v43  ;;  %v6138_v46 = vmul.f32 %v9333_v3, %v13018_v7 }
 0x48d   : > { %v8018_v19 = vmul.f32 -1.442695, %v13046_v20  ;;  %v6137_v42 = vmul.f32 %v9334_v34, %v13018_v7  ;;  %v9184_v24 = vpop.f32.mrb[6].mxu1 }
 0x48e   : > { %10047 = vpow2.f32 %v8019_v14  ;;  %v13054_v50 = vadd.f32 %v13024_v26, %v6138_v46  ;;  %v9335_v30 = vadd.f32 %v9184_v24, %v12782_v23  ;;  %v5964_v54 = vpop.f32.mrb[7].mxu1 }
 0x48f   : > { %10049 = vpow2.f32 %v8018_v19  ;;  %v13058_v60 = vadd.f32 %v13024_v26, %v6137_v42  ;;  %v9336_v13 = vadd.f32 %v5964_v54, %v12784_v8 }
 0x490   : > { %v8021_v38 = vmul.f32 -1.442695, %v13054_v50  ;;  %v6140_v44 = vmul.f32 %v9335_v30, %v13018_v7 }
 0x491   : > { %v8020_v2 = vmul.f32 -1.442695, %v13058_v60  ;;  %v6139_v63 = vmul.f32 %v9336_v13, %v13018_v7  ;;  %v9187_v5 = vpop.f32.mrb[8].mxu1 }
 0x492   : > { %10051 = vpow2.f32 %v8021_v38  ;;  %v13066_v45 = vadd.f32 %v13024_v26, %v6140_v44  ;;  %v9337_v23 = vadd.f32 %v9187_v5, %v12790_v9  ;;  %v5974_v47 = vpop.f32.mrb[9].mxu1 }
 0x493   : > { %10053 = vpow2.f32 %v8020_v2  ;;  %v13070_v1 = vadd.f32 %v13024_v26, %v6139_v63  ;;  %v9338_v8 = vadd.f32 %v5974_v47, %v12792_v32 }
 0x494   : > { %v10044_v6 = vpop.eup %10043  ;;  %v8023_v59 = vmul.f32 -1.442695, %v13066_v45  ;;  %v6142_v58 = vmul.f32 %v9337_v23, %v13018_v7 }
 0x495   : > { %v10046_v28 = vpop.eup %10045  ;;  %v6300_v25 = vadd.f32 1.0, %v10044_v6  ;;  %v8022_v31 = vmul.f32 -1.442695, %v13070_v1  ;;  %v6141_v37 = vmul.f32 %v9338_v8, %v13018_v7  ;;  %v9190_v12 = vpop.f32.mrb[10].mxu1 }
 0x496   : > { %v6299_v9 = vadd.f32 1.0, %v10046_v28  ;;  %10055 = vpow2.f32 %v8023_v59  ;;  %v13078_v17 = vadd.f32 %v13024_v26, %v6142_v58  ;;  %v9339_v56 = vadd.f32 %v9190_v12, %v12798_v35  ;;  %v5984_v32 = vpop.f32.mrb[11].mxu1 }
 0x497   : > { %10057 = vrcp.f32 %v6300_v25  ;;  %v13082_v62 = vadd.f32 %v13024_v26, %v6141_v37  ;;  %v9340_v3 = vadd.f32 %v5984_v32, %v12800_v51 }
 0x498   : > { %v10048_v48 = vpop.eup %10047  ;;  %10059 = vrcp.f32 %v6299_v9  ;;  %v8025_v34 = vmul.f32 -1.442695, %v13078_v17  ;;  %v6144_v14 = vmul.f32 %v9339_v56, %v13018_v7 }
 0x499   : > { %v10050_v46 = vpop.eup %10049  ;;  %v6302_v19 = vadd.f32 1.0, %v10048_v48  ;;  %10061 = vpow2.f32 %v8022_v31  ;;  %v8024_v42 = vmul.f32 -1.442695, %v13082_v62  ;;  %v6143_v35 = vmul.f32 %v9340_v3, %v13018_v7  ;;  %v9193_v24 = vpop.f32.mrb[12].mxu1 }
 0x49a   : > { %v6301_v30 = vadd.f32 1.0, %v10050_v46  ;;  %10063 = vpow2.f32 %v8025_v34  ;;  %v13090_v54 = vadd.f32 %v13024_v26, %v6144_v14  ;;  %v9341_v51 = vadd.f32 %v9193_v24, %v12806_v15  ;;  %v5994_v13 = vpop.f32.mrb[13].mxu1 }
 0x49b   : > { %10065 = vrcp.f32 %v6302_v19  ;;  %v13094_v38 = vadd.f32 %v13024_v26, %v6143_v35  ;;  %v9342_v44 = vadd.f32 %v5994_v13, %v12808_v55 }
 0x49c   : > { %v10052_v2 = vpop.eup %10051  ;;  %10067 = vrcp.f32 %v6301_v30  ;;  %v8027_v63 = vmul.f32 -1.442695, %v13090_v54  ;;  %v6146_v5 = vmul.f32 %v9341_v51, %v13018_v7 }
 0x49d   : > { %v10054_v23 = vpop.eup %10053  ;;  %v6304_v47 = vadd.f32 1.0, %v10052_v2  ;;  %10069 = vpow2.f32 %v8024_v42  ;;  %v8026_v8 = vmul.f32 -1.442695, %v13094_v38  ;;  %v6145_v15 = vmul.f32 %v9342_v44, %v13018_v7  ;;  %v9196_v6 = vpop.f32.mrb[14].mxu1 }
 0x49e   : > { %v6303_v59 = vadd.f32 1.0, %v10054_v23  ;;  %10071 = vpow2.f32 %v8027_v63  ;;  %v13102_v58 = vadd.f32 %v13024_v26, %v6146_v5  ;;  %v9343_v55 = vadd.f32 %v9196_v6, %v12814_v27  ;;  %v6004_v28 = vpop.f32.mrb[15].mxu1  ;;  %v13942_v6 = vld [vmem:[#allocation12_spill] sm:$0xff] }
 0x49f   : > { %10073 = vrcp.f32 %v6304_v47  ;;  %v13106_v25 = vadd.f32 %v13024_v26, %v6145_v15  ;;  %v9344_v31 = vadd.f32 %v6004_v28, %v12816_v4  ;;  %v13941_v47 = vld [vmem:[#allocation11_spill] sm:$0xff] }
 0x4a0   : > { %v10056_v37 = vpop.eup %10055  ;;  %10075 = vrcp.f32 %v6303_v59  ;;  %v8029_v12 = vmul.f32 -1.442695, %v13102_v58  ;;  %v6148_v9 = vmul.f32 %v9343_v55, %v13018_v7 }
 0x4a1   : > { %v10058_v56 = vpop.eup %10057  ;;  %v6306_v32 = vadd.f32 1.0, %v10056_v37  ;;  %10077 = vpow2.f32 %v8026_v8  ;;  %v8028_v3 = vmul.f32 -1.442695, %v13106_v25  ;;  %v6147_v27 = vmul.f32 %v9344_v31, %v13018_v7  ;;  %v9199_v48 = vpop.f32.mrb[16].mxu1 }
 0x4a2   : > { %v10060_v34 = vpop.eup %10059  ;;  %v6396_v14 = vmul.f32 %v10058_v56, %v13030_v57  ;;  %10079 = vpow2.f32 %v8029_v12  ;;  %v13115_v4 = vadd.f32 %v13024_v26, %v6148_v9  ;;  %v9345_v46 = vadd.f32 %v9199_v48, %v12822_v49  ;;  %v6014_v19 = vpop.f32.mrb[17].mxu1 }
 0x4a3   : > { %v10062_v42 = vpop.eup %10061  ;;  %v6395_v35 = vmul.f32 %v10060_v34, %v13034_v52  ;;  %10081 = vrcp.f32 %v6306_v32  ;;  %v13120_v24 = vadd.f32 %v13024_v26, %v6147_v27  ;;  %v9346_v30 = vadd.f32 %v6014_v19, %v12824_v36 }
 0x4a4   : > { %v10064_v51 = vpop.eup %10063  ;;  %v6305_v13 = vadd.f32 1.0, %v10062_v42  ;;  %10083 = vpow2.f32 %v8028_v3  ;;  %v8031_v57 = vmul.f32 -1.442695, %v13115_v4  ;;  %v6150_v49 = vmul.f32 %v9345_v46, %v13018_v7 }
 0x4a5   : > { %v10066_v44 = vpop.eup %10065  ;;  %v6308_v2 = vadd.f32 1.0, %v10064_v51  ;;  %v8030_v63 = vmul.f32 -1.442695, %v13120_v24  ;;  %v6149_v5 = vmul.f32 %v9346_v30, %v13018_v7  ;;  %v9202_v52 = vpop.f32.mrb[18].mxu1  ;;  %v6428_v8 = vadd.f32 %v6396_v14, %v13941_v47 }
 0x4a6   : > { %v10068_v23 = vpop.eup %10067  ;;  %10085 = vrcp.f32 %v6305_v13  ;;  %v9347_v36 = vadd.f32 %v9202_v52, %v12830_v16  ;;  %v6024_v15 = vpop.f32.mrb[19].mxu1  ;;  %v6427_v59 = vadd.f32 %v6395_v35, %v13942_v6  ;;  %v6398_v28 = vmul.f32 %v10066_v44, %v13042_v43 }
 0x4a7   : > { %v10070_v55 = vpop.eup %10069  ;;  %10087 = vrcp.f32 %v6308_v2  ;;  %v13132_v31 = vadd.f32 %v13024_v26, %v6150_v49  ;;  %v13135_v37 = vadd.f32 %v13024_v26, %v6149_v5  ;;  %v9348_v16 = vadd.f32 %v6024_v15, %v12832_v11 }
 0x4a8   : > { %v10072_v12 = vpop.eup %10071  ;;  %v6307_v9 = vadd.f32 1.0, %v10070_v55  ;;  %10089 = vpow2.f32 %v8031_v57  ;;  %v6152_v56 = vmul.f32 %v9347_v36, %v13018_v7  ;;  %9273 = vmatprep.mubr.msk.f32.mxu0 %vm1788_vm1, %v6427_v59  ;;  %v6397_v14 = vmul.f32 %v10068_v23, %v13046_v20  ;;  %v13943_v23 = vld [vmem:[#allocation14_spill] sm:$0xff]  ;;  %v13944_v55 = vld [vmem:[#allocation13_spill] sm:$0xff] }
 0x4a9   : > { %v10074_v32 = vpop.eup %10073  ;;  %v6310_v3 = vadd.f32 1.0, %v10072_v12  ;;  %10091 = vpow2.f32 %v8030_v63  ;;  %v8033_v43 = vmul.f32 -1.442695, %v13132_v31  ;;  %v8032_v27 = vmul.f32 -1.442695, %v13135_v37  ;;  %9274 = vmatmul.mubr.msk.f32.vlgmr.msra.gmra.mrb[128].mxu0 %vm1788_vm1, %v6428_v8  ;;  %v9205_v48 = vpop.f32.mrb[20].mxu1 }
 0x4aa   : > { %v10076_v34 = vpop.eup %10075  ;;  %10093 = vrcp.f32 %v6307_v9  ;;  %v13145_v46 = vadd.f32 %v13024_v26, %v6152_v56  ;;  %v6151_v11 = vmul.f32 %v9348_v16, %v13018_v7  ;;  %v6034_v19 = vpop.f32.mrb[21].mxu1  ;;  %v6400_v35 = vmul.f32 %v10074_v32, %v13054_v50 }
 0x4ab   : > { %v10078_v42 = vpop.eup %10077  ;;  %10095 = vrcp.f32 %v6310_v3  ;;  %v9349_v30 = vadd.f32 %v9205_v48, %v12838_v10  ;;  %v9350_v51 = vadd.f32 %v6034_v19, %v12840_v61  ;;  %v6399_v10 = vmul.f32 %v10076_v34, %v13058_v60  ;;  %v13946_v19 = vld [vmem:[#allocation15_spill] sm:$0xff] }
 0x4ac   : > { %v10080_v13 = vpop.eup %10079  ;;  %v6309_v57 = vadd.f32 1.0, %v10078_v42  ;;  %10097 = vpow2.f32 %v8033_v43  ;;  %v8035_v20 = vmul.f32 -1.442695, %v13145_v46  ;;  %v13153_v44 = vadd.f32 %v13024_v26, %v6151_v11 }
 0x4ad   : > { %v10082_v2 = vpop.eup %10081  ;;  %v6312_v63 = vadd.f32 1.0, %v10080_v13  ;;  %10099 = vpow2.f32 %v8032_v27  ;;  %v6154_v49 = vmul.f32 %v9349_v30, %v13018_v7  ;;  %v6153_v50 = vmul.f32 %v9350_v51, %v13018_v7  ;;  %v9208_v5 = vpop.f32.mrb[22].mxu1 }
 0x4ae   : > { %v10084_v52 = vpop.eup %10083  ;;  %10101 = vrcp.f32 %v6309_v57  ;;  %v8034_v61 = vmul.f32 -1.442695, %v13153_v44  ;;  %v6429_v47 = vadd.f32 %v6397_v14, %v13943_v23  ;;  %v6044_v8 = vpop.f32.mrb[23].mxu1  ;;  %v6430_v60 = vadd.f32 %v6398_v28, %v13944_v55 }
 0x4af   : > { %10103 = vrcp.f32 %v6312_v63  ;;  %v6311_v36 = vadd.f32 1.0, %v10084_v52  ;;  %v13161_v15 = vadd.f32 %v13024_v26, %v6154_v49  ;;  %v13164_v6 = vadd.f32 %v13024_v26, %v6153_v50 }
 0x4b0   : > { %v10086_v59 = vpop.eup %10085  ;;  %10105 = vpow2.f32 %v8035_v20  ;;  %9276 = vmatprep.mubr.msk.f32.mxu0 %vm1788_vm1, %v6429_v47  ;;  %v9351_v12 = vadd.f32 %v9208_v5, %v12847_v39  ;;  %v9352_v9 = vadd.f32 %v6044_v8, %v12849_v33  ;;  %v6402_v16 = vmul.f32 %v10082_v2, %v13066_v45  ;;  %v13945_v45 = vld [vmem:[#allocation16_spill] sm:$0xff]  ;;  %v13947_v47 = vld [vmem:[#allocation17_spill] sm:$0xff] }
 0x4b1   : > { %v10088_v56 = vpop.eup %10087  ;;  %10107 = vrcp.f32 %v6311_v36  ;;  %v8037_v32 = vmul.f32 -1.442695, %v13161_v15  ;;  %v8036_v3 = vmul.f32 -1.442695, %v13164_v6  ;;  %v9211_v43 = vpop.f32.mrb[24].mxu1  ;;  %v6401_v48 = vmul.f32 %v10086_v59, %v13070_v1  ;;  %9277 = vmatmul.mubr.msk.f32.gmra.mrb[130].mxu0 %vm1788_vm1, %v6430_v60 }
 0x4b2   : > { %v10090_v27 = vpop.eup %10089  ;;  %10109 = vpow2.f32 %v8034_v61  ;;  %v6156_v28 = vmul.f32 %v9351_v12, %v13018_v7  ;;  %v6155_v39 = vmul.f32 %v9352_v9, %v13018_v7  ;;  %v6054_v33 = vpop.f32.mrb[25].mxu1  ;;  %v6431_v11 = vadd.f32 %v6399_v10, %v13945_v45  ;;  %v13949_v45 = vld [vmem:[#allocation19_spill] sm:$0xff] }
 0x4b3   : > { %v10092_v34 = vpop.eup %10091  ;;  %v6314_v14 = vadd.f32 1.0, %v10090_v27  ;;  %10111 = vpow2.f32 %v8037_v32  ;;  %v6432_v42 = vadd.f32 %v6400_v35, %v13946_v19  ;;  %v9353_v20 = vadd.f32 %v9211_v43, %v12856_v53 }
 0x4b4   : > { %v10094_v30 = vpop.eup %10093  ;;  %v6313_v51 = vadd.f32 1.0, %v10092_v34  ;;  %10113 = vpow2.f32 %v8036_v3  ;;  %v13180_v1 = vadd.f32 %v13024_v26, %v6156_v28  ;;  %v13183_v13 = vadd.f32 %v13024_v26, %v6155_v39  ;;  %9279 = vmatprep.mubr.msk.f32.mxu0 %vm1788_vm1, %v6431_v11 }
 0x4b5   : > { %v10096_v57 = vpop.eup %10095  ;;  %10115 = vrcp.f32 %v6314_v14  ;;  %v9354_v2 = vadd.f32 %v6054_v33, %v12858_v29  ;;  %v9214_v63 = vpop.f32.mrb[26].mxu1  ;;  %v6403_v35 = vmul.f32 %v10094_v30, %v13082_v62  ;;  %9280 = vmatmul.mubr.msk.f32.gmra.mrb[132].mxu0 %vm1788_vm1, %v6432_v42  ;;  %v6158_v23 = vmul.f32 %v9353_v20, %v13018_v7  ;;  %v13948_v62 = vld [vmem:[#allocation18_spill] sm:$0xff]  ;;  %v13950_v42 = vld [vmem:[#allocation20_spill] sm:$0xff] }
 0x4b6   : > { %v10098_v49 = vpop.eup %10097  ;;  %10117 = vrcp.f32 %v6313_v51  ;;  %v8039_v50 = vmul.f32 -1.442695, %v13180_v1  ;;  %v8038_v5 = vmul.f32 -1.442695, %v13183_v13  ;;  %v6064_v52 = vpop.f32.mrb[27].mxu1  ;;  %v6433_v29 = vadd.f32 %v6401_v48, %v13947_v47 }
 0x4b7   : > { %v10100_v10 = vpop.eup %10099  ;;  %v6316_v61 = vadd.f32 1.0, %v10098_v49  ;;  %v6157_v53 = vmul.f32 %v9354_v2, %v13018_v7  ;;  %v6434_v59 = vadd.f32 %v6402_v16, %v13948_v62  ;;  %v9355_v55 = vadd.f32 %v9214_v63, %v12863_v0 }
 0x4b8   : > { %v10102_v8 = vpop.eup %10101  ;;  %v6315_v36 = vadd.f32 1.0, %v10100_v10  ;;  %10119 = vpow2.f32 %v8039_v50  ;;  %v6404_v12 = vmul.f32 %v10088_v56, %v13078_v17  ;;  %v13199_v9 = vadd.f32 %v13024_v26, %v6158_v23  ;;  %9282 = vmatprep.mubr.msk.f32.mxu0 %vm1788_vm1, %v6433_v29  ;;  %v13951_v23 = vld [vmem:[#allocation21_spill] sm:$0xff] }
 0x4b9   : > { %v10104_v60 = vpop.eup %10103  ;;  %10121 = vrcp.f32 %v6316_v61  ;;  %v13202_v32 = vadd.f32 %v13024_v26, %v6157_v53  ;;  %v9217_v3 = vpop.f32.mrb[28].mxu1  ;;  %v6406_v27 = vmul.f32 %v10096_v57, %v13090_v54  ;;  %9283 = vmatmul.mubr.msk.f32.gmra.mrb[134].mxu0 %vm1788_vm1, %v6434_v59  ;;  %v6160_v0 = vmul.f32 %v9355_v55, %v13018_v7 }
 0x4ba   : > { %v10106_v43 = vpop.eup %10105  ;;  %10123 = vrcp.f32 %v6315_v36  ;;  %v9356_v17 = vadd.f32 %v6064_v52, %v12865_v41  ;;  %v6074_v56 = vpop.f32.mrb[29].mxu1  ;;  %v6405_v48 = vmul.f32 %v10102_v8, %v13094_v38  ;;  %v8041_v39 = vmul.f32 -1.442695, %v13199_v9 }
 0x4bb   : > { %v10108_v16 = vpop.eup %10107  ;;  %v6318_v28 = vadd.f32 1.0, %v10106_v43  ;;  %10125 = vpow2.f32 %v8038_v5  ;;  %v8040_v34 = vmul.f32 -1.442695, %v13202_v32  ;;  %v13213_v54 = vadd.f32 %v13024_v26, %v6160_v0 }
 0x4bc   : > { %v10110_v33 = vpop.eup %10109  ;;  %v6159_v14 = vmul.f32 %v9356_v17, %v13018_v7  ;;  %v6435_v11 = vadd.f32 %v6403_v35, %v13949_v45  ;;  %v6436_v30 = vadd.f32 %v6404_v12, %v13950_v42  ;;  %v9357_v38 = vadd.f32 %v9217_v3, %v12869_v18  ;;  %v13953_v17 = vld [vmem:[#allocation23_spill] sm:$0xff] }
 0x4bd   : > { %v10112_v19 = vpop.eup %10111  ;;  %10127 = vrcp.f32 %v6318_v28  ;;  %v6317_v41 = vadd.f32 1.0, %v10110_v33  ;;  %v9220_v51 = vpop.f32.mrb[30].mxu1  ;;  %v8043_v2 = vmul.f32 -1.442695, %v13213_v54  ;;  %v9358_v18 = vadd.f32 %v6074_v56, %v12871_v21  ;;  %v13952_v21 = vld [vmem:[#allocation22_spill] sm:$0xff] }
 0x4be   : > { %v10114_v57 = vpop.eup %10113  ;;  %v6320_v20 = vadd.f32 1.0, %v10112_v19  ;;  %10129 = vpow2.f32 %v8041_v39  ;;  %v13221_v63 = vadd.f32 %v13024_v26, %v6159_v14  ;;  %9285 = vmatprep.mubr.msk.f32.mxu0 %vm1788_vm1, %v6435_v11  ;;  %v6084_v49 = vpop.f32.mrb[31].mxu1  ;;  %v6162_v5 = vmul.f32 %v9357_v38, %v13018_v7 }
 0x4bf   : > { %v10116_v35 = vpop.eup %10115  ;;  %10131 = vrcp.f32 %v6317_v41  ;;  %v6319_v50 = vadd.f32 1.0, %v10114_v57  ;;  %9286 = vmatmul.mubr.msk.f32.gmra.mrb[136].mxu0 %vm1788_vm1, %v6436_v30  ;;  %v6408_v10 = vmul.f32 %v10104_v60, %v13102_v58  ;;  %v6437_v53 = vadd.f32 %v6405_v48, %v13951_v23  ;;  %v13956_v30 = vld [vmem:[#allocation27_spill] sm:$0xff]  ;;  %v13959_v23 = vld [vmem:[#allocation28_spill] sm:$0xff] }
 0x4c0   : > { %v10118_v52 = vpop.eup %10117  ;;  %10133 = vrcp.f32 %v6320_v20  ;;  %v8042_v61 = vmul.f32 -1.442695, %v13221_v63  ;;  %v6407_v47 = vmul.f32 %v10108_v16, %v13106_v25  ;;  %v13232_v29 = vadd.f32 %v13024_v26, %v6162_v5  ;;  %v13957_v20 = vld [vmem:[#allocation25_spill] sm:$0xff] }
 0x4c1   : > { %10135 = vrcp.f32 %v6319_v50  ;;  %v6161_v8 = vmul.f32 %v9358_v18, %v13018_v7  ;;  %9288 = vmatprep.mubr.msk.f32.mxu0 %vm1788_vm1, %v6437_v53  ;;  %v6438_v62 = vadd.f32 %v6406_v27, %v13952_v21  ;;  %v9359_v58 = vadd.f32 %v9220_v51, %v12875_v40 }
 0x4c2   : > { %v10120_v36 = vpop.eup %10119  ;;  %10137 = vpow2.f32 %v8040_v34  ;;  %v9360_v59 = vadd.f32 %v6084_v49, %v12877_v22  ;;  %v6409_v60 = vmul.f32 %v10118_v52, %v13120_v24  ;;  %v8045_v25 = vmul.f32 -1.442695, %v13232_v29  ;;  %v13955_v34 = vld [vmem:[#allocation26_spill] sm:$0xff]  ;;  %v13958_v52 = vld [vmem:[#allocation29_spill] sm:$0xff] }
 0x4c3   : > { %v10122_v55 = vpop.eup %10121  ;;  %10139 = vpow2.f32 %v8043_v2  ;;  %v13242_v12 = vadd.f32 %v13024_v26, %v6161_v8  ;;  %9289 = vmatmul.mubr.msk.f32.gmra.mrb[138].mxu0 %vm1788_vm1, %v6438_v62  ;;  %v6164_v43 = vmul.f32 %v9359_v58, %v13018_v7  ;;  %v6322_v0 = vadd.f32 1.0, %v10120_v36  ;;  %v13960_v62 = vld [vmem:[#allocation32_spill] sm:$0xff] }
 0x4c4   : > { %v10124_v3 = vpop.eup %10123  ;;  %10141 = vpow2.f32 %v8042_v61  ;;  %v6163_v27 = vmul.f32 %v9360_v59, %v13018_v7  ;;  %v6439_v56 = vadd.f32 %v6407_v47, %v13953_v17  ;;  %v6410_v33 = vmul.f32 %v10116_v35, %v13115_v4  ;;  %v13954_v7 = vld [vmem:[#allocation24_spill] sm:$0xff]  ;;  %v13963_v17 = vld [vmem:[#allocation34_spill] sm:$0xff] }
 0x4c5   : > { %v10126_v40 = vpop.eup %10125  ;;  %v6411_v22 = vmul.f32 %v10124_v3, %v13135_v37  ;;  %v8044_v24 = vmul.f32 -1.442695, %v13242_v12  ;;  %10143 = vpow2.f32 %v8045_v25  ;;  %v13251_v48 = vadd.f32 %v13024_v26, %v6164_v43 }
 0x4c6   : > { %v6321_v16 = vadd.f32 1.0, %v10126_v40  ;;  %v13254_v28 = vadd.f32 %v13024_v26, %v6163_v27  ;;  %9291 = vmatprep.mubr.msk.f32.mxu0 %vm1788_vm1, %v6439_v56  ;;  %v6440_v37 = vadd.f32 %v6408_v10, %v13954_v7  ;;  %v6441_v14 = vadd.f32 %v6409_v60, %v13955_v34  ;;  %v13961_v60 = vld [vmem:[#allocation30_spill] sm:$0xff]  ;;  %v13962_v40 = vld [vmem:[#allocation36_spill] sm:$0xff] }
 0x4c7   : > { %v10128_v39 = vpop.eup %10127  ;;  %10145 = vpow2.f32 %v8044_v24  ;;  %v8047_v11 = vmul.f32 -1.442695, %v13251_v48  ;;  %v6443_v38 = vadd.f32 %v6411_v22, %v13956_v30  ;;  %v6412_v57 = vmul.f32 %v10122_v55, %v13132_v31  ;;  %v13964_v7 = vld [vmem:[#allocation38_spill] sm:$0xff] }
 0x4c8   : > { %v10130_v45 = vpop.eup %10129  ;;  %10147 = vrcp.f32 %v6321_v16  ;;  %v8046_v19 = vmul.f32 -1.442695, %v13254_v28  ;;  %9292 = vmatmul.mubr.msk.f32.gmra.mrb[140].mxu0 %vm1788_vm1, %v6440_v37  ;;  %v6442_v2 = vadd.f32 %v6410_v33, %v13957_v20  ;;  %v6414_v61 = vmul.f32 %v10128_v39, %v13145_v46 }
 0x4c9   : > { %v10132_v41 = vpop.eup %10131  ;;  %10149 = vrcp.f32 %v6322_v0  ;;  %v6324_v42 = vadd.f32 1.0, %v10130_v45  ;;  %9294 = vmatprep.mubr.msk.f32.mxu0 %vm1788_vm1, %v6441_v14  ;;  %v6444_v53 = vadd.f32 %v6412_v57, %v13959_v23  ;;  %v13965_v14 = vld [vmem:[#allocation40_spill] sm:$0xff]  ;;  %v13969_v57 = vld [vmem:[#allocation46_spill] sm:$0xff] }
 0x4ca   : > { %v10134_v26 = vpop.eup %10133  ;;  %v6413_v4 = vmul.f32 %v10132_v41, %v13153_v44  ;;  %10151 = vpow2.f32 %v8047_v11  ;;  %v6446_v25 = vadd.f32 %v6414_v61, %v13961_v60 }
 0x4cb   : > { %v10136_v51 = vpop.eup %10135  ;;  %10153 = vpow2.f32 %v8046_v19  ;;  %v6416_v46 = vmul.f32 %v10134_v26, %v13161_v15  ;;  %v13966_v19 = vld [vmem:[#allocation45_spill] sm:$0xff] }
 0x4cc   : > { %v10138_v49 = vpop.eup %10137  ;;  %9295 = vmatmul.mubr.msk.f32.gmra.mrb[142].mxu0 %vm1788_vm1, %v6442_v2  ;;  %v6415_v44 = vmul.f32 %v10136_v51, %v13164_v6  ;;  %10155 = vrcp.f32 %v6324_v42  ;;  %v6445_v10 = vadd.f32 %v6413_v4, %v13958_v52  ;;  %v13967_v4 = vld [vmem:[#allocation42_spill] sm:$0xff] }
 0x4cd   : > { %v10140_v35 = vpop.eup %10139  ;;  %v6323_v50 = vadd.f32 1.0, %v10138_v49  ;;  %9297 = vmatprep.mubr.msk.f32.mxu0 %vm1788_vm1, %v6443_v38  ;;  %v6448_v15 = vadd.f32 %v6416_v46, %v13963_v17 }
 0x4ce   : > { %v10142_v5 = vpop.eup %10141  ;;  %v6326_v18 = vadd.f32 1.0, %v10140_v35  ;;  %v6447_v58 = vadd.f32 %v6415_v44, %v13960_v62 }
 0x4cf   : > { %10157 = vrcp.f32 %v6323_v50  ;;  %v6325_v31 = vadd.f32 1.0, %v10142_v5  ;;  %v10144_v47 = vpop.eup %10143  ;;  %v13971_v50 = vld [vmem:[#allocation50_spill] sm:$0xff] }
 0x4d0   : > { %9298 = vmatmul.mubr.msk.f32.gmra.mrb[144].mxu0 %vm1788_vm1, %v6444_v53  ;;  %v6328_v6 = vadd.f32 1.0, %v10144_v47 }
 0x4d1   : > { %v10146_v8 = vpop.eup %10145  ;;  %10159 = vrcp.f32 %v6325_v31  ;;  %9300 = vmatprep.mubr.msk.f32.mxu0 %vm1788_vm1, %v6445_v10 }
 0x4d2   : > { %v10148_v36 = vpop.eup %10147  ;;  %10161 = vrcp.f32 %v6326_v18  ;;  %v6327_v21 = vadd.f32 1.0, %v10146_v8 }
 0x4d3   : > { %v10150_v59 = vpop.eup %10149  ;;  %v6417_v55 = vmul.f32 %v10148_v36, %v13183_v13 }
 0x4d4   : > { %v10152_v3 = vpop.eup %10151  ;;  %10163 = vrcp.f32 %v6327_v21  ;;  %9301 = vmatmul.mubr.msk.f32.gmra.mrb[146].mxu0 %vm1788_vm1, %v6446_v25  ;;  %v6418_v0 = vmul.f32 %v10150_v59, %v13180_v1 }
 0x4d5   : > { %v10154_v43 = vpop.eup %10153  ;;  %10165 = vrcp.f32 %v6328_v6  ;;  %v6330_v27 = vadd.f32 1.0, %v10152_v3  ;;  %9303 = vmatprep.mubr.msk.f32.mxu0 %vm1788_vm1, %v6447_v58  ;;  %v6449_v22 = vadd.f32 %v6417_v55, %v13962_v40 }
 0x4d6   : > { %v6329_v24 = vadd.f32 1.0, %v10154_v43  ;;  %v10156_v56 = vpop.eup %10155  ;;  %v6450_v37 = vadd.f32 %v6418_v0, %v13964_v7 }
 0x4d7   : > { %v6420_v33 = vmul.f32 %v10156_v56, %v13199_v9 }
 0x4d8   : > { %10167 = vrcp.f32 %v6329_v24  ;;  %9304 = vmatmul.mubr.msk.f32.gmra.mrb[148].mxu0 %vm1788_vm1, %v6448_v15 }
 0x4d9   : > { %v10158_v13 = vpop.eup %10157  ;;  %10169 = vrcp.f32 %v6330_v27  ;;  %9306 = vmatprep.mubr.msk.f32.mxu0 %vm1788_vm1, %v6449_v22  ;;  %v6452_v9 = vadd.f32 %v6420_v33, %v13967_v4 }
 0x4da   : > { %v6419_v16 = vmul.f32 %v10158_v13, %v13202_v32 }
 0x4db   : > { %v10160_v39 = vpop.eup %10159 }
 0x4dc   : > { %v10162_v34 = vpop.eup %10161  ;;  %v6421_v1 = vmul.f32 %v10160_v39, %v13221_v63  ;;  %v6451_v45 = vadd.f32 %v6419_v16, %v13965_v14  ;;  %9307 = vmatmul.mubr.msk.f32.gmra.mrb[150].mxu0 %vm1788_vm1, %v6450_v37  ;;  %v13968_v63 = vld [vmem:[#allocation49_spill] sm:$0xff] }
 0x4dd   : > { %v6422_v41 = vmul.f32 %v10162_v34, %v13213_v54  ;;  %v13970_v54 = vld [vmem:[#allocation53_spill] sm:$0xff] }
 0x4de   : > { %v10164_v11 = vpop.eup %10163  ;;  %9309 = vmatprep.mubr.msk.f32.mxu0 %vm1788_vm1, %v6451_v45  ;;  %v6453_v32 = vadd.f32 %v6421_v1, %v13966_v19 }
 0x4df   : > { %v6423_v26 = vmul.f32 %v10164_v11, %v13242_v12  ;;  %v10166_v42 = vpop.eup %10165  ;;  %v6454_v20 = vadd.f32 %v6422_v41, %v13969_v57 }
 0x4e0   : > { %9310 = vmatmul.mubr.msk.f32.gmra.mrb[152].mxu0 %vm1788_vm1, %v6452_v9  ;;  %v6424_v51 = vmul.f32 %v10166_v42, %v13232_v29  ;;  %v13972_v29 = vld [vmem:[#allocation54_spill] sm:$0xff] }
 0x4e1   : > { %9312 = vmatprep.mubr.msk.f32.mxu0 %vm1788_vm1, %v6453_v32  ;;  %v6455_v30 = vadd.f32 %v6423_v26, %v13968_v63 }
 0x4e2   : > { %v10168_v38 = vpop.eup %10167  ;;  %v6456_v5 = vadd.f32 %v6424_v51, %v13971_v50 }
 0x4e3   : > { %v10170_v2 = vpop.eup %10169  ;;  %v6425_v49 = vmul.f32 %v10168_v38, %v13254_v28  ;;  %v13316_v28 = vld [vmem:[%s13651_s15] ss:$0 sm:$0xff] }
 0x4e4   : > { %9313 = vmatmul.mubr.msk.f32.gmra.mrb[154].mxu0 %vm1788_vm1, %v6454_v20  ;;  %v6426_v35 = vmul.f32 %v10170_v2, %v13251_v48  ;;  %v13321_v48 = vld [vmem:[%s13652_s16] ss:$0 sm:$0xff] }
 0x4e5   : > { %9315 = vmatprep.mubr.msk.f32.mxu0 %vm1788_vm1, %v6455_v30  ;;  %v6457_v12 = vadd.f32 %v6425_v49, %v13970_v54 }
 0x4e6   : > { %v6458_v44 = vadd.f32 %v6426_v35, %v13972_v29 }
 0x4e8   : > { %9316 = vmatmul.mubr.msk.f32.gmra.mrb[156].mxu0 %vm1788_vm1, %v6456_v5 }
 0x4e9   : > { %9318 = vmatprep.mubr.msk.f32.mxu0 %vm1788_vm1, %v6457_v12 }
 0x4ec   : > { %9319 = vmatmul.mubr.msk.f32.gmra.mrb[158].mxu0 %vm1788_vm1, %v6458_v44 }
 0x57c   : > { %v9275_v18 = vpop.f32.mrb[128].mxu0 }
 0x57d   : > { %v7112_v52 = vmul.f32 %v9275_v18, %v13316_v28  ;;  %v6944_v10 = vpop.f32.mrb[129].mxu0 }
 0x57e   : > { %v7111_v61 = vmul.f32 %v13316_v28, %v6944_v10 }
 0x57f   : > { %v13326_v31 = vadd.f32 %v13321_v48, %v7112_v52 }
 0x580   : > { %v13329_v23 = vadd.f32 %v13321_v48, %v7111_v61 }
 0x581   : > { %v8115_v53 = vmul.f32 -1.442695, %v13326_v31 }
 0x582   : > { %v8114_v47 = vmul.f32 -1.442695, %v13329_v23 }
 0x583   : > { %10171 = vpow2.f32 %v8115_v53 }
 0x584   : > { %10173 = vpow2.f32 %v8114_v47  ;;  %v9278_v8 = vpop.f32.mrb[130].mxu0 }
 0x585   : > { %v7114_v36 = vmul.f32 %v9278_v8, %v13316_v28  ;;  %v6954_v6 = vpop.f32.mrb[131].mxu0 }
 0x586   : > { %v7113_v21 = vmul.f32 %v13316_v28, %v6954_v6 }
 0x587   : > { %v13336_v62 = vadd.f32 %v13321_v48, %v7114_v36 }
 0x588   : > { %v13339_v58 = vadd.f32 %v13321_v48, %v7113_v21  ;;  %v9281_v59 = vpop.f32.mrb[132].mxu0 }
 0x589   : > { %v8117_v46 = vmul.f32 -1.442695, %v13336_v62  ;;  %v7116_v55 = vmul.f32 %v9281_v59, %v13316_v28  ;;  %v6964_v60 = vpop.f32.mrb[133].mxu0 }
 0x58a   : > { %v8116_v25 = vmul.f32 -1.442695, %v13339_v58  ;;  %v7115_v3 = vmul.f32 %v13316_v28, %v6964_v60 }
 0x58b   : > { %10175 = vpow2.f32 %v8117_v46  ;;  %v13346_v43 = vadd.f32 %v13321_v48, %v7116_v55 }
 0x58c   : > { %10177 = vpow2.f32 %v8116_v25  ;;  %v13349_v40 = vadd.f32 %v13321_v48, %v7115_v3  ;;  %v9284_v22 = vpop.f32.mrb[134].mxu0 }
 0x58d   : > { %v10172_v27 = vpop.eup %10171  ;;  %v8119_v17 = vmul.f32 -1.442695, %v13346_v43  ;;  %v7118_v15 = vmul.f32 %v9284_v22, %v13316_v28  ;;  %v6974_v56 = vpop.f32.mrb[135].mxu0 }
 0x58e   : > { %v10174_v0 = vpop.eup %10173  ;;  %v7278_v24 = vadd.f32 1.0, %v10172_v27  ;;  %v8118_v16 = vmul.f32 -1.442695, %v13349_v40  ;;  %v7117_v39 = vmul.f32 %v13316_v28, %v6974_v56 }
 0x58f   : > { %v7277_v13 = vadd.f32 1.0, %v10174_v0  ;;  %v13356_v33 = vadd.f32 %v13321_v48, %v7118_v15 }
 0x590   : > { %10179 = vrcp.f32 %v7278_v24  ;;  %v13359_v7 = vadd.f32 %v13321_v48, %v7117_v39 }
 0x591   : > { %10181 = vrcp.f32 %v7277_v13  ;;  %v8121_v37 = vmul.f32 -1.442695, %v13356_v33 }
 0x592   : > { %10183 = vpow2.f32 %v8119_v17  ;;  %v9287_v34 = vpop.f32.mrb[136].mxu0  ;;  %v8120_v1 = vmul.f32 -1.442695, %v13359_v7 }
 0x593   : > { %10185 = vpow2.f32 %v8118_v16  ;;  %v7120_v14 = vmul.f32 %v9287_v34, %v13316_v28  ;;  %v6984_v45 = vpop.f32.mrb[137].mxu0 }
 0x594   : > { %10187 = vpow2.f32 %v8121_v37  ;;  %v7119_v11 = vmul.f32 %v13316_v28, %v6984_v45 }
 0x595   : > { %10189 = vpow2.f32 %v8120_v1  ;;  %v13367_v19 = vadd.f32 %v13321_v48, %v7120_v14  ;;  %v10176_v32 = vpop.eup %10175 }
 0x596   : > { %v13370_v41 = vadd.f32 %v13321_v48, %v7119_v11  ;;  %v10178_v26 = vpop.eup %10177  ;;  %v7280_v4 = vadd.f32 1.0, %v10176_v32  ;;  %v9290_v42 = vpop.f32.mrb[138].mxu0 }
 0x597   : > { %v8123_v9 = vmul.f32 -1.442695, %v13367_v19  ;;  %v7279_v63 = vadd.f32 1.0, %v10178_v26  ;;  %v7122_v38 = vmul.f32 %v9290_v42, %v13316_v28  ;;  %v6994_v51 = vpop.f32.mrb[139].mxu0 }
 0x598   : > { %v8122_v30 = vmul.f32 -1.442695, %v13370_v41  ;;  %10191 = vrcp.f32 %v7280_v4  ;;  %v7121_v57 = vmul.f32 %v13316_v28, %v6994_v51 }
 0x599   : > { %10193 = vrcp.f32 %v7279_v63  ;;  %v13379_v2 = vadd.f32 %v13321_v48, %v7122_v38 }
 0x59a   : > { %v10180_v20 = vpop.eup %10179  ;;  %10195 = vpow2.f32 %v8123_v9  ;;  %v13383_v12 = vadd.f32 %v13321_v48, %v7121_v57 }
 0x59b   : > { %v10182_v49 = vpop.eup %10181  ;;  %v7374_v54 = vmul.f32 %v10180_v20, %v13326_v31  ;;  %10197 = vpow2.f32 %v8122_v30  ;;  %v8125_v5 = vmul.f32 -1.442695, %v13379_v2  ;;  %v9293_v29 = vpop.f32.mrb[140].mxu0 }
 0x59c   : > { %v10184_v35 = vpop.eup %10183  ;;  %v7373_v50 = vmul.f32 %v10182_v49, %v13329_v23  ;;  %v7124_v52 = vmul.f32 %v9293_v29, %v13316_v28  ;;  %v7004_v10 = vpop.f32.mrb[141].mxu0  ;;  %v8124_v8 = vmul.f32 -1.442695, %v13383_v12 }
 0x59d   : > { %v10186_v44 = vpop.eup %10185  ;;  %7406 = vst.msk [vmem:[%s13387_s22 + $0x8] sm:$0xff] %vm635_vm0, %v7374_v54  ;;  %v7282_v18 = vadd.f32 1.0, %v10184_v35  ;;  %10199 = vpow2.f32 %v8125_v5  ;;  %v7123_v23 = vmul.f32 %v13316_v28, %v7004_v10 }
 0x59e   : > { %v10188_v61 = vpop.eup %10187  ;;  %7405 = vst.msk [vmem:[%s13387_s22] sm:$0xff] %vm635_vm0, %v7373_v50  ;;  %v7281_v31 = vadd.f32 1.0, %v10186_v44  ;;  %v13397_v36 = vadd.f32 %v13321_v48, %v7124_v52 }
 0x59f   : > { %v10190_v53 = vpop.eup %10189  ;;  %10201 = vrcp.f32 %v7282_v18  ;;  %v7284_v47 = vadd.f32 1.0, %v10188_v61  ;;  %v13400_v21 = vadd.f32 %v13321_v48, %v7123_v23  ;;  %v9296_v59 = vpop.f32.mrb[142].mxu0 }
 0x5a0   : > { %10203 = vrcp.f32 %v7281_v31  ;;  %v7283_v6 = vadd.f32 1.0, %v10190_v53  ;;  %v8127_v46 = vmul.f32 -1.442695, %v13397_v36  ;;  %v7126_v55 = vmul.f32 %v9296_v59, %v13316_v28  ;;  %v7014_v60 = vpop.f32.mrb[143].mxu0 }
 0x5a1   : > { %10205 = vrcp.f32 %v7284_v47  ;;  %v8126_v25 = vmul.f32 -1.442695, %v13400_v21  ;;  %v7125_v3 = vmul.f32 %v13316_v28, %v7014_v60 }
 0x5a2   : > { %10207 = vrcp.f32 %v7283_v6  ;;  %v10192_v27 = vpop.eup %10191  ;;  %v13407_v22 = vadd.f32 %v13321_v48, %v7126_v55 }
 0x5a3   : > { %10209 = vpow2.f32 %v8124_v8  ;;  %v10194_v0 = vpop.eup %10193  ;;  %v7376_v24 = vmul.f32 %v10192_v27, %v13336_v62  ;;  %v13411_v17 = vadd.f32 %v13321_v48, %v7125_v3  ;;  %v9299_v15 = vpop.f32.mrb[144].mxu0 }
 0x5a4   : > { %10211 = vpow2.f32 %v8127_v46  ;;  %v10196_v56 = vpop.eup %10195  ;;  %v7375_v13 = vmul.f32 %v10194_v0, %v13339_v58  ;;  %v8129_v16 = vmul.f32 -1.442695, %v13407_v22  ;;  %v7128_v39 = vmul.f32 %v9299_v15, %v13316_v28  ;;  %v7024_v37 = vpop.f32.mrb[145].mxu0 }
 0x5a5   : > { %10213 = vpow2.f32 %v8126_v25  ;;  %v10198_v34 = vpop.eup %10197  ;;  %7408 = vst.msk [vmem:[%s13387_s22 + $0x18] sm:$0xff] %vm635_vm0, %v7376_v24  ;;  %v7286_v1 = vadd.f32 1.0, %v10196_v56  ;;  %v8128_v62 = vmul.f32 -1.442695, %v13411_v17  ;;  %v7127_v14 = vmul.f32 %v13316_v28, %v7024_v37 }
 0x5a6   : > { %7407 = vst.msk [vmem:[%s13387_s22 + $0x10] sm:$0xff] %vm635_vm0, %v7375_v13  ;;  %v7285_v45 = vadd.f32 1.0, %v10198_v34  ;;  %10215 = vpow2.f32 %v8129_v16  ;;  %v13423_v58 = vadd.f32 %v13321_v48, %v7128_v39 }
 0x5a7   : > { %v10200_v11 = vpop.eup %10199  ;;  %10217 = vrcp.f32 %v7286_v1  ;;  %v13426_v32 = vadd.f32 %v13321_v48, %v7127_v14  ;;  %v9302_v26 = vpop.f32.mrb[146].mxu0 }
 0x5a8   : > { %10219 = vrcp.f32 %v7285_v45  ;;  %v7288_v9 = vadd.f32 1.0, %v10200_v11  ;;  %v8131_v42 = vmul.f32 -1.442695, %v13423_v58  ;;  %v7130_v63 = vmul.f32 %v9302_v26, %v13316_v28  ;;  %v7034_v30 = vpop.f32.mrb[147].mxu0 }
 0x5a9   : > { %v10202_v4 = vpop.eup %10201  ;;  %10221 = vpow2.f32 %v8128_v62  ;;  %v8130_v57 = vmul.f32 -1.442695, %v13426_v32  ;;  %v7129_v20 = vmul.f32 %v13316_v28, %v7034_v30 }
 0x5aa   : > { %v10204_v38 = vpop.eup %10203  ;;  %v7378_v51 = vmul.f32 %v10202_v4, %v13346_v43  ;;  %10223 = vrcp.f32 %v7288_v9  ;;  %v13435_v35 = vadd.f32 %v13321_v48, %v7130_v63 }
 0x5ab   : > { %v10206_v49 = vpop.eup %10205  ;;  %v7377_v54 = vmul.f32 %v10204_v38, %v13349_v40  ;;  %10225 = vpow2.f32 %v8131_v42  ;;  %v13441_v43 = vadd.f32 %v13321_v48, %v7129_v20  ;;  %v9305_v29 = vpop.f32.mrb[148].mxu0 }
 0x5ac   : > { %v10208_v50 = vpop.eup %10207  ;;  %7410 = vst.msk [vmem:[%s13387_s22 + $0x28] sm:$0xff] %vm635_vm0, %v7378_v51  ;;  %v7380_v5 = vmul.f32 %v10206_v49, %v13356_v33  ;;  %10227 = vpow2.f32 %v8130_v57  ;;  %v8133_v18 = vmul.f32 -1.442695, %v13435_v35  ;;  %v7132_v52 = vmul.f32 %v9305_v29, %v13316_v28  ;;  %v7044_v10 = vpop.f32.mrb[149].mxu0 }
 0x5ad   : > { %v10210_v44 = vpop.eup %10209  ;;  %7409 = vst.msk [vmem:[%s13387_s22 + $0x20] sm:$0xff] %vm635_vm0, %v7377_v54  ;;  %v7379_v40 = vmul.f32 %v10208_v50, %v13359_v7  ;;  %v7131_v31 = vmul.f32 %v13316_v28, %v7044_v10  ;;  %v8132_v47 = vmul.f32 -1.442695, %v13441_v43 }
 0x5ae   : > { %v10212_v61 = vpop.eup %10211  ;;  %7412 = vst.msk [vmem:[%s13387_s22 + $0x38] sm:$0xff] %vm635_vm0, %v7380_v5  ;;  %v7287_v33 = vadd.f32 1.0, %v10210_v44  ;;  %10229 = vpow2.f32 %v8133_v18  ;;  %v13455_v7 = vadd.f32 %v13321_v48, %v7132_v52 }
 0x5af   : > { %v10214_v23 = vpop.eup %10213  ;;  %7411 = vst.msk [vmem:[%s13387_s22 + $0x30] sm:$0xff] %vm635_vm0, %v7379_v40  ;;  %v7290_v53 = vadd.f32 1.0, %v10212_v61  ;;  %v13458_v6 = vadd.f32 %v13321_v48, %v7131_v31  ;;  %v9308_v59 = vpop.f32.mrb[150].mxu0 }
 0x5b0   : > { %10231 = vrcp.f32 %v7287_v33  ;;  %v7289_v8 = vadd.f32 1.0, %v10214_v23  ;;  %v10216_v46 = vpop.eup %10215  ;;  %v8135_v55 = vmul.f32 -1.442695, %v13455_v7  ;;  %v7134_v60 = vmul.f32 %v9308_v59, %v13316_v28  ;;  %v7054_v25 = vpop.f32.mrb[151].mxu0 }
 0x5b1   : > { %10233 = vrcp.f32 %v7290_v53  ;;  %v10218_v3 = vpop.eup %10217  ;;  %v7292_v27 = vadd.f32 1.0, %v10216_v46  ;;  %v8134_v0 = vmul.f32 -1.442695, %v13458_v6  ;;  %v7133_v24 = vmul.f32 %v13316_v28, %v7054_v25 }
 0x5b2   : > { %10235 = vrcp.f32 %v7289_v8  ;;  %v10220_v15 = vpop.eup %10219  ;;  %v7382_v56 = vmul.f32 %v10218_v3, %v13367_v19  ;;  %v13466_v13 = vadd.f32 %v13321_v48, %v7134_v60 }
 0x5b3   : > { %10237 = vpow2.f32 %v8132_v47  ;;  %v10222_v16 = vpop.eup %10221  ;;  %v7381_v39 = vmul.f32 %v10220_v15, %v13370_v41  ;;  %v13470_v37 = vadd.f32 %v13321_v48, %v7133_v24  ;;  %v9311_v34 = vpop.f32.mrb[152].mxu0 }
 0x5b4   : > { %10239 = vrcp.f32 %v7292_v27  ;;  %v10224_v1 = vpop.eup %10223  ;;  %7414 = vst.msk [vmem:[%s13387_s22 + $0x48] sm:$0xff] %vm635_vm0, %v7382_v56  ;;  %v7291_v62 = vadd.f32 1.0, %v10222_v16  ;;  %v8137_v19 = vmul.f32 -1.442695, %v13466_v13  ;;  %v7136_v14 = vmul.f32 %v9311_v34, %v13316_v28  ;;  %v7064_v45 = vpop.f32.mrb[153].mxu0 }
 0x5b5   : > { %10241 = vpow2.f32 %v8135_v55  ;;  %v10226_v11 = vpop.eup %10225  ;;  %7413 = vst.msk [vmem:[%s13387_s22 + $0x40] sm:$0xff] %vm635_vm0, %v7381_v39  ;;  %v7384_v41 = vmul.f32 %v10224_v1, %v13379_v2  ;;  %v7135_v26 = vmul.f32 %v13316_v28, %v7064_v45  ;;  %v8136_v42 = vmul.f32 -1.442695, %v13470_v37 }
 0x5b6   : > { %10243 = vpow2.f32 %v8134_v0  ;;  %v10228_v4 = vpop.eup %10227  ;;  %v7294_v9 = vadd.f32 1.0, %v10226_v11  ;;  %v13482_v63 = vadd.f32 %v13321_v48, %v7136_v14 }
 0x5b7   : > { %10245 = vrcp.f32 %v7291_v62  ;;  %7416 = vst.msk [vmem:[%s13387_s22 + $0x58] sm:$0xff] %vm635_vm0, %v7384_v41  ;;  %v7293_v30 = vadd.f32 1.0, %v10228_v4  ;;  %v13487_v38 = vadd.f32 %v13321_v48, %v7135_v26  ;;  %v9314_v51 = vpop.f32.mrb[154].mxu0 }
 0x5b8   : > { %10247 = vpow2.f32 %v8137_v19  ;;  %v10230_v2 = vpop.eup %10229  ;;  %v8139_v57 = vmul.f32 -1.442695, %v13482_v63  ;;  %v7138_v20 = vmul.f32 %v9314_v51, %v13316_v28  ;;  %v7074_v49 = vpop.f32.mrb[155].mxu0 }
 0x5b9   : > { %10249 = vrcp.f32 %v7294_v9  ;;  %v7296_v50 = vadd.f32 1.0, %v10230_v2  ;;  %v8138_v5 = vmul.f32 -1.442695, %v13487_v38  ;;  %v7137_v29 = vmul.f32 %v13316_v28, %v7074_v49 }
 0x5ba   : > { %v10232_v54 = vpop.eup %10231  ;;  %10251 = vrcp.f32 %v7293_v30  ;;  %v13495_v18 = vadd.f32 %v13321_v48, %v7138_v20 }
 0x5bb   : > { %v10234_v44 = vpop.eup %10233  ;;  %v7383_v40 = vmul.f32 %v10232_v54, %v13383_v12  ;;  %10253 = vpow2.f32 %v8136_v42  ;;  %v13499_v61 = vadd.f32 %v13321_v48, %v7137_v29  ;;  %v9317_v33 = vpop.f32.mrb[156].mxu0 }
 0x5bc   : > { %v10236_v52 = vpop.eup %10235  ;;  %v7386_v10 = vmul.f32 %v10234_v44, %v13397_v36  ;;  %10255 = vrcp.f32 %v7296_v50  ;;  %v8141_v12 = vmul.f32 -1.442695, %v13495_v18  ;;  %v7140_v53 = vmul.f32 %v9317_v33, %v13316_v28  ;;  %v7084_v47 = vpop.f32.mrb[157].mxu0 }
 0x5bd   : > { %v10238_v31 = vpop.eup %10237  ;;  %7415 = vst.msk [vmem:[%s13387_s22 + $0x50] sm:$0xff] %vm635_vm0, %v7383_v40  ;;  %v7385_v23 = vmul.f32 %v10236_v52, %v13400_v21  ;;  %10257 = vpow2.f32 %v8139_v57  ;;  %v8140_v59 = vmul.f32 -1.442695, %v13499_v61  ;;  %v7139_v46 = vmul.f32 %v13316_v28, %v7084_v47 }
 0x5be   : > { %v10240_v8 = vpop.eup %10239  ;;  %7418 = vst.msk [vmem:[%s13387_s22 + $0x68] sm:$0xff] %vm635_vm0, %v7386_v10  ;;  %v7295_v36 = vadd.f32 1.0, %v10238_v31  ;;  %10259 = vpow2.f32 %v8138_v5  ;;  %v13514_v60 = vadd.f32 %v13321_v48, %v7140_v53 }
 0x5bf   : > { %v10242_v55 = vpop.eup %10241  ;;  %7417 = vst.msk [vmem:[%s13387_s22 + $0x60] sm:$0xff] %vm635_vm0, %v7385_v23  ;;  %v7388_v21 = vmul.f32 %v10240_v8, %v13407_v22  ;;  %10261 = vpow2.f32 %v8141_v12  ;;  %v13517_v27 = vadd.f32 %v13321_v48, %v7139_v46  ;;  %v9320_v0 = vpop.f32.mrb[158].mxu0 }
 0x5c0   : > { %v10244_v25 = vpop.eup %10243  ;;  %10263 = vrcp.f32 %v7295_v36  ;;  %v7298_v3 = vadd.f32 1.0, %v10242_v55  ;;  %v8143_v56 = vmul.f32 -1.442695, %v13514_v60  ;;  %v7142_v22 = vmul.f32 %v9320_v0, %v13316_v28  ;;  %v7094_v16 = vpop.f32.mrb[159].mxu0 }
 0x5c1   : > { %v10246_v24 = vpop.eup %10245  ;;  %7420 = vst.msk [vmem:[%s13387_s22 + $0x78] sm:$0xff] %vm635_vm0, %v7388_v21  ;;  %v7297_v15 = vadd.f32 1.0, %v10244_v25  ;;  %10265 = vpow2.f32 %v8140_v59  ;;  %v8142_v1 = vmul.f32 -1.442695, %v13517_v27  ;;  %v7141_v62 = vmul.f32 %v13316_v28, %v7094_v16 }
 0x5c2   : > { %v10248_v39 = vpop.eup %10247  ;;  %v7387_v34 = vmul.f32 %v10246_v24, %v13411_v17  ;;  %10267 = vrcp.f32 %v7298_v3  ;;  %v13527_v45 = vadd.f32 %v13321_v48, %v7142_v22 }
 0x5c3   : > { %v10250_v19 = vpop.eup %10249  ;;  %10269 = vrcp.f32 %v7297_v15  ;;  %v7300_v14 = vadd.f32 1.0, %v10248_v39  ;;  %v13533_v17 = vadd.f32 %v13321_v48, %v7141_v62 }
 0x5c4   : > { %v10252_v11 = vpop.eup %10251  ;;  %7419 = vst.msk [vmem:[%s13387_s22 + $0x70] sm:$0xff] %vm635_vm0, %v7387_v34  ;;  %v7390_v41 = vmul.f32 %v10250_v19, %v13423_v58  ;;  %10271 = vpow2.f32 %v8143_v56  ;;  %v8145_v28 = vmul.f32 -1.442695, %v13527_v45 }
 0x5c5   : > { %v10254_v26 = vpop.eup %10253  ;;  %v7389_v4 = vmul.f32 %v10252_v11, %v13426_v32  ;;  %10273 = vrcp.f32 %v7300_v14  ;;  %v8144_v30 = vmul.f32 -1.442695, %v13533_v17 }
 0x5c6   : > { %v10256_v9 = vpop.eup %10255  ;;  %7422 = vst.msk [vmem:[%s13387_s22 + $0x88] sm:$0xff] %vm635_vm0, %v7390_v41  ;;  %v7299_v42 = vadd.f32 1.0, %v10254_v26  ;;  %10275 = vpow2.f32 %v8142_v1 }
 0x5c7   : > { %v10258_v51 = vpop.eup %10257  ;;  %7421 = vst.msk [vmem:[%s13387_s22 + $0x80] sm:$0xff] %vm635_vm0, %v7389_v4  ;;  %v7392_v48 = vmul.f32 %v10256_v9, %v13435_v35  ;;  %10277 = vpow2.f32 %v8145_v28 }
 0x5c8   : > { %v10260_v58 = vpop.eup %10259  ;;  %10279 = vrcp.f32 %v7299_v42  ;;  %v7302_v32 = vadd.f32 1.0, %v10258_v51 }
 0x5c9   : > { %v10262_v2 = vpop.eup %10261  ;;  %7424 = vst.msk [vmem:[%s13387_s22 + $0x98] sm:$0xff] %vm635_vm0, %v7392_v48  ;;  %v7301_v57 = vadd.f32 1.0, %v10260_v58  ;;  %10281 = vpow2.f32 %v8144_v30 }
 0x5ca   : > { %v10264_v20 = vpop.eup %10263  ;;  %10283 = vrcp.f32 %v7302_v32  ;;  %v7304_v49 = vadd.f32 1.0, %v10262_v2 }
 0x5cb   : > { %v10266_v54 = vpop.eup %10265  ;;  %v7391_v50 = vmul.f32 %v10264_v20, %v13441_v43  ;;  %10285 = vrcp.f32 %v7301_v57 }
 0x5cc   : > { %v10268_v35 = vpop.eup %10267  ;;  %10287 = vrcp.f32 %v7304_v49  ;;  %v7303_v5 = vadd.f32 1.0, %v10266_v54 }
 0x5cd   : > { %v10270_v29 = vpop.eup %10269  ;;  %7423 = vst.msk [vmem:[%s13387_s22 + $0x90] sm:$0xff] %vm635_vm0, %v7391_v50  ;;  %v7394_v44 = vmul.f32 %v10268_v35, %v13455_v7 }
 0x5ce   : > { %v10272_v40 = vpop.eup %10271  ;;  %v7393_v52 = vmul.f32 %v10270_v29, %v13458_v6  ;;  %10289 = vrcp.f32 %v7303_v5 }
 0x5cf   : > { %v10274_v10 = vpop.eup %10273  ;;  %7426 = vst.msk [vmem:[%s13387_s22 + $0xa8] sm:$0xff] %vm635_vm0, %v7394_v44  ;;  %v7306_v33 = vadd.f32 1.0, %v10272_v40 }
 0x5d0   : > { %v10276_v31 = vpop.eup %10275  ;;  %7425 = vst.msk [vmem:[%s13387_s22 + $0xa0] sm:$0xff] %vm635_vm0, %v7393_v52  ;;  %v7396_v43 = vmul.f32 %v10274_v10, %v13466_v13 }
 0x5d1   : > { %v10278_v23 = vpop.eup %10277  ;;  %10291 = vrcp.f32 %v7306_v33  ;;  %v7305_v12 = vadd.f32 1.0, %v10276_v31 }
 0x5d2   : > { %v10280_v53 = vpop.eup %10279  ;;  %7428 = vst.msk [vmem:[%s13387_s22 + $0xb8] sm:$0xff] %vm635_vm0, %v7396_v43  ;;  %v7308_v7 = vadd.f32 1.0, %v10278_v23 }
 0x5d3   : > { %v10282_v6 = vpop.eup %10281  ;;  %v7395_v47 = vmul.f32 %v10280_v53, %v13470_v37  ;;  %10293 = vrcp.f32 %v7305_v12 }
 0x5d4   : > { %v10284_v8 = vpop.eup %10283  ;;  %10295 = vrcp.f32 %v7308_v7  ;;  %v7307_v36 = vadd.f32 1.0, %v10282_v6 }
 0x5d5   : > { %v10286_v59 = vpop.eup %10285  ;;  %7427 = vst.msk [vmem:[%s13387_s22 + $0xb0] sm:$0xff] %vm635_vm0, %v7395_v47  ;;  %v7398_v13 = vmul.f32 %v10284_v8, %v13482_v63 }
 0x5d6   : > { %v10288_v46 = vpop.eup %10287  ;;  %v7397_v55 = vmul.f32 %v10286_v59, %v13487_v38  ;;  %10297 = vrcp.f32 %v7307_v36 }
 0x5d7   : > { %7430 = vst.msk [vmem:[%s13387_s22 + $0xc8] sm:$0xff] %vm635_vm0, %v7398_v13  ;;  %v7400_v37 = vmul.f32 %v10288_v46, %v13495_v18 }
 0x5d8   : > { %v10290_v21 = vpop.eup %10289  ;;  %7429 = vst.msk [vmem:[%s13387_s22 + $0xc0] sm:$0xff] %vm635_vm0, %v7397_v55 }
 0x5d9   : > { %7432 = vst.msk [vmem:[%s13387_s22 + $0xd8] sm:$0xff] %vm635_vm0, %v7400_v37  ;;  %v7399_v25 = vmul.f32 %v10290_v21, %v13499_v61 }
 0x5db   : > { %v10292_v3 = vpop.eup %10291  ;;  %7431 = vst.msk [vmem:[%s13387_s22 + $0xd0] sm:$0xff] %vm635_vm0, %v7399_v25 }
 0x5dc   : > { %v7402_v63 = vmul.f32 %v10292_v3, %v13514_v60 }
 0x5dd   : > { %v10294_v38 = vpop.eup %10293 }
 0x5de   : > { %v10296_v18 = vpop.eup %10295  ;;  %7434 = vst.msk [vmem:[%s13387_s22 + $0xe8] sm:$0xff] %vm635_vm0, %v7402_v63  ;;  %v7401_v0 = vmul.f32 %v10294_v38, %v13517_v27 }
 0x5df   : > { %v7404_v24 = vmul.f32 %v10296_v18, %v13527_v45 }
 0x5e0   : > { %v10298_v15 = vpop.eup %10297  ;;  %7433 = vst.msk [vmem:[%s13387_s22 + $0xe0] sm:$0xff] %vm635_vm0, %v7401_v0 }
 0x5e1   : > { %7436 = vst.msk [vmem:[%s13387_s22 + $0xf8] sm:$0xff] %vm635_vm0, %v7404_v24  ;;  %v7403_v61 = vmul.f32 %v10298_v15, %v13533_v17 }
 0x5e3   : > { %7435 = vst.msk [vmem:[%s13387_s22 + $0xf0] sm:$0xff] %vm635_vm0, %v7403_v61 }
 0x5e4   : > { %10378 = shalt.err (!%p10375_p3)
}
 0x5e5   : > { %s10379_s27 = scalar_lea.hbm %s13584_s25, 4096  ;;  %s10383_s2 = scalar_lea.hbm %s13655_s19, 8192 }
 0x5e6   : > { %p10380_p4 = scmp.ne.s32.totalorder %s13584_s25, %s10379_s27  ;;  %p10384_p9 = scmp.lt.u32.totalorder %s13584_s25, %s13655_s19 }
 0x5e7   : > { %p10385_p10 = scmp.lt.u32.totalorder %s10383_s2, %s10379_s27  ;;  %p10387_p12 = scmp.lt.u32.totalorder %s10379_s27, %s13584_s25 }
 0x5e8   : > { %p10381_p7 = pnand %p10380_p4, %p10571_p5 }
 0x5e9   : > { %p10386_p11 = por %p10385_p10, %p10384_p9 }
 0x5ea   : > { %p10382_p8 = pneg %p10381_p7 }
 0x5eb   : > { %p10388_p13 = por %p10387_p12, %p10386_p11 }
 0x5ed   : > { %p10389_p0 = pnand %p10388_p13, %p10382_p8 }
 0x5ef   : > { %10392 = shalt.err (!%p10389_p0)
}
 0x5f0   : > { %s10431_s26 = smov 128   ;;  %s10432_s23 = smov 8  }
 0x5f1   : > { %9617 = dma.vmem_to_hbm [thread:$0]  (%p10571_p5), %s13586_s0, 4096, %s13584_s25, %s13595_s1, %s10431_s26, %s10431_s26, %s10432_s23  }
 0x5f2 PF: > { %s13973_s22 = sld [smem:[#allocation6_spill]]  ;;  %p9623_p1 = scmp.ge.s32.totalorder %s10427_s21, 2 }
 0x5f4   : > { %p9620_p2 = pnand %p9623_p1, %p10575_p6 }
 0x5f8   : > { %s7466_s24 = sand.u32 1, %s13973_s22  }
 0x5f9   : > { %s7467_s27 = scalar_lea.sflag [#allocation4], %s7466_s24 }
 0x5fa   : > { %10410 = dma.done.wait (!%p9620_p2), %s7467_s27, 4096  }
 0x5fb   : > { %10412 = vsyncadd (!%p9620_p2), %s7467_s27, 4294963200  ;;  %s13975_s21 = sld [smem:[#allocation8_spill]]  ;;  %s13976_s2 = sld [smem:[#allocation7_spill]] }
 0x5fc   : > { %s13977_s20 = sld [smem:[#allocation9_spill]]  ;;  %s13978_s0 = smov %s10419_s30 }
 0x601   : > { %p29_p3 = scmp.ge.s32.totalorder %s13975_s21, 4   ;;  %s13979_s30 = smov %s13976_s2 }
 0x603   :  { %31 = sbr.rel (!%p29_p3) target bundleno = 8 (0x8), region = 139 }
 0x60a   :  { %7472 = vsyncpa [#allocation4], 1 }
 0x60b   :  { %7474 = vsyncpa [#allocation4 + $0x1], 1 }

</bundles_post_ra>
